<compile_context>
chip_gen: v7x
topology: tpu7x:2x2x1
jax: 0.10.0
libtpu: 0.0.40
codegen_flags: <defaults>
</compile_context>

<pallas_src>
import jax
import jax.numpy as jnp
from jax.experimental import pallas as pl
from jax.experimental.pallas import tpu as pltpu

C_IN, C_OUT, K = 3, 2, 5
STRIDE, DIL = 3, 2
PAD_H, PAD_W = 1, 2
HALO = 3  # zero halo around x inside the kernel (covers every out-of-range tap, -2..+1)

# Polyphase tap tables.  Output row oh = 3*r + jh gets contributions only from kernel rows
# kh with 3 | (oh + PAD_H - DIL*kh); the matching input row is ih = r + ihb.
#   jh -> ((kh, ihb), ...)
H_TAPS = (
    ((2, -1),),            # oh % 3 == 0
    ((1, 0), (4, -2)),     # oh % 3 == 1
    ((0, 1), (3, -1)),     # oh % 3 == 2
)
# Same along W (PAD_W = 2): ow = 3*c + jw, iw = c + iwb.
W_TAPS = (
    ((1, 0), (4, -2)),     # ow % 3 == 0
    ((0, 1), (3, -1)),     # ow % 3 == 1
    ((2, 0),),             # ow % 3 == 2
)


def _make_kernel(H, W):
    HP = H + 2          # padded per-phase output rows (>= valid rows of every phase)
    WP = W + 1          # padded per-phase output cols
    inv6 = 1.0 / 6.0

    def kernel(w_ref, x_ref, o_ref, xp_ref):
        # w_ref : SMEM (C_IN*C_OUT*K*K,) raw ConvTranspose2d weights (PyTorch ci,co,kh,kw order)
        # x_ref : VMEM (1, C_IN, H, W) compact input block for batch n
        # o_ref : VMEM (1, C_OUT*9, HP, WP) phase-blocked output
        # xp_ref: VMEM (C_IN, H+2*HALO, W+2*HALO) zero-haloed copy of x
        #
        # Rebuilt every step (NOT gated on program_id): the grid axis is "parallel", so on
        # v7x each TensorCore has its own scratch instance and only one of them would ever
        # see program_id(0)==0.  Cost is ~a dozen small vector stores.
        xp_ref[...] = jnp.zeros_like(xp_ref)
        for ci in range(C_IN):
            xp_ref[ci, HALO:HALO + H, HALO:HALO + W] = x_ref[0, ci, :, :]

        # jw outer: the lane-shifted column loads below are jh-invariant, so each is loaded
        # exactly once per W-phase and reused across all 3 H-phases, all kh taps and both
        # output channels.
        for jw in range(STRIDE):
            cols = {}
            for ci in range(C_IN):
                for (_, iwb) in W_TAPS[jw]:
                    # lane-offset slice of the haloed input, shape (H+2*HALO, WP)
                    cols[(ci, iwb)] = xp_ref[ci, :, HALO + iwb:HALO + iwb + WP]

            for jh in range(STRIDE):
                acc = [None] * C_OUT   # initialised from the first tap's product
                for ci in range(C_IN):
                    for (kw, iwb) in W_TAPS[jw]:
                        col = cols[(ci, iwb)]
                        for (kh, ihb) in H_TAPS[jh]:
                            # sublane-offset slice of the hoisted column, shape (HP, WP)
                            patch = col[HALO + ihb:HALO + ihb + HP, :]
                            for co in range(C_OUT):
                                wv = w_ref[((ci * C_OUT + co) * K + kh) * K + kw]
                                t = patch * wv
                                acc[co] = t if acc[co] is None else acc[co] + t
                for co in range(C_OUT):
                    plane = (co * STRIDE + jh) * STRIDE + jw
                    res = jnp.clip(acc[co] + 3.0, 0.0, 6.0) * inv6
                    o_ref[0, plane, :, :] = res.astype(o_ref.dtype)

    return kernel, HP, WP


def conv_transpose_hardsigmoid(x, weight):
    """x: (N, C_IN, H, W) f32; weight: (C_IN, C_OUT, K, K) f32 (PyTorch ConvTranspose2d layout)."""
    N, C, H, W = x.shape
    assert C == C_IN
    H_out = (H - 1) * STRIDE - 2 * PAD_H + DIL * (K - 1) + 1
    W_out = (W - 1) * STRIDE - 2 * PAD_W + DIL * (K - 1) + 1

    kernel, HP, WP = _make_kernel(H, W)
    w_flat = weight.reshape(-1).astype(jnp.float32)
    n_planes = C_OUT * STRIDE * STRIDE

    phase_out = pl.pallas_call(
        kernel,
        out_shape=jax.ShapeDtypeStruct((N, n_planes, HP, WP), x.dtype),
        grid_spec=pltpu.PrefetchScalarGridSpec(
            num_scalar_prefetch=0,
            grid=(N,),
            in_specs=[
                pl.BlockSpec(memory_space=pltpu.MemorySpace.SMEM),
                pl.BlockSpec((1, C_IN, H, W), lambda n: (n, 0, 0, 0)),
            ],
            out_specs=pl.BlockSpec((1, n_planes, HP, WP), lambda n: (n, 0, 0, 0)),
            scratch_shapes=[
                pltpu.VMEM((C_IN, H + 2 * HALO, W + 2 * HALO), jnp.float32),
            ],
        ),
        compiler_params=pltpu.CompilerParams(dimension_semantics=("parallel",)),
    )(w_flat, x)

    # Interleave the 3x3 phases: (N, C_OUT, jh, jw, r, c) -> oh = 3r + jh, ow = 3c + jw.
    # Kept in the wrapper: an in-kernel full interleave would need lane-strided stores or
    # lane-upsampling gathers (both fragile in Mosaic); this is a single small fused XLA op
    # on ~88 KiB of output.
    y = phase_out.reshape(N, C_OUT, STRIDE, STRIDE, HP, WP)
    y = y.transpose(0, 1, 4, 2, 5, 3).reshape(N, C_OUT, STRIDE * HP, STRIDE * WP)
    return y[:, :, :H_out, :W_out]


if __name__ == "__main__":
    key = jax.random.PRNGKey(0)
    kx, kw = jax.random.split(key)

    N, H, W = 2, 16, 16
    x = jax.random.normal(kx, (N, C_IN, H, W), dtype=jnp.float32)
    # deterministic synthetic weights, PyTorch ConvTranspose2d layout (C_in, C_out, K, K)
    weight = 0.1 * jax.random.normal(kw, (C_IN, C_OUT, K, K), dtype=jnp.float32)

    out = jax.block_until_ready(conv_transpose_hardsigmoid(x, weight))

    # independent XLA reference: transposed conv == dilated conv of the zero-stuffed input
    # with the flipped / channel-transposed kernel.
    pad_h_eff = DIL * (K - 1) - PAD_H
    pad_w_eff = DIL * (K - 1) - PAD_W
    w_flip = jnp.flip(jnp.transpose(weight, (1, 0, 2, 3)), axis=(2, 3))
    ref = jax.lax.conv_general_dilated(
        x, w_flip,
        window_strides=(1, 1),
        padding=((pad_h_eff, pad_h_eff), (pad_w_eff, pad_w_eff)),
        lhs_dilation=(STRIDE, STRIDE),
        rhs_dilation=(DIL, DIL),
        dimension_numbers=("NCHW", "OIHW", "NCHW"))
    ref = jnp.clip(ref + 3.0, 0.0, 6.0) / 6.0

    H_out = (H - 1) * STRIDE - 2 * PAD_H + DIL * (K - 1) + 1
    W_out = (W - 1) * STRIDE - 2 * PAD_W + DIL * (K - 1) + 1
    assert out.shape == (N, C_OUT, H_out, W_out)
    assert jnp.allclose(out, ref, atol=1e-5, rtol=1e-5)
    print("KERNEL_OK")
</pallas_src>

<mosaic_0001>
module attributes {stable_mosaic.version = 11 : i64} {
  func.func @kernel(%arg0: i32, %arg1: memref<150xf32, #tpu.memory_space<smem>>, %arg2: memref<1x3x16x16xf32, #tpu.memory_space<vmem>>, %arg3: memref<1x18x18x17xf32, #tpu.memory_space<vmem>>, %arg4: memref<3x22x22xf32, #tpu.memory_space<vmem>>) attributes {dimension_semantics = [#tpu.dimension_semantics<parallel>], iteration_bounds = array<i64: 2>, scalar_prefetch = 0 : i64, scratch_operands = 1 : i64, tpu.core_type = #tpu.core_type<tc>, window_params = [{transform_indices = @transform_0, window_bounds = array<i64: 150>}, {transform_indices = @transform_1, window_bounds = array<i64: 1, 3, 16, 16>}, {transform_indices = @transform_2, window_bounds = array<i64: 1, 18, 18, 17>}]} {
    %cst = arith.constant 0.000000e+00 : f32
    %0 = vector.broadcast %cst : f32 to vector<3x22x22xf32>
    %c0 = arith.constant 0 : index
    %c0_0 = arith.constant 0 : index
    %c0_1 = arith.constant 0 : index
    %1 = vector.load %arg4[%c0, %c0_0, %c0_1] : memref<3x22x22xf32, #tpu.memory_space<vmem>>, vector<3x22x22xf32>
    tpu.vector_store %arg4[%c0, %c0_0, %c0_1], %0 {strides = array<i32>} : memref<3x22x22xf32, #tpu.memory_space<vmem>>, vector<3x22x22xf32>,
    %c0_2 = arith.constant 0 : index
    %c0_3 = arith.constant 0 : index
    %c0_4 = arith.constant 0 : index
    %c0_5 = arith.constant 0 : index
    %2 = vector.load %arg2[%c0_2, %c0_3, %c0_4, %c0_5] : memref<1x3x16x16xf32, #tpu.memory_space<vmem>>, vector<1x1x16x16xf32>
    %3 = vector.shape_cast %2 : vector<1x1x16x16xf32> to vector<16x16xf32>
    %c0_6 = arith.constant 0 : index
    %c3 = arith.constant 3 : index
    %c3_7 = arith.constant 3 : index
    %4 = vector.load %arg4[%c0_6, %c3, %c3_7] : memref<3x22x22xf32, #tpu.memory_space<vmem>>, vector<1x16x16xf32>
    %5 = vector.shape_cast %4 : vector<1x16x16xf32> to vector<16x16xf32>
    %6 = vector.shape_cast %3 : vector<16x16xf32> to vector<1x16x16xf32>
    tpu.vector_store %arg4[%c0_6, %c3, %c3_7], %6 {strides = array<i32>} : memref<3x22x22xf32, #tpu.memory_space<vmem>>, vector<1x16x16xf32>,
    %c0_8 = arith.constant 0 : index
    %c1 = arith.constant 1 : index
    %c0_9 = arith.constant 0 : index
    %c0_10 = arith.constant 0 : index
    %7 = vector.load %arg2[%c0_8, %c1, %c0_9, %c0_10] : memref<1x3x16x16xf32, #tpu.memory_space<vmem>>, vector<1x1x16x16xf32>
    %8 = vector.shape_cast %7 : vector<1x1x16x16xf32> to vector<16x16xf32>
    %c1_11 = arith.constant 1 : index
    %c3_12 = arith.constant 3 : index
    %c3_13 = arith.constant 3 : index
    %9 = vector.load %arg4[%c1_11, %c3_12, %c3_13] : memref<3x22x22xf32, #tpu.memory_space<vmem>>, vector<1x16x16xf32>
    %10 = vector.shape_cast %9 : vector<1x16x16xf32> to vector<16x16xf32>
    %11 = vector.shape_cast %8 : vector<16x16xf32> to vector<1x16x16xf32>
    tpu.vector_store %arg4[%c1_11, %c3_12, %c3_13], %11 {strides = array<i32>} : memref<3x22x22xf32, #tpu.memory_space<vmem>>, vector<1x16x16xf32>,
    %c0_14 = arith.constant 0 : index
    %c2 = arith.constant 2 : index
    %c0_15 = arith.constant 0 : index
    %c0_16 = arith.constant 0 : index
    %12 = vector.load %arg2[%c0_14, %c2, %c0_15, %c0_16] : memref<1x3x16x16xf32, #tpu.memory_space<vmem>>, vector<1x1x16x16xf32>
    %13 = vector.shape_cast %12 : vector<1x1x16x16xf32> to vector<16x16xf32>
    %c2_17 = arith.constant 2 : index
    %c3_18 = arith.constant 3 : index
    %c3_19 = arith.constant 3 : index
    %14 = vector.load %arg4[%c2_17, %c3_18, %c3_19] : memref<3x22x22xf32, #tpu.memory_space<vmem>>, vector<1x16x16xf32>
    %15 = vector.shape_cast %14 : vector<1x16x16xf32> to vector<16x16xf32>
    %16 = vector.shape_cast %13 : vector<16x16xf32> to vector<1x16x16xf32>
    tpu.vector_store %arg4[%c2_17, %c3_18, %c3_19], %16 {strides = array<i32>} : memref<3x22x22xf32, #tpu.memory_space<vmem>>, vector<1x16x16xf32>,
    %c0_20 = arith.constant 0 : index
    %c0_21 = arith.constant 0 : index
    %c3_22 = arith.constant 3 : index
    %17 = vector.load %arg4[%c0_20, %c0_21, %c3_22] : memref<3x22x22xf32, #tpu.memory_space<vmem>>, vector<1x22x17xf32>
    %18 = vector.shape_cast %17 : vector<1x22x17xf32> to vector<22x17xf32>
    %c0_23 = arith.constant 0 : index
    %c0_24 = arith.constant 0 : index
    %c1_25 = arith.constant 1 : index
    %19 = vector.load %arg4[%c0_23, %c0_24, %c1_25] : memref<3x22x22xf32, #tpu.memory_space<vmem>>, vector<1x22x17xf32>
    %20 = vector.shape_cast %19 : vector<1x22x17xf32> to vector<22x17xf32>
    %c1_26 = arith.constant 1 : index
    %c0_27 = arith.constant 0 : index
    %c3_28 = arith.constant 3 : index
    %21 = vector.load %arg4[%c1_26, %c0_27, %c3_28] : memref<3x22x22xf32, #tpu.memory_space<vmem>>, vector<1x22x17xf32>
    %22 = vector.shape_cast %21 : vector<1x22x17xf32> to vector<22x17xf32>
    %c1_29 = arith.constant 1 : index
    %c0_30 = arith.constant 0 : index
    %c1_31 = arith.constant 1 : index
    %23 = vector.load %arg4[%c1_29, %c0_30, %c1_31] : memref<3x22x22xf32, #tpu.memory_space<vmem>>, vector<1x22x17xf32>
    %24 = vector.shape_cast %23 : vector<1x22x17xf32> to vector<22x17xf32>
    %c2_32 = arith.constant 2 : index
    %c0_33 = arith.constant 0 : index
    %c3_34 = arith.constant 3 : index
    %25 = vector.load %arg4[%c2_32, %c0_33, %c3_34] : memref<3x22x22xf32, #tpu.memory_space<vmem>>, vector<1x22x17xf32>
    %26 = vector.shape_cast %25 : vector<1x22x17xf32> to vector<22x17xf32>
    %c2_35 = arith.constant 2 : index
    %c0_36 = arith.constant 0 : index
    %c1_37 = arith.constant 1 : index
    %27 = vector.load %arg4[%c2_35, %c0_36, %c1_37] : memref<3x22x22xf32, #tpu.memory_space<vmem>>, vector<1x22x17xf32>
    %28 = vector.shape_cast %27 : vector<1x22x17xf32> to vector<22x17xf32>
    %29 = vector.extract_strided_slice %18 {offsets = [2, 0], sizes = [18, 17], strides = [1, 1]} : vector<22x17xf32> to vector<18x17xf32>
    %c11 = arith.constant 11 : index
    %30 = memref.load %arg1[%c11] : memref<150xf32, #tpu.memory_space<smem>>
    %31 = vector.broadcast %30 : f32 to vector<18x17xf32>
    %32 = arith.mulf %29, %31 : vector<18x17xf32>
    %c36 = arith.constant 36 : index
    %33 = memref.load %arg1[%c36] : memref<150xf32, #tpu.memory_space<smem>>
    %34 = vector.broadcast %33 : f32 to vector<18x17xf32>
    %35 = arith.mulf %29, %34 : vector<18x17xf32>
    %36 = vector.extract_strided_slice %20 {offsets = [2, 0], sizes = [18, 17], strides = [1, 1]} : vector<22x17xf32> to vector<18x17xf32>
    %c14 = arith.constant 14 : index
    %37 = memref.load %arg1[%c14] : memref<150xf32, #tpu.memory_space<smem>>
    %38 = vector.broadcast %37 : f32 to vector<18x17xf32>
    %39 = arith.mulf %36, %38 : vector<18x17xf32>
    %40 = arith.addf %32, %39 : vector<18x17xf32>
    %c39 = arith.constant 39 : index
    %41 = memref.load %arg1[%c39] : memref<150xf32, #tpu.memory_space<smem>>
    %42 = vector.broadcast %41 : f32 to vector<18x17xf32>
    %43 = arith.mulf %36, %42 : vector<18x17xf32>
    %44 = arith.addf %35, %43 : vector<18x17xf32>
    %45 = vector.extract_strided_slice %22 {offsets = [2, 0], sizes = [18, 17], strides = [1, 1]} : vector<22x17xf32> to vector<18x17xf32>
    %c61 = arith.constant 61 : index
    %46 = memref.load %arg1[%c61] : memref<150xf32, #tpu.memory_space<smem>>
    %47 = vector.broadcast %46 : f32 to vector<18x17xf32>
    %48 = arith.mulf %45, %47 : vector<18x17xf32>
    %49 = arith.addf %40, %48 : vector<18x17xf32>
    %c86 = arith.constant 86 : index
    %50 = memref.load %arg1[%c86] : memref<150xf32, #tpu.memory_space<smem>>
    %51 = vector.broadcast %50 : f32 to vector<18x17xf32>
    %52 = arith.mulf %45, %51 : vector<18x17xf32>
    %53 = arith.addf %44, %52 : vector<18x17xf32>
    %54 = vector.extract_strided_slice %24 {offsets = [2, 0], sizes = [18, 17], strides = [1, 1]} : vector<22x17xf32> to vector<18x17xf32>
    %c64 = arith.constant 64 : index
    %55 = memref.load %arg1[%c64] : memref<150xf32, #tpu.memory_space<smem>>
    %56 = vector.broadcast %55 : f32 to vector<18x17xf32>
    %57 = arith.mulf %54, %56 : vector<18x17xf32>
    %58 = arith.addf %49, %57 : vector<18x17xf32>
    %c89 = arith.constant 89 : index
    %59 = memref.load %arg1[%c89] : memref<150xf32, #tpu.memory_space<smem>>
    %60 = vector.broadcast %59 : f32 to vector<18x17xf32>
    %61 = arith.mulf %54, %60 : vector<18x17xf32>
    %62 = arith.addf %53, %61 : vector<18x17xf32>
    %63 = vector.extract_strided_slice %26 {offsets = [2, 0], sizes = [18, 17], strides = [1, 1]} : vector<22x17xf32> to vector<18x17xf32>
    %c111 = arith.constant 111 : index
    %64 = memref.load %arg1[%c111] : memref<150xf32, #tpu.memory_space<smem>>
    %65 = vector.broadcast %64 : f32 to vector<18x17xf32>
    %66 = arith.mulf %63, %65 : vector<18x17xf32>
    %67 = arith.addf %58, %66 : vector<18x17xf32>
    %c136 = arith.constant 136 : index
    %68 = memref.load %arg1[%c136] : memref<150xf32, #tpu.memory_space<smem>>
    %69 = vector.broadcast %68 : f32 to vector<18x17xf32>
    %70 = arith.mulf %63, %69 : vector<18x17xf32>
    %71 = arith.addf %62, %70 : vector<18x17xf32>
    %72 = vector.extract_strided_slice %28 {offsets = [2, 0], sizes = [18, 17], strides = [1, 1]} : vector<22x17xf32> to vector<18x17xf32>
    %c114 = arith.constant 114 : index
    %73 = memref.load %arg1[%c114] : memref<150xf32, #tpu.memory_space<smem>>
    %74 = vector.broadcast %73 : f32 to vector<18x17xf32>
    %75 = arith.mulf %72, %74 : vector<18x17xf32>
    %76 = arith.addf %67, %75 : vector<18x17xf32>
    %c139 = arith.constant 139 : index
    %77 = memref.load %arg1[%c139] : memref<150xf32, #tpu.memory_space<smem>>
    %78 = vector.broadcast %77 : f32 to vector<18x17xf32>
    %79 = arith.mulf %72, %78 : vector<18x17xf32>
    %80 = arith.addf %71, %79 : vector<18x17xf32>
    %cst_38 = arith.constant 3.000000e+00 : f32
    %81 = vector.broadcast %cst_38 : f32 to vector<18x17xf32>
    %82 = arith.addf %76, %81 : vector<18x17xf32>
    %cst_39 = arith.constant 0.000000e+00 : f32
    %cst_40 = arith.constant 6.000000e+00 : f32
    %83 = vector.broadcast %cst_39 : f32 to vector<18x17xf32>
    %84 = arith.maximumf %83, %82 : vector<18x17xf32>
    %85 = vector.broadcast %cst_40 : f32 to vector<18x17xf32>
    %86 = arith.minimumf %85, %84 : vector<18x17xf32>
    %cst_41 = arith.constant 0.166666672 : f32
    %87 = vector.broadcast %cst_41 : f32 to vector<18x17xf32>
    %88 = arith.mulf %86, %87 : vector<18x17xf32>
    %c0_42 = arith.constant 0 : index
    %c0_43 = arith.constant 0 : index
    %c0_44 = arith.constant 0 : index
    %c0_45 = arith.constant 0 : index
    %89 = vector.load %arg3[%c0_42, %c0_43, %c0_44, %c0_45] : memref<1x18x18x17xf32, #tpu.memory_space<vmem>>, vector<1x1x18x17xf32>
    %90 = vector.shape_cast %89 : vector<1x1x18x17xf32> to vector<18x17xf32>
    %91 = vector.shape_cast %88 : vector<18x17xf32> to vector<1x1x18x17xf32>
    tpu.vector_store %arg3[%c0_42, %c0_43, %c0_44, %c0_45], %91 {strides = array<i32>} : memref<1x18x18x17xf32, #tpu.memory_space<vmem>>, vector<1x1x18x17xf32>,
    %cst_46 = arith.constant 3.000000e+00 : f32
    %92 = vector.broadcast %cst_46 : f32 to vector<18x17xf32>
    %93 = arith.addf %80, %92 : vector<18x17xf32>
    %cst_47 = arith.constant 0.000000e+00 : f32
    %cst_48 = arith.constant 6.000000e+00 : f32
    %94 = vector.broadcast %cst_47 : f32 to vector<18x17xf32>
    %95 = arith.maximumf %94, %93 : vector<18x17xf32>
    %96 = vector.broadcast %cst_48 : f32 to vector<18x17xf32>
    %97 = arith.minimumf %96, %95 : vector<18x17xf32>
    %cst_49 = arith.constant 0.166666672 : f32
    %98 = vector.broadcast %cst_49 : f32 to vector<18x17xf32>
    %99 = arith.mulf %97, %98 : vector<18x17xf32>
    %c0_50 = arith.constant 0 : index
    %c9 = arith.constant 9 : index
    %c0_51 = arith.constant 0 : index
    %c0_52 = arith.constant 0 : index
    %100 = vector.load %arg3[%c0_50, %c9, %c0_51, %c0_52] : memref<1x18x18x17xf32, #tpu.memory_space<vmem>>, vector<1x1x18x17xf32>
    %101 = vector.shape_cast %100 : vector<1x1x18x17xf32> to vector<18x17xf32>
    %102 = vector.shape_cast %99 : vector<18x17xf32> to vector<1x1x18x17xf32>
    tpu.vector_store %arg3[%c0_50, %c9, %c0_51, %c0_52], %102 {strides = array<i32>} : memref<1x18x18x17xf32, #tpu.memory_space<vmem>>, vector<1x1x18x17xf32>,
    %103 = vector.extract_strided_slice %18 {offsets = [3, 0], sizes = [18, 17], strides = [1, 1]} : vector<22x17xf32> to vector<18x17xf32>
    %c6 = arith.constant 6 : index
    %104 = memref.load %arg1[%c6] : memref<150xf32, #tpu.memory_space<smem>>
    %105 = vector.broadcast %104 : f32 to vector<18x17xf32>
    %106 = arith.mulf %103, %105 : vector<18x17xf32>
    %c31 = arith.constant 31 : index
    %107 = memref.load %arg1[%c31] : memref<150xf32, #tpu.memory_space<smem>>
    %108 = vector.broadcast %107 : f32 to vector<18x17xf32>
    %109 = arith.mulf %103, %108 : vector<18x17xf32>
    %110 = vector.extract_strided_slice %18 {offsets = [1, 0], sizes = [18, 17], strides = [1, 1]} : vector<22x17xf32> to vector<18x17xf32>
    %c21 = arith.constant 21 : index
    %111 = memref.load %arg1[%c21] : memref<150xf32, #tpu.memory_space<smem>>
    %112 = vector.broadcast %111 : f32 to vector<18x17xf32>
    %113 = arith.mulf %110, %112 : vector<18x17xf32>
    %114 = arith.addf %106, %113 : vector<18x17xf32>
    %c46 = arith.constant 46 : index
    %115 = memref.load %arg1[%c46] : memref<150xf32, #tpu.memory_space<smem>>
    %116 = vector.broadcast %115 : f32 to vector<18x17xf32>
    %117 = arith.mulf %110, %116 : vector<18x17xf32>
    %118 = arith.addf %109, %117 : vector<18x17xf32>
    %119 = vector.extract_strided_slice %20 {offsets = [3, 0], sizes = [18, 17], strides = [1, 1]} : vector<22x17xf32> to vector<18x17xf32>
    %c9_53 = arith.constant 9 : index
    %120 = memref.load %arg1[%c9_53] : memref<150xf32, #tpu.memory_space<smem>>
    %121 = vector.broadcast %120 : f32 to vector<18x17xf32>
    %122 = arith.mulf %119, %121 : vector<18x17xf32>
    %123 = arith.addf %114, %122 : vector<18x17xf32>
    %c34 = arith.constant 34 : index
    %124 = memref.load %arg1[%c34] : memref<150xf32, #tpu.memory_space<smem>>
    %125 = vector.broadcast %124 : f32 to vector<18x17xf32>
    %126 = arith.mulf %119, %125 : vector<18x17xf32>
    %127 = arith.addf %118, %126 : vector<18x17xf32>
    %128 = vector.extract_strided_slice %20 {offsets = [1, 0], sizes = [18, 17], strides = [1, 1]} : vector<22x17xf32> to vector<18x17xf32>
    %c24 = arith.constant 24 : index
    %129 = memref.load %arg1[%c24] : memref<150xf32, #tpu.memory_space<smem>>
    %130 = vector.broadcast %129 : f32 to vector<18x17xf32>
    %131 = arith.mulf %128, %130 : vector<18x17xf32>
    %132 = arith.addf %123, %131 : vector<18x17xf32>
    %c49 = arith.constant 49 : index
    %133 = memref.load %arg1[%c49] : memref<150xf32, #tpu.memory_space<smem>>
    %134 = vector.broadcast %133 : f32 to vector<18x17xf32>
    %135 = arith.mulf %128, %134 : vector<18x17xf32>
    %136 = arith.addf %127, %135 : vector<18x17xf32>
    %137 = vector.extract_strided_slice %22 {offsets = [3, 0], sizes = [18, 17], strides = [1, 1]} : vector<22x17xf32> to vector<18x17xf32>
    %c56 = arith.constant 56 : index
    %138 = memref.load %arg1[%c56] : memref<150xf32, #tpu.memory_space<smem>>
    %139 = vector.broadcast %138 : f32 to vector<18x17xf32>
    %140 = arith.mulf %137, %139 : vector<18x17xf32>
    %141 = arith.addf %132, %140 : vector<18x17xf32>
    %c81 = arith.constant 81 : index
    %142 = memref.load %arg1[%c81] : memref<150xf32, #tpu.memory_space<smem>>
    %143 = vector.broadcast %142 : f32 to vector<18x17xf32>
    %144 = arith.mulf %137, %143 : vector<18x17xf32>
    %145 = arith.addf %136, %144 : vector<18x17xf32>
    %146 = vector.extract_strided_slice %22 {offsets = [1, 0], sizes = [18, 17], strides = [1, 1]} : vector<22x17xf32> to vector<18x17xf32>
    %c71 = arith.constant 71 : index
    %147 = memref.load %arg1[%c71] : memref<150xf32, #tpu.memory_space<smem>>
    %148 = vector.broadcast %147 : f32 to vector<18x17xf32>
    %149 = arith.mulf %146, %148 : vector<18x17xf32>
    %150 = arith.addf %141, %149 : vector<18x17xf32>
    %c96 = arith.constant 96 : index
    %151 = memref.load %arg1[%c96] : memref<150xf32, #tpu.memory_space<smem>>
    %152 = vector.broadcast %151 : f32 to vector<18x17xf32>
    %153 = arith.mulf %146, %152 : vector<18x17xf32>
    %154 = arith.addf %145, %153 : vector<18x17xf32>
    %155 = vector.extract_strided_slice %24 {offsets = [3, 0], sizes = [18, 17], strides = [1, 1]} : vector<22x17xf32> to vector<18x17xf32>
    %c59 = arith.constant 59 : index
    %156 = memref.load %arg1[%c59] : memref<150xf32, #tpu.memory_space<smem>>
    %157 = vector.broadcast %156 : f32 to vector<18x17xf32>
    %158 = arith.mulf %155, %157 : vector<18x17xf32>
    %159 = arith.addf %150, %158 : vector<18x17xf32>
    %c84 = arith.constant 84 : index
    %160 = memref.load %arg1[%c84] : memref<150xf32, #tpu.memory_space<smem>>
    %161 = vector.broadcast %160 : f32 to vector<18x17xf32>
    %162 = arith.mulf %155, %161 : vector<18x17xf32>
    %163 = arith.addf %154, %162 : vector<18x17xf32>
    %164 = vector.extract_strided_slice %24 {offsets = [1, 0], sizes = [18, 17], strides = [1, 1]} : vector<22x17xf32> to vector<18x17xf32>
    %c74 = arith.constant 74 : index
    %165 = memref.load %arg1[%c74] : memref<150xf32, #tpu.memory_space<smem>>
    %166 = vector.broadcast %165 : f32 to vector<18x17xf32>
    %167 = arith.mulf %164, %166 : vector<18x17xf32>
    %168 = arith.addf %159, %167 : vector<18x17xf32>
    %c99 = arith.constant 99 : index
    %169 = memref.load %arg1[%c99] : memref<150xf32, #tpu.memory_space<smem>>
    %170 = vector.broadcast %169 : f32 to vector<18x17xf32>
    %171 = arith.mulf %164, %170 : vector<18x17xf32>
    %172 = arith.addf %163, %171 : vector<18x17xf32>
    %173 = vector.extract_strided_slice %26 {offsets = [3, 0], sizes = [18, 17], strides = [1, 1]} : vector<22x17xf32> to vector<18x17xf32>
    %c106 = arith.constant 106 : index
    %174 = memref.load %arg1[%c106] : memref<150xf32, #tpu.memory_space<smem>>
    %175 = vector.broadcast %174 : f32 to vector<18x17xf32>
    %176 = arith.mulf %173, %175 : vector<18x17xf32>
    %177 = arith.addf %168, %176 : vector<18x17xf32>
    %c131 = arith.constant 131 : index
    %178 = memref.load %arg1[%c131] : memref<150xf32, #tpu.memory_space<smem>>
    %179 = vector.broadcast %178 : f32 to vector<18x17xf32>
    %180 = arith.mulf %173, %179 : vector<18x17xf32>
    %181 = arith.addf %172, %180 : vector<18x17xf32>
    %182 = vector.extract_strided_slice %26 {offsets = [1, 0], sizes = [18, 17], strides = [1, 1]} : vector<22x17xf32> to vector<18x17xf32>
    %c121 = arith.constant 121 : index
    %183 = memref.load %arg1[%c121] : memref<150xf32, #tpu.memory_space<smem>>
    %184 = vector.broadcast %183 : f32 to vector<18x17xf32>
    %185 = arith.mulf %182, %184 : vector<18x17xf32>
    %186 = arith.addf %177, %185 : vector<18x17xf32>
    %c146 = arith.constant 146 : index
    %187 = memref.load %arg1[%c146] : memref<150xf32, #tpu.memory_space<smem>>
    %188 = vector.broadcast %187 : f32 to vector<18x17xf32>
    %189 = arith.mulf %182, %188 : vector<18x17xf32>
    %190 = arith.addf %181, %189 : vector<18x17xf32>
    %191 = vector.extract_strided_slice %28 {offsets = [3, 0], sizes = [18, 17], strides = [1, 1]} : vector<22x17xf32> to vector<18x17xf32>
    %c109 = arith.constant 109 : index
    %192 = memref.load %arg1[%c109] : memref<150xf32, #tpu.memory_space<smem>>
    %193 = vector.broadcast %192 : f32 to vector<18x17xf32>
    %194 = arith.mulf %191, %193 : vector<18x17xf32>
    %195 = arith.addf %186, %194 : vector<18x17xf32>
    %c134 = arith.constant 134 : index
    %196 = memref.load %arg1[%c134] : memref<150xf32, #tpu.memory_space<smem>>
    %197 = vector.broadcast %196 : f32 to vector<18x17xf32>
    %198 = arith.mulf %191, %197 : vector<18x17xf32>
    %199 = arith.addf %190, %198 : vector<18x17xf32>
    %200 = vector.extract_strided_slice %28 {offsets = [1, 0], sizes = [18, 17], strides = [1, 1]} : vector<22x17xf32> to vector<18x17xf32>
    %c124 = arith.constant 124 : index
    %201 = memref.load %arg1[%c124] : memref<150xf32, #tpu.memory_space<smem>>
    %202 = vector.broadcast %201 : f32 to vector<18x17xf32>
    %203 = arith.mulf %200, %202 : vector<18x17xf32>
    %204 = arith.addf %195, %203 : vector<18x17xf32>
    %c149 = arith.constant 149 : index
    %205 = memref.load %arg1[%c149] : memref<150xf32, #tpu.memory_space<smem>>
    %206 = vector.broadcast %205 : f32 to vector<18x17xf32>
    %207 = arith.mulf %200, %206 : vector<18x17xf32>
    %208 = arith.addf %199, %207 : vector<18x17xf32>
    %cst_54 = arith.constant 3.000000e+00 : f32
    %209 = vector.broadcast %cst_54 : f32 to vector<18x17xf32>
    %210 = arith.addf %204, %209 : vector<18x17xf32>
    %cst_55 = arith.constant 0.000000e+00 : f32
    %cst_56 = arith.constant 6.000000e+00 : f32
    %211 = vector.broadcast %cst_55 : f32 to vector<18x17xf32>
    %212 = arith.maximumf %211, %210 : vector<18x17xf32>
    %213 = vector.broadcast %cst_56 : f32 to vector<18x17xf32>
    %214 = arith.minimumf %213, %212 : vector<18x17xf32>
    %cst_57 = arith.constant 0.166666672 : f32
    %215 = vector.broadcast %cst_57 : f32 to vector<18x17xf32>
    %216 = arith.mulf %214, %215 : vector<18x17xf32>
    %c0_58 = arith.constant 0 : index
    %c3_59 = arith.constant 3 : index
    %c0_60 = arith.constant 0 : index
    %c0_61 = arith.constant 0 : index
    %217 = vector.load %arg3[%c0_58, %c3_59, %c0_60, %c0_61] : memref<1x18x18x17xf32, #tpu.memory_space<vmem>>, vector<1x1x18x17xf32>
    %218 = vector.shape_cast %217 : vector<1x1x18x17xf32> to vector<18x17xf32>
    %219 = vector.shape_cast %216 : vector<18x17xf32> to vector<1x1x18x17xf32>
    tpu.vector_store %arg3[%c0_58, %c3_59, %c0_60, %c0_61], %219 {strides = array<i32>} : memref<1x18x18x17xf32, #tpu.memory_space<vmem>>, vector<1x1x18x17xf32>,
    %cst_62 = arith.constant 3.000000e+00 : f32
    %220 = vector.broadcast %cst_62 : f32 to vector<18x17xf32>
    %221 = arith.addf %208, %220 : vector<18x17xf32>
    %cst_63 = arith.constant 0.000000e+00 : f32
    %cst_64 = arith.constant 6.000000e+00 : f32
    %222 = vector.broadcast %cst_63 : f32 to vector<18x17xf32>
    %223 = arith.maximumf %222, %221 : vector<18x17xf32>
    %224 = vector.broadcast %cst_64 : f32 to vector<18x17xf32>
    %225 = arith.minimumf %224, %223 : vector<18x17xf32>
    %cst_65 = arith.constant 0.166666672 : f32
    %226 = vector.broadcast %cst_65 : f32 to vector<18x17xf32>
    %227 = arith.mulf %225, %226 : vector<18x17xf32>
    %c0_66 = arith.constant 0 : index
    %c12 = arith.constant 12 : index
    %c0_67 = arith.constant 0 : index
    %c0_68 = arith.constant 0 : index
    %228 = vector.load %arg3[%c0_66, %c12, %c0_67, %c0_68] : memref<1x18x18x17xf32, #tpu.memory_space<vmem>>, vector<1x1x18x17xf32>
    %229 = vector.shape_cast %228 : vector<1x1x18x17xf32> to vector<18x17xf32>
    %230 = vector.shape_cast %227 : vector<18x17xf32> to vector<1x1x18x17xf32>
    tpu.vector_store %arg3[%c0_66, %c12, %c0_67, %c0_68], %230 {strides = array<i32>} : memref<1x18x18x17xf32, #tpu.memory_space<vmem>>, vector<1x1x18x17xf32>,
    %231 = vector.extract_strided_slice %18 {offsets = [4, 0], sizes = [18, 17], strides = [1, 1]} : vector<22x17xf32> to vector<18x17xf32>
    %c1_69 = arith.constant 1 : index
    %232 = memref.load %arg1[%c1_69] : memref<150xf32, #tpu.memory_space<smem>>
    %233 = vector.broadcast %232 : f32 to vector<18x17xf32>
    %234 = arith.mulf %231, %233 : vector<18x17xf32>
    %c26 = arith.constant 26 : index
    %235 = memref.load %arg1[%c26] : memref<150xf32, #tpu.memory_space<smem>>
    %236 = vector.broadcast %235 : f32 to vector<18x17xf32>
    %237 = arith.mulf %231, %236 : vector<18x17xf32>
    %238 = vector.extract_strided_slice %18 {offsets = [2, 0], sizes = [18, 17], strides = [1, 1]} : vector<22x17xf32> to vector<18x17xf32>
    %c16 = arith.constant 16 : index
    %239 = memref.load %arg1[%c16] : memref<150xf32, #tpu.memory_space<smem>>
    %240 = vector.broadcast %239 : f32 to vector<18x17xf32>
    %241 = arith.mulf %238, %240 : vector<18x17xf32>
    %242 = arith.addf %234, %241 : vector<18x17xf32>
    %c41 = arith.constant 41 : index
    %243 = memref.load %arg1[%c41] : memref<150xf32, #tpu.memory_space<smem>>
    %244 = vector.broadcast %243 : f32 to vector<18x17xf32>
    %245 = arith.mulf %238, %244 : vector<18x17xf32>
    %246 = arith.addf %237, %245 : vector<18x17xf32>
    %247 = vector.extract_strided_slice %20 {offsets = [4, 0], sizes = [18, 17], strides = [1, 1]} : vector<22x17xf32> to vector<18x17xf32>
    %c4 = arith.constant 4 : index
    %248 = memref.load %arg1[%c4] : memref<150xf32, #tpu.memory_space<smem>>
    %249 = vector.broadcast %248 : f32 to vector<18x17xf32>
    %250 = arith.mulf %247, %249 : vector<18x17xf32>
    %251 = arith.addf %242, %250 : vector<18x17xf32>
    %c29 = arith.constant 29 : index
    %252 = memref.load %arg1[%c29] : memref<150xf32, #tpu.memory_space<smem>>
    %253 = vector.broadcast %252 : f32 to vector<18x17xf32>
    %254 = arith.mulf %247, %253 : vector<18x17xf32>
    %255 = arith.addf %246, %254 : vector<18x17xf32>
    %256 = vector.extract_strided_slice %20 {offsets = [2, 0], sizes = [18, 17], strides = [1, 1]} : vector<22x17xf32> to vector<18x17xf32>
    %c19 = arith.constant 19 : index
    %257 = memref.load %arg1[%c19] : memref<150xf32, #tpu.memory_space<smem>>
    %258 = vector.broadcast %257 : f32 to vector<18x17xf32>
    %259 = arith.mulf %256, %258 : vector<18x17xf32>
    %260 = arith.addf %251, %259 : vector<18x17xf32>
    %c44 = arith.constant 44 : index
    %261 = memref.load %arg1[%c44] : memref<150xf32, #tpu.memory_space<smem>>
    %262 = vector.broadcast %261 : f32 to vector<18x17xf32>
    %263 = arith.mulf %256, %262 : vector<18x17xf32>
    %264 = arith.addf %255, %263 : vector<18x17xf32>
    %265 = vector.extract_strided_slice %22 {offsets = [4, 0], sizes = [18, 17], strides = [1, 1]} : vector<22x17xf32> to vector<18x17xf32>
    %c51 = arith.constant 51 : index
    %266 = memref.load %arg1[%c51] : memref<150xf32, #tpu.memory_space<smem>>
    %267 = vector.broadcast %266 : f32 to vector<18x17xf32>
    %268 = arith.mulf %265, %267 : vector<18x17xf32>
    %269 = arith.addf %260, %268 : vector<18x17xf32>
    %c76 = arith.constant 76 : index
    %270 = memref.load %arg1[%c76] : memref<150xf32, #tpu.memory_space<smem>>
    %271 = vector.broadcast %270 : f32 to vector<18x17xf32>
    %272 = arith.mulf %265, %271 : vector<18x17xf32>
    %273 = arith.addf %264, %272 : vector<18x17xf32>
    %274 = vector.extract_strided_slice %22 {offsets = [2, 0], sizes = [18, 17], strides = [1, 1]} : vector<22x17xf32> to vector<18x17xf32>
    %c66 = arith.constant 66 : index
    %275 = memref.load %arg1[%c66] : memref<150xf32, #tpu.memory_space<smem>>
    %276 = vector.broadcast %275 : f32 to vector<18x17xf32>
    %277 = arith.mulf %274, %276 : vector<18x17xf32>
    %278 = arith.addf %269, %277 : vector<18x17xf32>
    %c91 = arith.constant 91 : index
    %279 = memref.load %arg1[%c91] : memref<150xf32, #tpu.memory_space<smem>>
    %280 = vector.broadcast %279 : f32 to vector<18x17xf32>
    %281 = arith.mulf %274, %280 : vector<18x17xf32>
    %282 = arith.addf %273, %281 : vector<18x17xf32>
    %283 = vector.extract_strided_slice %24 {offsets = [4, 0], sizes = [18, 17], strides = [1, 1]} : vector<22x17xf32> to vector<18x17xf32>
    %c54 = arith.constant 54 : index
    %284 = memref.load %arg1[%c54] : memref<150xf32, #tpu.memory_space<smem>>
    %285 = vector.broadcast %284 : f32 to vector<18x17xf32>
    %286 = arith.mulf %283, %285 : vector<18x17xf32>
    %287 = arith.addf %278, %286 : vector<18x17xf32>
    %c79 = arith.constant 79 : index
    %288 = memref.load %arg1[%c79] : memref<150xf32, #tpu.memory_space<smem>>
    %289 = vector.broadcast %288 : f32 to vector<18x17xf32>
    %290 = arith.mulf %283, %289 : vector<18x17xf32>
    %291 = arith.addf %282, %290 : vector<18x17xf32>
    %292 = vector.extract_strided_slice %24 {offsets = [2, 0], sizes = [18, 17], strides = [1, 1]} : vector<22x17xf32> to vector<18x17xf32>
    %c69 = arith.constant 69 : index
    %293 = memref.load %arg1[%c69] : memref<150xf32, #tpu.memory_space<smem>>
    %294 = vector.broadcast %293 : f32 to vector<18x17xf32>
    %295 = arith.mulf %292, %294 : vector<18x17xf32>
    %296 = arith.addf %287, %295 : vector<18x17xf32>
    %c94 = arith.constant 94 : index
    %297 = memref.load %arg1[%c94] : memref<150xf32, #tpu.memory_space<smem>>
    %298 = vector.broadcast %297 : f32 to vector<18x17xf32>
    %299 = arith.mulf %292, %298 : vector<18x17xf32>
    %300 = arith.addf %291, %299 : vector<18x17xf32>
    %301 = vector.extract_strided_slice %26 {offsets = [4, 0], sizes = [18, 17], strides = [1, 1]} : vector<22x17xf32> to vector<18x17xf32>
    %c101 = arith.constant 101 : index
    %302 = memref.load %arg1[%c101] : memref<150xf32, #tpu.memory_space<smem>>
    %303 = vector.broadcast %302 : f32 to vector<18x17xf32>
    %304 = arith.mulf %301, %303 : vector<18x17xf32>
    %305 = arith.addf %296, %304 : vector<18x17xf32>
    %c126 = arith.constant 126 : index
    %306 = memref.load %arg1[%c126] : memref<150xf32, #tpu.memory_space<smem>>
    %307 = vector.broadcast %306 : f32 to vector<18x17xf32>
    %308 = arith.mulf %301, %307 : vector<18x17xf32>
    %309 = arith.addf %300, %308 : vector<18x17xf32>
    %310 = vector.extract_strided_slice %26 {offsets = [2, 0], sizes = [18, 17], strides = [1, 1]} : vector<22x17xf32> to vector<18x17xf32>
    %c116 = arith.constant 116 : index
    %311 = memref.load %arg1[%c116] : memref<150xf32, #tpu.memory_space<smem>>
    %312 = vector.broadcast %311 : f32 to vector<18x17xf32>
    %313 = arith.mulf %310, %312 : vector<18x17xf32>
    %314 = arith.addf %305, %313 : vector<18x17xf32>
    %c141 = arith.constant 141 : index
    %315 = memref.load %arg1[%c141] : memref<150xf32, #tpu.memory_space<smem>>
    %316 = vector.broadcast %315 : f32 to vector<18x17xf32>
    %317 = arith.mulf %310, %316 : vector<18x17xf32>
    %318 = arith.addf %309, %317 : vector<18x17xf32>
    %319 = vector.extract_strided_slice %28 {offsets = [4, 0], sizes = [18, 17], strides = [1, 1]} : vector<22x17xf32> to vector<18x17xf32>
    %c104 = arith.constant 104 : index
    %320 = memref.load %arg1[%c104] : memref<150xf32, #tpu.memory_space<smem>>
    %321 = vector.broadcast %320 : f32 to vector<18x17xf32>
    %322 = arith.mulf %319, %321 : vector<18x17xf32>
    %323 = arith.addf %314, %322 : vector<18x17xf32>
    %c129 = arith.constant 129 : index
    %324 = memref.load %arg1[%c129] : memref<150xf32, #tpu.memory_space<smem>>
    %325 = vector.broadcast %324 : f32 to vector<18x17xf32>
    %326 = arith.mulf %319, %325 : vector<18x17xf32>
    %327 = arith.addf %318, %326 : vector<18x17xf32>
    %328 = vector.extract_strided_slice %28 {offsets = [2, 0], sizes = [18, 17], strides = [1, 1]} : vector<22x17xf32> to vector<18x17xf32>
    %c119 = arith.constant 119 : index
    %329 = memref.load %arg1[%c119] : memref<150xf32, #tpu.memory_space<smem>>
    %330 = vector.broadcast %329 : f32 to vector<18x17xf32>
    %331 = arith.mulf %328, %330 : vector<18x17xf32>
    %332 = arith.addf %323, %331 : vector<18x17xf32>
    %c144 = arith.constant 144 : index
    %333 = memref.load %arg1[%c144] : memref<150xf32, #tpu.memory_space<smem>>
    %334 = vector.broadcast %333 : f32 to vector<18x17xf32>
    %335 = arith.mulf %328, %334 : vector<18x17xf32>
    %336 = arith.addf %327, %335 : vector<18x17xf32>
    %cst_70 = arith.constant 3.000000e+00 : f32
    %337 = vector.broadcast %cst_70 : f32 to vector<18x17xf32>
    %338 = arith.addf %332, %337 : vector<18x17xf32>
    %cst_71 = arith.constant 0.000000e+00 : f32
    %cst_72 = arith.constant 6.000000e+00 : f32
    %339 = vector.broadcast %cst_71 : f32 to vector<18x17xf32>
    %340 = arith.maximumf %339, %338 : vector<18x17xf32>
    %341 = vector.broadcast %cst_72 : f32 to vector<18x17xf32>
    %342 = arith.minimumf %341, %340 : vector<18x17xf32>
    %cst_73 = arith.constant 0.166666672 : f32
    %343 = vector.broadcast %cst_73 : f32 to vector<18x17xf32>
    %344 = arith.mulf %342, %343 : vector<18x17xf32>
    %c0_74 = arith.constant 0 : index
    %c6_75 = arith.constant 6 : index
    %c0_76 = arith.constant 0 : index
    %c0_77 = arith.constant 0 : index
    %345 = vector.load %arg3[%c0_74, %c6_75, %c0_76, %c0_77] : memref<1x18x18x17xf32, #tpu.memory_space<vmem>>, vector<1x1x18x17xf32>
    %346 = vector.shape_cast %345 : vector<1x1x18x17xf32> to vector<18x17xf32>
    %347 = vector.shape_cast %344 : vector<18x17xf32> to vector<1x1x18x17xf32>
    tpu.vector_store %arg3[%c0_74, %c6_75, %c0_76, %c0_77], %347 {strides = array<i32>} : memref<1x18x18x17xf32, #tpu.memory_space<vmem>>, vector<1x1x18x17xf32>,
    %cst_78 = arith.constant 3.000000e+00 : f32
    %348 = vector.broadcast %cst_78 : f32 to vector<18x17xf32>
    %349 = arith.addf %336, %348 : vector<18x17xf32>
    %cst_79 = arith.constant 0.000000e+00 : f32
    %cst_80 = arith.constant 6.000000e+00 : f32
    %350 = vector.broadcast %cst_79 : f32 to vector<18x17xf32>
    %351 = arith.maximumf %350, %349 : vector<18x17xf32>
    %352 = vector.broadcast %cst_80 : f32 to vector<18x17xf32>
    %353 = arith.minimumf %352, %351 : vector<18x17xf32>
    %cst_81 = arith.constant 0.166666672 : f32
    %354 = vector.broadcast %cst_81 : f32 to vector<18x17xf32>
    %355 = arith.mulf %353, %354 : vector<18x17xf32>
    %c0_82 = arith.constant 0 : index
    %c15 = arith.constant 15 : index
    %c0_83 = arith.constant 0 : index
    %c0_84 = arith.constant 0 : index
    %356 = vector.load %arg3[%c0_82, %c15, %c0_83, %c0_84] : memref<1x18x18x17xf32, #tpu.memory_space<vmem>>, vector<1x1x18x17xf32>
    %357 = vector.shape_cast %356 : vector<1x1x18x17xf32> to vector<18x17xf32>
    %358 = vector.shape_cast %355 : vector<18x17xf32> to vector<1x1x18x17xf32>
    tpu.vector_store %arg3[%c0_82, %c15, %c0_83, %c0_84], %358 {strides = array<i32>} : memref<1x18x18x17xf32, #tpu.memory_space<vmem>>, vector<1x1x18x17xf32>,
    %c0_85 = arith.constant 0 : index
    %c0_86 = arith.constant 0 : index
    %c4_87 = arith.constant 4 : index
    %359 = vector.load %arg4[%c0_85, %c0_86, %c4_87] : memref<3x22x22xf32, #tpu.memory_space<vmem>>, vector<1x22x17xf32>
    %360 = vector.shape_cast %359 : vector<1x22x17xf32> to vector<22x17xf32>
    %c0_88 = arith.constant 0 : index
    %c0_89 = arith.constant 0 : index
    %c2_90 = arith.constant 2 : index
    %361 = vector.load %arg4[%c0_88, %c0_89, %c2_90] : memref<3x22x22xf32, #tpu.memory_space<vmem>>, vector<1x22x17xf32>
    %362 = vector.shape_cast %361 : vector<1x22x17xf32> to vector<22x17xf32>
    %c1_91 = arith.constant 1 : index
    %c0_92 = arith.constant 0 : index
    %c4_93 = arith.constant 4 : index
    %363 = vector.load %arg4[%c1_91, %c0_92, %c4_93] : memref<3x22x22xf32, #tpu.memory_space<vmem>>, vector<1x22x17xf32>
    %364 = vector.shape_cast %363 : vector<1x22x17xf32> to vector<22x17xf32>
    %c1_94 = arith.constant 1 : index
    %c0_95 = arith.constant 0 : index
    %c2_96 = arith.constant 2 : index
    %365 = vector.load %arg4[%c1_94, %c0_95, %c2_96] : memref<3x22x22xf32, #tpu.memory_space<vmem>>, vector<1x22x17xf32>
    %366 = vector.shape_cast %365 : vector<1x22x17xf32> to vector<22x17xf32>
    %c2_97 = arith.constant 2 : index
    %c0_98 = arith.constant 0 : index
    %c4_99 = arith.constant 4 : index
    %367 = vector.load %arg4[%c2_97, %c0_98, %c4_99] : memref<3x22x22xf32, #tpu.memory_space<vmem>>, vector<1x22x17xf32>
    %368 = vector.shape_cast %367 : vector<1x22x17xf32> to vector<22x17xf32>
    %c2_100 = arith.constant 2 : index
    %c0_101 = arith.constant 0 : index
    %c2_102 = arith.constant 2 : index
    %369 = vector.load %arg4[%c2_100, %c0_101, %c2_102] : memref<3x22x22xf32, #tpu.memory_space<vmem>>, vector<1x22x17xf32>
    %370 = vector.shape_cast %369 : vector<1x22x17xf32> to vector<22x17xf32>
    %371 = vector.extract_strided_slice %360 {offsets = [2, 0], sizes = [18, 17], strides = [1, 1]} : vector<22x17xf32> to vector<18x17xf32>
    %c10 = arith.constant 10 : index
    %372 = memref.load %arg1[%c10] : memref<150xf32, #tpu.memory_space<smem>>
    %373 = vector.broadcast %372 : f32 to vector<18x17xf32>
    %374 = arith.mulf %371, %373 : vector<18x17xf32>
    %c35 = arith.constant 35 : index
    %375 = memref.load %arg1[%c35] : memref<150xf32, #tpu.memory_space<smem>>
    %376 = vector.broadcast %375 : f32 to vector<18x17xf32>
    %377 = arith.mulf %371, %376 : vector<18x17xf32>
    %378 = vector.extract_strided_slice %362 {offsets = [2, 0], sizes = [18, 17], strides = [1, 1]} : vector<22x17xf32> to vector<18x17xf32>
    %c13 = arith.constant 13 : index
    %379 = memref.load %arg1[%c13] : memref<150xf32, #tpu.memory_space<smem>>
    %380 = vector.broadcast %379 : f32 to vector<18x17xf32>
    %381 = arith.mulf %378, %380 : vector<18x17xf32>
    %382 = arith.addf %374, %381 : vector<18x17xf32>
    %c38 = arith.constant 38 : index
    %383 = memref.load %arg1[%c38] : memref<150xf32, #tpu.memory_space<smem>>
    %384 = vector.broadcast %383 : f32 to vector<18x17xf32>
    %385 = arith.mulf %378, %384 : vector<18x17xf32>
    %386 = arith.addf %377, %385 : vector<18x17xf32>
    %387 = vector.extract_strided_slice %364 {offsets = [2, 0], sizes = [18, 17], strides = [1, 1]} : vector<22x17xf32> to vector<18x17xf32>
    %c60 = arith.constant 60 : index
    %388 = memref.load %arg1[%c60] : memref<150xf32, #tpu.memory_space<smem>>
    %389 = vector.broadcast %388 : f32 to vector<18x17xf32>
    %390 = arith.mulf %387, %389 : vector<18x17xf32>
    %391 = arith.addf %382, %390 : vector<18x17xf32>
    %c85 = arith.constant 85 : index
    %392 = memref.load %arg1[%c85] : memref<150xf32, #tpu.memory_space<smem>>
    %393 = vector.broadcast %392 : f32 to vector<18x17xf32>
    %394 = arith.mulf %387, %393 : vector<18x17xf32>
    %395 = arith.addf %386, %394 : vector<18x17xf32>
    %396 = vector.extract_strided_slice %366 {offsets = [2, 0], sizes = [18, 17], strides = [1, 1]} : vector<22x17xf32> to vector<18x17xf32>
    %c63 = arith.constant 63 : index
    %397 = memref.load %arg1[%c63] : memref<150xf32, #tpu.memory_space<smem>>
    %398 = vector.broadcast %397 : f32 to vector<18x17xf32>
    %399 = arith.mulf %396, %398 : vector<18x17xf32>
    %400 = arith.addf %391, %399 : vector<18x17xf32>
    %c88 = arith.constant 88 : index
    %401 = memref.load %arg1[%c88] : memref<150xf32, #tpu.memory_space<smem>>
    %402 = vector.broadcast %401 : f32 to vector<18x17xf32>
    %403 = arith.mulf %396, %402 : vector<18x17xf32>
    %404 = arith.addf %395, %403 : vector<18x17xf32>
    %405 = vector.extract_strided_slice %368 {offsets = [2, 0], sizes = [18, 17], strides = [1, 1]} : vector<22x17xf32> to vector<18x17xf32>
    %c110 = arith.constant 110 : index
    %406 = memref.load %arg1[%c110] : memref<150xf32, #tpu.memory_space<smem>>
    %407 = vector.broadcast %406 : f32 to vector<18x17xf32>
    %408 = arith.mulf %405, %407 : vector<18x17xf32>
    %409 = arith.addf %400, %408 : vector<18x17xf32>
    %c135 = arith.constant 135 : index
    %410 = memref.load %arg1[%c135] : memref<150xf32, #tpu.memory_space<smem>>
    %411 = vector.broadcast %410 : f32 to vector<18x17xf32>
    %412 = arith.mulf %405, %411 : vector<18x17xf32>
    %413 = arith.addf %404, %412 : vector<18x17xf32>
    %414 = vector.extract_strided_slice %370 {offsets = [2, 0], sizes = [18, 17], strides = [1, 1]} : vector<22x17xf32> to vector<18x17xf32>
    %c113 = arith.constant 113 : index
    %415 = memref.load %arg1[%c113] : memref<150xf32, #tpu.memory_space<smem>>
    %416 = vector.broadcast %415 : f32 to vector<18x17xf32>
    %417 = arith.mulf %414, %416 : vector<18x17xf32>
    %418 = arith.addf %409, %417 : vector<18x17xf32>
    %c138 = arith.constant 138 : index
    %419 = memref.load %arg1[%c138] : memref<150xf32, #tpu.memory_space<smem>>
    %420 = vector.broadcast %419 : f32 to vector<18x17xf32>
    %421 = arith.mulf %414, %420 : vector<18x17xf32>
    %422 = arith.addf %413, %421 : vector<18x17xf32>
    %cst_103 = arith.constant 3.000000e+00 : f32
    %423 = vector.broadcast %cst_103 : f32 to vector<18x17xf32>
    %424 = arith.addf %418, %423 : vector<18x17xf32>
    %cst_104 = arith.constant 0.000000e+00 : f32
    %cst_105 = arith.constant 6.000000e+00 : f32
    %425 = vector.broadcast %cst_104 : f32 to vector<18x17xf32>
    %426 = arith.maximumf %425, %424 : vector<18x17xf32>
    %427 = vector.broadcast %cst_105 : f32 to vector<18x17xf32>
    %428 = arith.minimumf %427, %426 : vector<18x17xf32>
    %cst_106 = arith.constant 0.166666672 : f32
    %429 = vector.broadcast %cst_106 : f32 to vector<18x17xf32>
    %430 = arith.mulf %428, %429 : vector<18x17xf32>
    %c0_107 = arith.constant 0 : index
    %c1_108 = arith.constant 1 : index
    %c0_109 = arith.constant 0 : index
    %c0_110 = arith.constant 0 : index
    %431 = vector.load %arg3[%c0_107, %c1_108, %c0_109, %c0_110] : memref<1x18x18x17xf32, #tpu.memory_space<vmem>>, vector<1x1x18x17xf32>
    %432 = vector.shape_cast %431 : vector<1x1x18x17xf32> to vector<18x17xf32>
    %433 = vector.shape_cast %430 : vector<18x17xf32> to vector<1x1x18x17xf32>
    tpu.vector_store %arg3[%c0_107, %c1_108, %c0_109, %c0_110], %433 {strides = array<i32>} : memref<1x18x18x17xf32, #tpu.memory_space<vmem>>, vector<1x1x18x17xf32>,
    %cst_111 = arith.constant 3.000000e+00 : f32
    %434 = vector.broadcast %cst_111 : f32 to vector<18x17xf32>
    %435 = arith.addf %422, %434 : vector<18x17xf32>
    %cst_112 = arith.constant 0.000000e+00 : f32
    %cst_113 = arith.constant 6.000000e+00 : f32
    %436 = vector.broadcast %cst_112 : f32 to vector<18x17xf32>
    %437 = arith.maximumf %436, %435 : vector<18x17xf32>
    %438 = vector.broadcast %cst_113 : f32 to vector<18x17xf32>
    %439 = arith.minimumf %438, %437 : vector<18x17xf32>
    %cst_114 = arith.constant 0.166666672 : f32
    %440 = vector.broadcast %cst_114 : f32 to vector<18x17xf32>
    %441 = arith.mulf %439, %440 : vector<18x17xf32>
    %c0_115 = arith.constant 0 : index
    %c10_116 = arith.constant 10 : index
    %c0_117 = arith.constant 0 : index
    %c0_118 = arith.constant 0 : index
    %442 = vector.load %arg3[%c0_115, %c10_116, %c0_117, %c0_118] : memref<1x18x18x17xf32, #tpu.memory_space<vmem>>, vector<1x1x18x17xf32>
    %443 = vector.shape_cast %442 : vector<1x1x18x17xf32> to vector<18x17xf32>
    %444 = vector.shape_cast %441 : vector<18x17xf32> to vector<1x1x18x17xf32>
    tpu.vector_store %arg3[%c0_115, %c10_116, %c0_117, %c0_118], %444 {strides = array<i32>} : memref<1x18x18x17xf32, #tpu.memory_space<vmem>>, vector<1x1x18x17xf32>,
    %445 = vector.extract_strided_slice %360 {offsets = [3, 0], sizes = [18, 17], strides = [1, 1]} : vector<22x17xf32> to vector<18x17xf32>
    %c5 = arith.constant 5 : index
    %446 = memref.load %arg1[%c5] : memref<150xf32, #tpu.memory_space<smem>>
    %447 = vector.broadcast %446 : f32 to vector<18x17xf32>
    %448 = arith.mulf %445, %447 : vector<18x17xf32>
    %c30 = arith.constant 30 : index
    %449 = memref.load %arg1[%c30] : memref<150xf32, #tpu.memory_space<smem>>
    %450 = vector.broadcast %449 : f32 to vector<18x17xf32>
    %451 = arith.mulf %445, %450 : vector<18x17xf32>
    %452 = vector.extract_strided_slice %360 {offsets = [1, 0], sizes = [18, 17], strides = [1, 1]} : vector<22x17xf32> to vector<18x17xf32>
    %c20 = arith.constant 20 : index
    %453 = memref.load %arg1[%c20] : memref<150xf32, #tpu.memory_space<smem>>
    %454 = vector.broadcast %453 : f32 to vector<18x17xf32>
    %455 = arith.mulf %452, %454 : vector<18x17xf32>
    %456 = arith.addf %448, %455 : vector<18x17xf32>
    %c45 = arith.constant 45 : index
    %457 = memref.load %arg1[%c45] : memref<150xf32, #tpu.memory_space<smem>>
    %458 = vector.broadcast %457 : f32 to vector<18x17xf32>
    %459 = arith.mulf %452, %458 : vector<18x17xf32>
    %460 = arith.addf %451, %459 : vector<18x17xf32>
    %461 = vector.extract_strided_slice %362 {offsets = [3, 0], sizes = [18, 17], strides = [1, 1]} : vector<22x17xf32> to vector<18x17xf32>
    %c8 = arith.constant 8 : index
    %462 = memref.load %arg1[%c8] : memref<150xf32, #tpu.memory_space<smem>>
    %463 = vector.broadcast %462 : f32 to vector<18x17xf32>
    %464 = arith.mulf %461, %463 : vector<18x17xf32>
    %465 = arith.addf %456, %464 : vector<18x17xf32>
    %c33 = arith.constant 33 : index
    %466 = memref.load %arg1[%c33] : memref<150xf32, #tpu.memory_space<smem>>
    %467 = vector.broadcast %466 : f32 to vector<18x17xf32>
    %468 = arith.mulf %461, %467 : vector<18x17xf32>
    %469 = arith.addf %460, %468 : vector<18x17xf32>
    %470 = vector.extract_strided_slice %362 {offsets = [1, 0], sizes = [18, 17], strides = [1, 1]} : vector<22x17xf32> to vector<18x17xf32>
    %c23 = arith.constant 23 : index
    %471 = memref.load %arg1[%c23] : memref<150xf32, #tpu.memory_space<smem>>
    %472 = vector.broadcast %471 : f32 to vector<18x17xf32>
    %473 = arith.mulf %470, %472 : vector<18x17xf32>
    %474 = arith.addf %465, %473 : vector<18x17xf32>
    %c48 = arith.constant 48 : index
    %475 = memref.load %arg1[%c48] : memref<150xf32, #tpu.memory_space<smem>>
    %476 = vector.broadcast %475 : f32 to vector<18x17xf32>
    %477 = arith.mulf %470, %476 : vector<18x17xf32>
    %478 = arith.addf %469, %477 : vector<18x17xf32>
    %479 = vector.extract_strided_slice %364 {offsets = [3, 0], sizes = [18, 17], strides = [1, 1]} : vector<22x17xf32> to vector<18x17xf32>
    %c55 = arith.constant 55 : index
    %480 = memref.load %arg1[%c55] : memref<150xf32, #tpu.memory_space<smem>>
    %481 = vector.broadcast %480 : f32 to vector<18x17xf32>
    %482 = arith.mulf %479, %481 : vector<18x17xf32>
    %483 = arith.addf %474, %482 : vector<18x17xf32>
    %c80 = arith.constant 80 : index
    %484 = memref.load %arg1[%c80] : memref<150xf32, #tpu.memory_space<smem>>
    %485 = vector.broadcast %484 : f32 to vector<18x17xf32>
    %486 = arith.mulf %479, %485 : vector<18x17xf32>
    %487 = arith.addf %478, %486 : vector<18x17xf32>
    %488 = vector.extract_strided_slice %364 {offsets = [1, 0], sizes = [18, 17], strides = [1, 1]} : vector<22x17xf32> to vector<18x17xf32>
    %c70 = arith.constant 70 : index
    %489 = memref.load %arg1[%c70] : memref<150xf32, #tpu.memory_space<smem>>
    %490 = vector.broadcast %489 : f32 to vector<18x17xf32>
    %491 = arith.mulf %488, %490 : vector<18x17xf32>
    %492 = arith.addf %483, %491 : vector<18x17xf32>
    %c95 = arith.constant 95 : index
    %493 = memref.load %arg1[%c95] : memref<150xf32, #tpu.memory_space<smem>>
    %494 = vector.broadcast %493 : f32 to vector<18x17xf32>
    %495 = arith.mulf %488, %494 : vector<18x17xf32>
    %496 = arith.addf %487, %495 : vector<18x17xf32>
    %497 = vector.extract_strided_slice %366 {offsets = [3, 0], sizes = [18, 17], strides = [1, 1]} : vector<22x17xf32> to vector<18x17xf32>
    %c58 = arith.constant 58 : index
    %498 = memref.load %arg1[%c58] : memref<150xf32, #tpu.memory_space<smem>>
    %499 = vector.broadcast %498 : f32 to vector<18x17xf32>
    %500 = arith.mulf %497, %499 : vector<18x17xf32>
    %501 = arith.addf %492, %500 : vector<18x17xf32>
    %c83 = arith.constant 83 : index
    %502 = memref.load %arg1[%c83] : memref<150xf32, #tpu.memory_space<smem>>
    %503 = vector.broadcast %502 : f32 to vector<18x17xf32>
    %504 = arith.mulf %497, %503 : vector<18x17xf32>
    %505 = arith.addf %496, %504 : vector<18x17xf32>
    %506 = vector.extract_strided_slice %366 {offsets = [1, 0], sizes = [18, 17], strides = [1, 1]} : vector<22x17xf32> to vector<18x17xf32>
    %c73 = arith.constant 73 : index
    %507 = memref.load %arg1[%c73] : memref<150xf32, #tpu.memory_space<smem>>
    %508 = vector.broadcast %507 : f32 to vector<18x17xf32>
    %509 = arith.mulf %506, %508 : vector<18x17xf32>
    %510 = arith.addf %501, %509 : vector<18x17xf32>
    %c98 = arith.constant 98 : index
    %511 = memref.load %arg1[%c98] : memref<150xf32, #tpu.memory_space<smem>>
    %512 = vector.broadcast %511 : f32 to vector<18x17xf32>
    %513 = arith.mulf %506, %512 : vector<18x17xf32>
    %514 = arith.addf %505, %513 : vector<18x17xf32>
    %515 = vector.extract_strided_slice %368 {offsets = [3, 0], sizes = [18, 17], strides = [1, 1]} : vector<22x17xf32> to vector<18x17xf32>
    %c105 = arith.constant 105 : index
    %516 = memref.load %arg1[%c105] : memref<150xf32, #tpu.memory_space<smem>>
    %517 = vector.broadcast %516 : f32 to vector<18x17xf32>
    %518 = arith.mulf %515, %517 : vector<18x17xf32>
    %519 = arith.addf %510, %518 : vector<18x17xf32>
    %c130 = arith.constant 130 : index
    %520 = memref.load %arg1[%c130] : memref<150xf32, #tpu.memory_space<smem>>
    %521 = vector.broadcast %520 : f32 to vector<18x17xf32>
    %522 = arith.mulf %515, %521 : vector<18x17xf32>
    %523 = arith.addf %514, %522 : vector<18x17xf32>
    %524 = vector.extract_strided_slice %368 {offsets = [1, 0], sizes = [18, 17], strides = [1, 1]} : vector<22x17xf32> to vector<18x17xf32>
    %c120 = arith.constant 120 : index
    %525 = memref.load %arg1[%c120] : memref<150xf32, #tpu.memory_space<smem>>
    %526 = vector.broadcast %525 : f32 to vector<18x17xf32>
    %527 = arith.mulf %524, %526 : vector<18x17xf32>
    %528 = arith.addf %519, %527 : vector<18x17xf32>
    %c145 = arith.constant 145 : index
    %529 = memref.load %arg1[%c145] : memref<150xf32, #tpu.memory_space<smem>>
    %530 = vector.broadcast %529 : f32 to vector<18x17xf32>
    %531 = arith.mulf %524, %530 : vector<18x17xf32>
    %532 = arith.addf %523, %531 : vector<18x17xf32>
    %533 = vector.extract_strided_slice %370 {offsets = [3, 0], sizes = [18, 17], strides = [1, 1]} : vector<22x17xf32> to vector<18x17xf32>
    %c108 = arith.constant 108 : index
    %534 = memref.load %arg1[%c108] : memref<150xf32, #tpu.memory_space<smem>>
    %535 = vector.broadcast %534 : f32 to vector<18x17xf32>
    %536 = arith.mulf %533, %535 : vector<18x17xf32>
    %537 = arith.addf %528, %536 : vector<18x17xf32>
    %c133 = arith.constant 133 : index
    %538 = memref.load %arg1[%c133] : memref<150xf32, #tpu.memory_space<smem>>
    %539 = vector.broadcast %538 : f32 to vector<18x17xf32>
    %540 = arith.mulf %533, %539 : vector<18x17xf32>
    %541 = arith.addf %532, %540 : vector<18x17xf32>
    %542 = vector.extract_strided_slice %370 {offsets = [1, 0], sizes = [18, 17], strides = [1, 1]} : vector<22x17xf32> to vector<18x17xf32>
    %c123 = arith.constant 123 : index
    %543 = memref.load %arg1[%c123] : memref<150xf32, #tpu.memory_space<smem>>
    %544 = vector.broadcast %543 : f32 to vector<18x17xf32>
    %545 = arith.mulf %542, %544 : vector<18x17xf32>
    %546 = arith.addf %537, %545 : vector<18x17xf32>
    %c148 = arith.constant 148 : index
    %547 = memref.load %arg1[%c148] : memref<150xf32, #tpu.memory_space<smem>>
    %548 = vector.broadcast %547 : f32 to vector<18x17xf32>
    %549 = arith.mulf %542, %548 : vector<18x17xf32>
    %550 = arith.addf %541, %549 : vector<18x17xf32>
    %cst_119 = arith.constant 3.000000e+00 : f32
    %551 = vector.broadcast %cst_119 : f32 to vector<18x17xf32>
    %552 = arith.addf %546, %551 : vector<18x17xf32>
    %cst_120 = arith.constant 0.000000e+00 : f32
    %cst_121 = arith.constant 6.000000e+00 : f32
    %553 = vector.broadcast %cst_120 : f32 to vector<18x17xf32>
    %554 = arith.maximumf %553, %552 : vector<18x17xf32>
    %555 = vector.broadcast %cst_121 : f32 to vector<18x17xf32>
    %556 = arith.minimumf %555, %554 : vector<18x17xf32>
    %cst_122 = arith.constant 0.166666672 : f32
    %557 = vector.broadcast %cst_122 : f32 to vector<18x17xf32>
    %558 = arith.mulf %556, %557 : vector<18x17xf32>
    %c0_123 = arith.constant 0 : index
    %c4_124 = arith.constant 4 : index
    %c0_125 = arith.constant 0 : index
    %c0_126 = arith.constant 0 : index
    %559 = vector.load %arg3[%c0_123, %c4_124, %c0_125, %c0_126] : memref<1x18x18x17xf32, #tpu.memory_space<vmem>>, vector<1x1x18x17xf32>
    %560 = vector.shape_cast %559 : vector<1x1x18x17xf32> to vector<18x17xf32>
    %561 = vector.shape_cast %558 : vector<18x17xf32> to vector<1x1x18x17xf32>
    tpu.vector_store %arg3[%c0_123, %c4_124, %c0_125, %c0_126], %561 {strides = array<i32>} : memref<1x18x18x17xf32, #tpu.memory_space<vmem>>, vector<1x1x18x17xf32>,
    %cst_127 = arith.constant 3.000000e+00 : f32
    %562 = vector.broadcast %cst_127 : f32 to vector<18x17xf32>
    %563 = arith.addf %550, %562 : vector<18x17xf32>
    %cst_128 = arith.constant 0.000000e+00 : f32
    %cst_129 = arith.constant 6.000000e+00 : f32
    %564 = vector.broadcast %cst_128 : f32 to vector<18x17xf32>
    %565 = arith.maximumf %564, %563 : vector<18x17xf32>
    %566 = vector.broadcast %cst_129 : f32 to vector<18x17xf32>
    %567 = arith.minimumf %566, %565 : vector<18x17xf32>
    %cst_130 = arith.constant 0.166666672 : f32
    %568 = vector.broadcast %cst_130 : f32 to vector<18x17xf32>
    %569 = arith.mulf %567, %568 : vector<18x17xf32>
    %c0_131 = arith.constant 0 : index
    %c13_132 = arith.constant 13 : index
    %c0_133 = arith.constant 0 : index
    %c0_134 = arith.constant 0 : index
    %570 = vector.load %arg3[%c0_131, %c13_132, %c0_133, %c0_134] : memref<1x18x18x17xf32, #tpu.memory_space<vmem>>, vector<1x1x18x17xf32>
    %571 = vector.shape_cast %570 : vector<1x1x18x17xf32> to vector<18x17xf32>
    %572 = vector.shape_cast %569 : vector<18x17xf32> to vector<1x1x18x17xf32>
    tpu.vector_store %arg3[%c0_131, %c13_132, %c0_133, %c0_134], %572 {strides = array<i32>} : memref<1x18x18x17xf32, #tpu.memory_space<vmem>>, vector<1x1x18x17xf32>,
    %573 = vector.extract_strided_slice %360 {offsets = [4, 0], sizes = [18, 17], strides = [1, 1]} : vector<22x17xf32> to vector<18x17xf32>
    %c0_135 = arith.constant 0 : index
    %574 = memref.load %arg1[%c0_135] : memref<150xf32, #tpu.memory_space<smem>>
    %575 = vector.broadcast %574 : f32 to vector<18x17xf32>
    %576 = arith.mulf %573, %575 : vector<18x17xf32>
    %c25 = arith.constant 25 : index
    %577 = memref.load %arg1[%c25] : memref<150xf32, #tpu.memory_space<smem>>
    %578 = vector.broadcast %577 : f32 to vector<18x17xf32>
    %579 = arith.mulf %573, %578 : vector<18x17xf32>
    %580 = vector.extract_strided_slice %360 {offsets = [2, 0], sizes = [18, 17], strides = [1, 1]} : vector<22x17xf32> to vector<18x17xf32>
    %c15_136 = arith.constant 15 : index
    %581 = memref.load %arg1[%c15_136] : memref<150xf32, #tpu.memory_space<smem>>
    %582 = vector.broadcast %581 : f32 to vector<18x17xf32>
    %583 = arith.mulf %580, %582 : vector<18x17xf32>
    %584 = arith.addf %576, %583 : vector<18x17xf32>
    %c40 = arith.constant 40 : index
    %585 = memref.load %arg1[%c40] : memref<150xf32, #tpu.memory_space<smem>>
    %586 = vector.broadcast %585 : f32 to vector<18x17xf32>
    %587 = arith.mulf %580, %586 : vector<18x17xf32>
    %588 = arith.addf %579, %587 : vector<18x17xf32>
    %589 = vector.extract_strided_slice %362 {offsets = [4, 0], sizes = [18, 17], strides = [1, 1]} : vector<22x17xf32> to vector<18x17xf32>
    %c3_137 = arith.constant 3 : index
    %590 = memref.load %arg1[%c3_137] : memref<150xf32, #tpu.memory_space<smem>>
    %591 = vector.broadcast %590 : f32 to vector<18x17xf32>
    %592 = arith.mulf %589, %591 : vector<18x17xf32>
    %593 = arith.addf %584, %592 : vector<18x17xf32>
    %c28 = arith.constant 28 : index
    %594 = memref.load %arg1[%c28] : memref<150xf32, #tpu.memory_space<smem>>
    %595 = vector.broadcast %594 : f32 to vector<18x17xf32>
    %596 = arith.mulf %589, %595 : vector<18x17xf32>
    %597 = arith.addf %588, %596 : vector<18x17xf32>
    %598 = vector.extract_strided_slice %362 {offsets = [2, 0], sizes = [18, 17], strides = [1, 1]} : vector<22x17xf32> to vector<18x17xf32>
    %c18 = arith.constant 18 : index
    %599 = memref.load %arg1[%c18] : memref<150xf32, #tpu.memory_space<smem>>
    %600 = vector.broadcast %599 : f32 to vector<18x17xf32>
    %601 = arith.mulf %598, %600 : vector<18x17xf32>
    %602 = arith.addf %593, %601 : vector<18x17xf32>
    %c43 = arith.constant 43 : index
    %603 = memref.load %arg1[%c43] : memref<150xf32, #tpu.memory_space<smem>>
    %604 = vector.broadcast %603 : f32 to vector<18x17xf32>
    %605 = arith.mulf %598, %604 : vector<18x17xf32>
    %606 = arith.addf %597, %605 : vector<18x17xf32>
    %607 = vector.extract_strided_slice %364 {offsets = [4, 0], sizes = [18, 17], strides = [1, 1]} : vector<22x17xf32> to vector<18x17xf32>
    %c50 = arith.constant 50 : index
    %608 = memref.load %arg1[%c50] : memref<150xf32, #tpu.memory_space<smem>>
    %609 = vector.broadcast %608 : f32 to vector<18x17xf32>
    %610 = arith.mulf %607, %609 : vector<18x17xf32>
    %611 = arith.addf %602, %610 : vector<18x17xf32>
    %c75 = arith.constant 75 : index
    %612 = memref.load %arg1[%c75] : memref<150xf32, #tpu.memory_space<smem>>
    %613 = vector.broadcast %612 : f32 to vector<18x17xf32>
    %614 = arith.mulf %607, %613 : vector<18x17xf32>
    %615 = arith.addf %606, %614 : vector<18x17xf32>
    %616 = vector.extract_strided_slice %364 {offsets = [2, 0], sizes = [18, 17], strides = [1, 1]} : vector<22x17xf32> to vector<18x17xf32>
    %c65 = arith.constant 65 : index
    %617 = memref.load %arg1[%c65] : memref<150xf32, #tpu.memory_space<smem>>
    %618 = vector.broadcast %617 : f32 to vector<18x17xf32>
    %619 = arith.mulf %616, %618 : vector<18x17xf32>
    %620 = arith.addf %611, %619 : vector<18x17xf32>
    %c90 = arith.constant 90 : index
    %621 = memref.load %arg1[%c90] : memref<150xf32, #tpu.memory_space<smem>>
    %622 = vector.broadcast %621 : f32 to vector<18x17xf32>
    %623 = arith.mulf %616, %622 : vector<18x17xf32>
    %624 = arith.addf %615, %623 : vector<18x17xf32>
    %625 = vector.extract_strided_slice %366 {offsets = [4, 0], sizes = [18, 17], strides = [1, 1]} : vector<22x17xf32> to vector<18x17xf32>
    %c53 = arith.constant 53 : index
    %626 = memref.load %arg1[%c53] : memref<150xf32, #tpu.memory_space<smem>>
    %627 = vector.broadcast %626 : f32 to vector<18x17xf32>
    %628 = arith.mulf %625, %627 : vector<18x17xf32>
    %629 = arith.addf %620, %628 : vector<18x17xf32>
    %c78 = arith.constant 78 : index
    %630 = memref.load %arg1[%c78] : memref<150xf32, #tpu.memory_space<smem>>
    %631 = vector.broadcast %630 : f32 to vector<18x17xf32>
    %632 = arith.mulf %625, %631 : vector<18x17xf32>
    %633 = arith.addf %624, %632 : vector<18x17xf32>
    %634 = vector.extract_strided_slice %366 {offsets = [2, 0], sizes = [18, 17], strides = [1, 1]} : vector<22x17xf32> to vector<18x17xf32>
    %c68 = arith.constant 68 : index
    %635 = memref.load %arg1[%c68] : memref<150xf32, #tpu.memory_space<smem>>
    %636 = vector.broadcast %635 : f32 to vector<18x17xf32>
    %637 = arith.mulf %634, %636 : vector<18x17xf32>
    %638 = arith.addf %629, %637 : vector<18x17xf32>
    %c93 = arith.constant 93 : index
    %639 = memref.load %arg1[%c93] : memref<150xf32, #tpu.memory_space<smem>>
    %640 = vector.broadcast %639 : f32 to vector<18x17xf32>
    %641 = arith.mulf %634, %640 : vector<18x17xf32>
    %642 = arith.addf %633, %641 : vector<18x17xf32>
    %643 = vector.extract_strided_slice %368 {offsets = [4, 0], sizes = [18, 17], strides = [1, 1]} : vector<22x17xf32> to vector<18x17xf32>
    %c100 = arith.constant 100 : index
    %644 = memref.load %arg1[%c100] : memref<150xf32, #tpu.memory_space<smem>>
    %645 = vector.broadcast %644 : f32 to vector<18x17xf32>
    %646 = arith.mulf %643, %645 : vector<18x17xf32>
    %647 = arith.addf %638, %646 : vector<18x17xf32>
    %c125 = arith.constant 125 : index
    %648 = memref.load %arg1[%c125] : memref<150xf32, #tpu.memory_space<smem>>
    %649 = vector.broadcast %648 : f32 to vector<18x17xf32>
    %650 = arith.mulf %643, %649 : vector<18x17xf32>
    %651 = arith.addf %642, %650 : vector<18x17xf32>
    %652 = vector.extract_strided_slice %368 {offsets = [2, 0], sizes = [18, 17], strides = [1, 1]} : vector<22x17xf32> to vector<18x17xf32>
    %c115 = arith.constant 115 : index
    %653 = memref.load %arg1[%c115] : memref<150xf32, #tpu.memory_space<smem>>
    %654 = vector.broadcast %653 : f32 to vector<18x17xf32>
    %655 = arith.mulf %652, %654 : vector<18x17xf32>
    %656 = arith.addf %647, %655 : vector<18x17xf32>
    %c140 = arith.constant 140 : index
    %657 = memref.load %arg1[%c140] : memref<150xf32, #tpu.memory_space<smem>>
    %658 = vector.broadcast %657 : f32 to vector<18x17xf32>
    %659 = arith.mulf %652, %658 : vector<18x17xf32>
    %660 = arith.addf %651, %659 : vector<18x17xf32>
    %661 = vector.extract_strided_slice %370 {offsets = [4, 0], sizes = [18, 17], strides = [1, 1]} : vector<22x17xf32> to vector<18x17xf32>
    %c103 = arith.constant 103 : index
    %662 = memref.load %arg1[%c103] : memref<150xf32, #tpu.memory_space<smem>>
    %663 = vector.broadcast %662 : f32 to vector<18x17xf32>
    %664 = arith.mulf %661, %663 : vector<18x17xf32>
    %665 = arith.addf %656, %664 : vector<18x17xf32>
    %c128 = arith.constant 128 : index
    %666 = memref.load %arg1[%c128] : memref<150xf32, #tpu.memory_space<smem>>
    %667 = vector.broadcast %666 : f32 to vector<18x17xf32>
    %668 = arith.mulf %661, %667 : vector<18x17xf32>
    %669 = arith.addf %660, %668 : vector<18x17xf32>
    %670 = vector.extract_strided_slice %370 {offsets = [2, 0], sizes = [18, 17], strides = [1, 1]} : vector<22x17xf32> to vector<18x17xf32>
    %c118 = arith.constant 118 : index
    %671 = memref.load %arg1[%c118] : memref<150xf32, #tpu.memory_space<smem>>
    %672 = vector.broadcast %671 : f32 to vector<18x17xf32>
    %673 = arith.mulf %670, %672 : vector<18x17xf32>
    %674 = arith.addf %665, %673 : vector<18x17xf32>
    %c143 = arith.constant 143 : index
    %675 = memref.load %arg1[%c143] : memref<150xf32, #tpu.memory_space<smem>>
    %676 = vector.broadcast %675 : f32 to vector<18x17xf32>
    %677 = arith.mulf %670, %676 : vector<18x17xf32>
    %678 = arith.addf %669, %677 : vector<18x17xf32>
    %cst_138 = arith.constant 3.000000e+00 : f32
    %679 = vector.broadcast %cst_138 : f32 to vector<18x17xf32>
    %680 = arith.addf %674, %679 : vector<18x17xf32>
    %cst_139 = arith.constant 0.000000e+00 : f32
    %cst_140 = arith.constant 6.000000e+00 : f32
    %681 = vector.broadcast %cst_139 : f32 to vector<18x17xf32>
    %682 = arith.maximumf %681, %680 : vector<18x17xf32>
    %683 = vector.broadcast %cst_140 : f32 to vector<18x17xf32>
    %684 = arith.minimumf %683, %682 : vector<18x17xf32>
    %cst_141 = arith.constant 0.166666672 : f32
    %685 = vector.broadcast %cst_141 : f32 to vector<18x17xf32>
    %686 = arith.mulf %684, %685 : vector<18x17xf32>
    %c0_142 = arith.constant 0 : index
    %c7 = arith.constant 7 : index
    %c0_143 = arith.constant 0 : index
    %c0_144 = arith.constant 0 : index
    %687 = vector.load %arg3[%c0_142, %c7, %c0_143, %c0_144] : memref<1x18x18x17xf32, #tpu.memory_space<vmem>>, vector<1x1x18x17xf32>
    %688 = vector.shape_cast %687 : vector<1x1x18x17xf32> to vector<18x17xf32>
    %689 = vector.shape_cast %686 : vector<18x17xf32> to vector<1x1x18x17xf32>
    tpu.vector_store %arg3[%c0_142, %c7, %c0_143, %c0_144], %689 {strides = array<i32>} : memref<1x18x18x17xf32, #tpu.memory_space<vmem>>, vector<1x1x18x17xf32>,
    %cst_145 = arith.constant 3.000000e+00 : f32
    %690 = vector.broadcast %cst_145 : f32 to vector<18x17xf32>
    %691 = arith.addf %678, %690 : vector<18x17xf32>
    %cst_146 = arith.constant 0.000000e+00 : f32
    %cst_147 = arith.constant 6.000000e+00 : f32
    %692 = vector.broadcast %cst_146 : f32 to vector<18x17xf32>
    %693 = arith.maximumf %692, %691 : vector<18x17xf32>
    %694 = vector.broadcast %cst_147 : f32 to vector<18x17xf32>
    %695 = arith.minimumf %694, %693 : vector<18x17xf32>
    %cst_148 = arith.constant 0.166666672 : f32
    %696 = vector.broadcast %cst_148 : f32 to vector<18x17xf32>
    %697 = arith.mulf %695, %696 : vector<18x17xf32>
    %c0_149 = arith.constant 0 : index
    %c16_150 = arith.constant 16 : index
    %c0_151 = arith.constant 0 : index
    %c0_152 = arith.constant 0 : index
    %698 = vector.load %arg3[%c0_149, %c16_150, %c0_151, %c0_152] : memref<1x18x18x17xf32, #tpu.memory_space<vmem>>, vector<1x1x18x17xf32>
    %699 = vector.shape_cast %698 : vector<1x1x18x17xf32> to vector<18x17xf32>
    %700 = vector.shape_cast %697 : vector<18x17xf32> to vector<1x1x18x17xf32>
    tpu.vector_store %arg3[%c0_149, %c16_150, %c0_151, %c0_152], %700 {strides = array<i32>} : memref<1x18x18x17xf32, #tpu.memory_space<vmem>>, vector<1x1x18x17xf32>,
    %c0_153 = arith.constant 0 : index
    %c0_154 = arith.constant 0 : index
    %c3_155 = arith.constant 3 : index
    %701 = vector.load %arg4[%c0_153, %c0_154, %c3_155] : memref<3x22x22xf32, #tpu.memory_space<vmem>>, vector<1x22x17xf32>
    %702 = vector.shape_cast %701 : vector<1x22x17xf32> to vector<22x17xf32>
    %c1_156 = arith.constant 1 : index
    %c0_157 = arith.constant 0 : index
    %c3_158 = arith.constant 3 : index
    %703 = vector.load %arg4[%c1_156, %c0_157, %c3_158] : memref<3x22x22xf32, #tpu.memory_space<vmem>>, vector<1x22x17xf32>
    %704 = vector.shape_cast %703 : vector<1x22x17xf32> to vector<22x17xf32>
    %c2_159 = arith.constant 2 : index
    %c0_160 = arith.constant 0 : index
    %c3_161 = arith.constant 3 : index
    %705 = vector.load %arg4[%c2_159, %c0_160, %c3_161] : memref<3x22x22xf32, #tpu.memory_space<vmem>>, vector<1x22x17xf32>
    %706 = vector.shape_cast %705 : vector<1x22x17xf32> to vector<22x17xf32>
    %707 = vector.extract_strided_slice %702 {offsets = [2, 0], sizes = [18, 17], strides = [1, 1]} : vector<22x17xf32> to vector<18x17xf32>
    %c12_162 = arith.constant 12 : index
    %708 = memref.load %arg1[%c12_162] : memref<150xf32, #tpu.memory_space<smem>>
    %709 = vector.broadcast %708 : f32 to vector<18x17xf32>
    %710 = arith.mulf %707, %709 : vector<18x17xf32>
    %c37 = arith.constant 37 : index
    %711 = memref.load %arg1[%c37] : memref<150xf32, #tpu.memory_space<smem>>
    %712 = vector.broadcast %711 : f32 to vector<18x17xf32>
    %713 = arith.mulf %707, %712 : vector<18x17xf32>
    %714 = vector.extract_strided_slice %704 {offsets = [2, 0], sizes = [18, 17], strides = [1, 1]} : vector<22x17xf32> to vector<18x17xf32>
    %c62 = arith.constant 62 : index
    %715 = memref.load %arg1[%c62] : memref<150xf32, #tpu.memory_space<smem>>
    %716 = vector.broadcast %715 : f32 to vector<18x17xf32>
    %717 = arith.mulf %714, %716 : vector<18x17xf32>
    %718 = arith.addf %710, %717 : vector<18x17xf32>
    %c87 = arith.constant 87 : index
    %719 = memref.load %arg1[%c87] : memref<150xf32, #tpu.memory_space<smem>>
    %720 = vector.broadcast %719 : f32 to vector<18x17xf32>
    %721 = arith.mulf %714, %720 : vector<18x17xf32>
    %722 = arith.addf %713, %721 : vector<18x17xf32>
    %723 = vector.extract_strided_slice %706 {offsets = [2, 0], sizes = [18, 17], strides = [1, 1]} : vector<22x17xf32> to vector<18x17xf32>
    %c112 = arith.constant 112 : index
    %724 = memref.load %arg1[%c112] : memref<150xf32, #tpu.memory_space<smem>>
    %725 = vector.broadcast %724 : f32 to vector<18x17xf32>
    %726 = arith.mulf %723, %725 : vector<18x17xf32>
    %727 = arith.addf %718, %726 : vector<18x17xf32>
    %c137 = arith.constant 137 : index
    %728 = memref.load %arg1[%c137] : memref<150xf32, #tpu.memory_space<smem>>
    %729 = vector.broadcast %728 : f32 to vector<18x17xf32>
    %730 = arith.mulf %723, %729 : vector<18x17xf32>
    %731 = arith.addf %722, %730 : vector<18x17xf32>
    %cst_163 = arith.constant 3.000000e+00 : f32
    %732 = vector.broadcast %cst_163 : f32 to vector<18x17xf32>
    %733 = arith.addf %727, %732 : vector<18x17xf32>
    %cst_164 = arith.constant 0.000000e+00 : f32
    %cst_165 = arith.constant 6.000000e+00 : f32
    %734 = vector.broadcast %cst_164 : f32 to vector<18x17xf32>
    %735 = arith.maximumf %734, %733 : vector<18x17xf32>
    %736 = vector.broadcast %cst_165 : f32 to vector<18x17xf32>
    %737 = arith.minimumf %736, %735 : vector<18x17xf32>
    %cst_166 = arith.constant 0.166666672 : f32
    %738 = vector.broadcast %cst_166 : f32 to vector<18x17xf32>
    %739 = arith.mulf %737, %738 : vector<18x17xf32>
    %c0_167 = arith.constant 0 : index
    %c2_168 = arith.constant 2 : index
    %c0_169 = arith.constant 0 : index
    %c0_170 = arith.constant 0 : index
    %740 = vector.load %arg3[%c0_167, %c2_168, %c0_169, %c0_170] : memref<1x18x18x17xf32, #tpu.memory_space<vmem>>, vector<1x1x18x17xf32>
    %741 = vector.shape_cast %740 : vector<1x1x18x17xf32> to vector<18x17xf32>
    %742 = vector.shape_cast %739 : vector<18x17xf32> to vector<1x1x18x17xf32>
    tpu.vector_store %arg3[%c0_167, %c2_168, %c0_169, %c0_170], %742 {strides = array<i32>} : memref<1x18x18x17xf32, #tpu.memory_space<vmem>>, vector<1x1x18x17xf32>,
    %cst_171 = arith.constant 3.000000e+00 : f32
    %743 = vector.broadcast %cst_171 : f32 to vector<18x17xf32>
    %744 = arith.addf %731, %743 : vector<18x17xf32>
    %cst_172 = arith.constant 0.000000e+00 : f32
    %cst_173 = arith.constant 6.000000e+00 : f32
    %745 = vector.broadcast %cst_172 : f32 to vector<18x17xf32>
    %746 = arith.maximumf %745, %744 : vector<18x17xf32>
    %747 = vector.broadcast %cst_173 : f32 to vector<18x17xf32>
    %748 = arith.minimumf %747, %746 : vector<18x17xf32>
    %cst_174 = arith.constant 0.166666672 : f32
    %749 = vector.broadcast %cst_174 : f32 to vector<18x17xf32>
    %750 = arith.mulf %748, %749 : vector<18x17xf32>
    %c0_175 = arith.constant 0 : index
    %c11_176 = arith.constant 11 : index
    %c0_177 = arith.constant 0 : index
    %c0_178 = arith.constant 0 : index
    %751 = vector.load %arg3[%c0_175, %c11_176, %c0_177, %c0_178] : memref<1x18x18x17xf32, #tpu.memory_space<vmem>>, vector<1x1x18x17xf32>
    %752 = vector.shape_cast %751 : vector<1x1x18x17xf32> to vector<18x17xf32>
    %753 = vector.shape_cast %750 : vector<18x17xf32> to vector<1x1x18x17xf32>
    tpu.vector_store %arg3[%c0_175, %c11_176, %c0_177, %c0_178], %753 {strides = array<i32>} : memref<1x18x18x17xf32, #tpu.memory_space<vmem>>, vector<1x1x18x17xf32>,
    %754 = vector.extract_strided_slice %702 {offsets = [3, 0], sizes = [18, 17], strides = [1, 1]} : vector<22x17xf32> to vector<18x17xf32>
    %c7_179 = arith.constant 7 : index
    %755 = memref.load %arg1[%c7_179] : memref<150xf32, #tpu.memory_space<smem>>
    %756 = vector.broadcast %755 : f32 to vector<18x17xf32>
    %757 = arith.mulf %754, %756 : vector<18x17xf32>
    %c32 = arith.constant 32 : index
    %758 = memref.load %arg1[%c32] : memref<150xf32, #tpu.memory_space<smem>>
    %759 = vector.broadcast %758 : f32 to vector<18x17xf32>
    %760 = arith.mulf %754, %759 : vector<18x17xf32>
    %761 = vector.extract_strided_slice %702 {offsets = [1, 0], sizes = [18, 17], strides = [1, 1]} : vector<22x17xf32> to vector<18x17xf32>
    %c22 = arith.constant 22 : index
    %762 = memref.load %arg1[%c22] : memref<150xf32, #tpu.memory_space<smem>>
    %763 = vector.broadcast %762 : f32 to vector<18x17xf32>
    %764 = arith.mulf %761, %763 : vector<18x17xf32>
    %765 = arith.addf %757, %764 : vector<18x17xf32>
    %c47 = arith.constant 47 : index
    %766 = memref.load %arg1[%c47] : memref<150xf32, #tpu.memory_space<smem>>
    %767 = vector.broadcast %766 : f32 to vector<18x17xf32>
    %768 = arith.mulf %761, %767 : vector<18x17xf32>
    %769 = arith.addf %760, %768 : vector<18x17xf32>
    %770 = vector.extract_strided_slice %704 {offsets = [3, 0], sizes = [18, 17], strides = [1, 1]} : vector<22x17xf32> to vector<18x17xf32>
    %c57 = arith.constant 57 : index
    %771 = memref.load %arg1[%c57] : memref<150xf32, #tpu.memory_space<smem>>
    %772 = vector.broadcast %771 : f32 to vector<18x17xf32>
    %773 = arith.mulf %770, %772 : vector<18x17xf32>
    %774 = arith.addf %765, %773 : vector<18x17xf32>
    %c82 = arith.constant 82 : index
    %775 = memref.load %arg1[%c82] : memref<150xf32, #tpu.memory_space<smem>>
    %776 = vector.broadcast %775 : f32 to vector<18x17xf32>
    %777 = arith.mulf %770, %776 : vector<18x17xf32>
    %778 = arith.addf %769, %777 : vector<18x17xf32>
    %779 = vector.extract_strided_slice %704 {offsets = [1, 0], sizes = [18, 17], strides = [1, 1]} : vector<22x17xf32> to vector<18x17xf32>
    %c72 = arith.constant 72 : index
    %780 = memref.load %arg1[%c72] : memref<150xf32, #tpu.memory_space<smem>>
    %781 = vector.broadcast %780 : f32 to vector<18x17xf32>
    %782 = arith.mulf %779, %781 : vector<18x17xf32>
    %783 = arith.addf %774, %782 : vector<18x17xf32>
    %c97 = arith.constant 97 : index
    %784 = memref.load %arg1[%c97] : memref<150xf32, #tpu.memory_space<smem>>
    %785 = vector.broadcast %784 : f32 to vector<18x17xf32>
    %786 = arith.mulf %779, %785 : vector<18x17xf32>
    %787 = arith.addf %778, %786 : vector<18x17xf32>
    %788 = vector.extract_strided_slice %706 {offsets = [3, 0], sizes = [18, 17], strides = [1, 1]} : vector<22x17xf32> to vector<18x17xf32>
    %c107 = arith.constant 107 : index
    %789 = memref.load %arg1[%c107] : memref<150xf32, #tpu.memory_space<smem>>
    %790 = vector.broadcast %789 : f32 to vector<18x17xf32>
    %791 = arith.mulf %788, %790 : vector<18x17xf32>
    %792 = arith.addf %783, %791 : vector<18x17xf32>
    %c132 = arith.constant 132 : index
    %793 = memref.load %arg1[%c132] : memref<150xf32, #tpu.memory_space<smem>>
    %794 = vector.broadcast %793 : f32 to vector<18x17xf32>
    %795 = arith.mulf %788, %794 : vector<18x17xf32>
    %796 = arith.addf %787, %795 : vector<18x17xf32>
    %797 = vector.extract_strided_slice %706 {offsets = [1, 0], sizes = [18, 17], strides = [1, 1]} : vector<22x17xf32> to vector<18x17xf32>
    %c122 = arith.constant 122 : index
    %798 = memref.load %arg1[%c122] : memref<150xf32, #tpu.memory_space<smem>>
    %799 = vector.broadcast %798 : f32 to vector<18x17xf32>
    %800 = arith.mulf %797, %799 : vector<18x17xf32>
    %801 = arith.addf %792, %800 : vector<18x17xf32>
    %c147 = arith.constant 147 : index
    %802 = memref.load %arg1[%c147] : memref<150xf32, #tpu.memory_space<smem>>
    %803 = vector.broadcast %802 : f32 to vector<18x17xf32>
    %804 = arith.mulf %797, %803 : vector<18x17xf32>
    %805 = arith.addf %796, %804 : vector<18x17xf32>
    %cst_180 = arith.constant 3.000000e+00 : f32
    %806 = vector.broadcast %cst_180 : f32 to vector<18x17xf32>
    %807 = arith.addf %801, %806 : vector<18x17xf32>
    %cst_181 = arith.constant 0.000000e+00 : f32
    %cst_182 = arith.constant 6.000000e+00 : f32
    %808 = vector.broadcast %cst_181 : f32 to vector<18x17xf32>
    %809 = arith.maximumf %808, %807 : vector<18x17xf32>
    %810 = vector.broadcast %cst_182 : f32 to vector<18x17xf32>
    %811 = arith.minimumf %810, %809 : vector<18x17xf32>
    %cst_183 = arith.constant 0.166666672 : f32
    %812 = vector.broadcast %cst_183 : f32 to vector<18x17xf32>
    %813 = arith.mulf %811, %812 : vector<18x17xf32>
    %c0_184 = arith.constant 0 : index
    %c5_185 = arith.constant 5 : index
    %c0_186 = arith.constant 0 : index
    %c0_187 = arith.constant 0 : index
    %814 = vector.load %arg3[%c0_184, %c5_185, %c0_186, %c0_187] : memref<1x18x18x17xf32, #tpu.memory_space<vmem>>, vector<1x1x18x17xf32>
    %815 = vector.shape_cast %814 : vector<1x1x18x17xf32> to vector<18x17xf32>
    %816 = vector.shape_cast %813 : vector<18x17xf32> to vector<1x1x18x17xf32>
    tpu.vector_store %arg3[%c0_184, %c5_185, %c0_186, %c0_187], %816 {strides = array<i32>} : memref<1x18x18x17xf32, #tpu.memory_space<vmem>>, vector<1x1x18x17xf32>,
    %cst_188 = arith.constant 3.000000e+00 : f32
    %817 = vector.broadcast %cst_188 : f32 to vector<18x17xf32>
    %818 = arith.addf %805, %817 : vector<18x17xf32>
    %cst_189 = arith.constant 0.000000e+00 : f32
    %cst_190 = arith.constant 6.000000e+00 : f32
    %819 = vector.broadcast %cst_189 : f32 to vector<18x17xf32>
    %820 = arith.maximumf %819, %818 : vector<18x17xf32>
    %821 = vector.broadcast %cst_190 : f32 to vector<18x17xf32>
    %822 = arith.minimumf %821, %820 : vector<18x17xf32>
    %cst_191 = arith.constant 0.166666672 : f32
    %823 = vector.broadcast %cst_191 : f32 to vector<18x17xf32>
    %824 = arith.mulf %822, %823 : vector<18x17xf32>
    %c0_192 = arith.constant 0 : index
    %c14_193 = arith.constant 14 : index
    %c0_194 = arith.constant 0 : index
    %c0_195 = arith.constant 0 : index
    %825 = vector.load %arg3[%c0_192, %c14_193, %c0_194, %c0_195] : memref<1x18x18x17xf32, #tpu.memory_space<vmem>>, vector<1x1x18x17xf32>
    %826 = vector.shape_cast %825 : vector<1x1x18x17xf32> to vector<18x17xf32>
    %827 = vector.shape_cast %824 : vector<18x17xf32> to vector<1x1x18x17xf32>
    tpu.vector_store %arg3[%c0_192, %c14_193, %c0_194, %c0_195], %827 {strides = array<i32>} : memref<1x18x18x17xf32, #tpu.memory_space<vmem>>, vector<1x1x18x17xf32>,
    %828 = vector.extract_strided_slice %702 {offsets = [4, 0], sizes = [18, 17], strides = [1, 1]} : vector<22x17xf32> to vector<18x17xf32>
    %c2_196 = arith.constant 2 : index
    %829 = memref.load %arg1[%c2_196] : memref<150xf32, #tpu.memory_space<smem>>
    %830 = vector.broadcast %829 : f32 to vector<18x17xf32>
    %831 = arith.mulf %828, %830 : vector<18x17xf32>
    %c27 = arith.constant 27 : index
    %832 = memref.load %arg1[%c27] : memref<150xf32, #tpu.memory_space<smem>>
    %833 = vector.broadcast %832 : f32 to vector<18x17xf32>
    %834 = arith.mulf %828, %833 : vector<18x17xf32>
    %835 = vector.extract_strided_slice %702 {offsets = [2, 0], sizes = [18, 17], strides = [1, 1]} : vector<22x17xf32> to vector<18x17xf32>
    %c17 = arith.constant 17 : index
    %836 = memref.load %arg1[%c17] : memref<150xf32, #tpu.memory_space<smem>>
    %837 = vector.broadcast %836 : f32 to vector<18x17xf32>
    %838 = arith.mulf %835, %837 : vector<18x17xf32>
    %839 = arith.addf %831, %838 : vector<18x17xf32>
    %c42 = arith.constant 42 : index
    %840 = memref.load %arg1[%c42] : memref<150xf32, #tpu.memory_space<smem>>
    %841 = vector.broadcast %840 : f32 to vector<18x17xf32>
    %842 = arith.mulf %835, %841 : vector<18x17xf32>
    %843 = arith.addf %834, %842 : vector<18x17xf32>
    %844 = vector.extract_strided_slice %704 {offsets = [4, 0], sizes = [18, 17], strides = [1, 1]} : vector<22x17xf32> to vector<18x17xf32>
    %c52 = arith.constant 52 : index
    %845 = memref.load %arg1[%c52] : memref<150xf32, #tpu.memory_space<smem>>
    %846 = vector.broadcast %845 : f32 to vector<18x17xf32>
    %847 = arith.mulf %844, %846 : vector<18x17xf32>
    %848 = arith.addf %839, %847 : vector<18x17xf32>
    %c77 = arith.constant 77 : index
    %849 = memref.load %arg1[%c77] : memref<150xf32, #tpu.memory_space<smem>>
    %850 = vector.broadcast %849 : f32 to vector<18x17xf32>
    %851 = arith.mulf %844, %850 : vector<18x17xf32>
    %852 = arith.addf %843, %851 : vector<18x17xf32>
    %853 = vector.extract_strided_slice %704 {offsets = [2, 0], sizes = [18, 17], strides = [1, 1]} : vector<22x17xf32> to vector<18x17xf32>
    %c67 = arith.constant 67 : index
    %854 = memref.load %arg1[%c67] : memref<150xf32, #tpu.memory_space<smem>>
    %855 = vector.broadcast %854 : f32 to vector<18x17xf32>
    %856 = arith.mulf %853, %855 : vector<18x17xf32>
    %857 = arith.addf %848, %856 : vector<18x17xf32>
    %c92 = arith.constant 92 : index
    %858 = memref.load %arg1[%c92] : memref<150xf32, #tpu.memory_space<smem>>
    %859 = vector.broadcast %858 : f32 to vector<18x17xf32>
    %860 = arith.mulf %853, %859 : vector<18x17xf32>
    %861 = arith.addf %852, %860 : vector<18x17xf32>
    %862 = vector.extract_strided_slice %706 {offsets = [4, 0], sizes = [18, 17], strides = [1, 1]} : vector<22x17xf32> to vector<18x17xf32>
    %c102 = arith.constant 102 : index
    %863 = memref.load %arg1[%c102] : memref<150xf32, #tpu.memory_space<smem>>
    %864 = vector.broadcast %863 : f32 to vector<18x17xf32>
    %865 = arith.mulf %862, %864 : vector<18x17xf32>
    %866 = arith.addf %857, %865 : vector<18x17xf32>
    %c127 = arith.constant 127 : index
    %867 = memref.load %arg1[%c127] : memref<150xf32, #tpu.memory_space<smem>>
    %868 = vector.broadcast %867 : f32 to vector<18x17xf32>
    %869 = arith.mulf %862, %868 : vector<18x17xf32>
    %870 = arith.addf %861, %869 : vector<18x17xf32>
    %871 = vector.extract_strided_slice %706 {offsets = [2, 0], sizes = [18, 17], strides = [1, 1]} : vector<22x17xf32> to vector<18x17xf32>
    %c117 = arith.constant 117 : index
    %872 = memref.load %arg1[%c117] : memref<150xf32, #tpu.memory_space<smem>>
    %873 = vector.broadcast %872 : f32 to vector<18x17xf32>
    %874 = arith.mulf %871, %873 : vector<18x17xf32>
    %875 = arith.addf %866, %874 : vector<18x17xf32>
    %c142 = arith.constant 142 : index
    %876 = memref.load %arg1[%c142] : memref<150xf32, #tpu.memory_space<smem>>
    %877 = vector.broadcast %876 : f32 to vector<18x17xf32>
    %878 = arith.mulf %871, %877 : vector<18x17xf32>
    %879 = arith.addf %870, %878 : vector<18x17xf32>
    %cst_197 = arith.constant 3.000000e+00 : f32
    %880 = vector.broadcast %cst_197 : f32 to vector<18x17xf32>
    %881 = arith.addf %875, %880 : vector<18x17xf32>
    %cst_198 = arith.constant 0.000000e+00 : f32
    %cst_199 = arith.constant 6.000000e+00 : f32
    %882 = vector.broadcast %cst_198 : f32 to vector<18x17xf32>
    %883 = arith.maximumf %882, %881 : vector<18x17xf32>
    %884 = vector.broadcast %cst_199 : f32 to vector<18x17xf32>
    %885 = arith.minimumf %884, %883 : vector<18x17xf32>
    %cst_200 = arith.constant 0.166666672 : f32
    %886 = vector.broadcast %cst_200 : f32 to vector<18x17xf32>
    %887 = arith.mulf %885, %886 : vector<18x17xf32>
    %c0_201 = arith.constant 0 : index
    %c8_202 = arith.constant 8 : index
    %c0_203 = arith.constant 0 : index
    %c0_204 = arith.constant 0 : index
    %888 = vector.load %arg3[%c0_201, %c8_202, %c0_203, %c0_204] : memref<1x18x18x17xf32, #tpu.memory_space<vmem>>, vector<1x1x18x17xf32>
    %889 = vector.shape_cast %888 : vector<1x1x18x17xf32> to vector<18x17xf32>
    %890 = vector.shape_cast %887 : vector<18x17xf32> to vector<1x1x18x17xf32>
    tpu.vector_store %arg3[%c0_201, %c8_202, %c0_203, %c0_204], %890 {strides = array<i32>} : memref<1x18x18x17xf32, #tpu.memory_space<vmem>>, vector<1x1x18x17xf32>,
    %cst_205 = arith.constant 3.000000e+00 : f32
    %891 = vector.broadcast %cst_205 : f32 to vector<18x17xf32>
    %892 = arith.addf %879, %891 : vector<18x17xf32>
    %cst_206 = arith.constant 0.000000e+00 : f32
    %cst_207 = arith.constant 6.000000e+00 : f32
    %893 = vector.broadcast %cst_206 : f32 to vector<18x17xf32>
    %894 = arith.maximumf %893, %892 : vector<18x17xf32>
    %895 = vector.broadcast %cst_207 : f32 to vector<18x17xf32>
    %896 = arith.minimumf %895, %894 : vector<18x17xf32>
    %cst_208 = arith.constant 0.166666672 : f32
    %897 = vector.broadcast %cst_208 : f32 to vector<18x17xf32>
    %898 = arith.mulf %896, %897 : vector<18x17xf32>
    %c0_209 = arith.constant 0 : index
    %c17_210 = arith.constant 17 : index
    %c0_211 = arith.constant 0 : index
    %c0_212 = arith.constant 0 : index
    %899 = vector.load %arg3[%c0_209, %c17_210, %c0_211, %c0_212] : memref<1x18x18x17xf32, #tpu.memory_space<vmem>>, vector<1x1x18x17xf32>
    %900 = vector.shape_cast %899 : vector<1x1x18x17xf32> to vector<18x17xf32>
    %901 = vector.shape_cast %898 : vector<18x17xf32> to vector<1x1x18x17xf32>
    tpu.vector_store %arg3[%c0_209, %c17_210, %c0_211, %c0_212], %901 {strides = array<i32>} : memref<1x18x18x17xf32, #tpu.memory_space<vmem>>, vector<1x1x18x17xf32>,
    return
  }
  func.func @transform_0(%arg0: i32) -> i32 {
    %c0_i32 = arith.constant 0 : i32
    %c0_i32_0 = arith.constant 0 : i32
    return %c0_i32 : i32
  }
  func.func @transform_1(%arg0: i32) -> (i32, i32, i32, i32) {
    %c0_i32 = arith.constant 0 : i32
    %c0_i32_0 = arith.constant 0 : i32
    %c0_i32_1 = arith.constant 0 : i32
    %c0_i32_2 = arith.constant 0 : i32
    return %arg0, %c0_i32, %c0_i32_0, %c0_i32_1 : i32, i32, i32, i32
  }
  func.func @transform_2(%arg0: i32) -> (i32, i32, i32, i32) {
    %c0_i32 = arith.constant 0 : i32
    %c0_i32_0 = arith.constant 0 : i32
    %c0_i32_1 = arith.constant 0 : i32
    %c0_i32_2 = arith.constant 0 : i32
    return %arg0, %c0_i32, %c0_i32_0, %c0_i32_1 : i32, i32, i32, i32
  }
}

</mosaic_0001>

<bundles_post_ra>
// kernel: tpu_custom_call.1
= control target key start
LH: loop header
LB: loop body
LE: loop exit
PB: predicated region body
PF: predicated region fallthrough
CT: control target
= control target key end

     0   :  { %s6170_s0 = inlined_call_operand.hbm [shape: f32[150], index: 0, kind: input, shape index: {}]   ;;  %s6171_s1 = inlined_call_operand.hbm [shape: f32[2,3,16,16], index: 1, kind: input, shape index: {}]   ;;  %s6172_s2 = inlined_call_operand.vmem [shape: f32[2,18,18,17], index: 2, kind: output, shape index: {}]  }
   0x1   :  { %6227 = sst [smem:[#allocation90_spill]] %s6170_s0 }
   0x2   :  { %6228 = sst [smem:[#allocation91_spill]] %s6171_s1 }
   0x3   :  { %7 = vsyncpa [#allocation5], 0 }
   0x4   :  { %8 = vsyncpa [#allocation4], 0 }
   0x5   :  { %10 = vsyncpa [#allocation4 + $0x1], 0  ;;  %s3634_s9 = smov 0   ;;  %s3636_s10 = smov 0  }
   0x6   :  { %s3638_s11 = smov 0   ;;  %s3640_s12 = smov 0  }
   0x7 LB: > { %6229 = sst [smem:[#allocation9_spill]] %s3604_s11  ;;  %s3653_s13 = sadd.s32 4294967295, %s3608_s12   ;;  %s3608_s12 = sphi %s3640_s12, %s6572_s12   ;;  %s3604_s11 = sphi %s3638_s11, %s6569_s11   ;;  %s3600_s10 = sphi %s3636_s10, %s6571_s10   ;;  %s3596_s9 = sphi %s3634_s9, %s6570_s9  }
   0x8   : > { %s3656_s14 = sadd.s32 1, %s3608_s12   ;;  %s44_s16 = sadd.s32 1, %s3604_s11 }
   0x9   : > { %s41_s15 = ssub.s32 %s3608_s12, %s3656_s14  ;;  %p51_p1 = scmp.ne.s32.totalorder %s3604_s11, %s3600_s10 }
   0xa   : > { %p42_p0 = scmp.eq.s32.totalorder %s41_s15, 0  ;;  %p52_p2 = scmp.eq.s32.totalorder %s3608_s12, 0 }
   0xb   : > { %p57_p3 = scmp.ne.s32.totalorder %s3600_s10, %s3596_s9  ;;  %p6173_p5 = scmp.eq.s32.totalorder %s3653_s13, 0 }
   0xc   : > { %s3666_s17 = scalar_select %p42_p0, %s3604_s11, %s44_s16  }
   0xd   : > { %p53_p4 = por %p52_p2, %p51_p1  ;;  %p3228_p6 = scmp.ge.s32.totalorder %s3608_s12, 1 }
   0xe   : > { %6230 = sst [smem:[#allocation10_spill]] %s3666_s17  ;;  %p94_p7 = scmp.lt.s32.totalorder %s3608_s12, 3 }
   0xf   : > { %p3673_p8 = por %p6173_p5, %p57_p3  ;;  %p3460_p10 = scmp.lt.s32.totalorder %s3608_s12, 2 }
  0x10   : > { %p3677_p9 = pnand %p3228_p6, %p94_p7  ;;  %s116_s20 = sand.u32 1, %s3604_s11  }
  0x11   : > { %s6231_s18 = scalar_select %p3673_p8, 1, 0 }
  0x12   : > { %p3451_p11 = pneg %p3677_p9  ;;  %p3685_p12 = pnand %p3460_p10, %p53_p4 }
  0x13   : > { %s3441_s22 = smul.u32 48, %s116_s20  ;;  %s6234_s0 = sld [smem:[#allocation90_spill]] }
  0x14   : > { %p3452_p13 = pnand %p3451_p11, %p6173_p5  ;;  %s3442_s23 = smul.u32 768, %s3608_s12 }
  0x16   : > { %p3529_p1 = pneg %p3452_p13 }
  0x19   : > { %s3527_s26 = scalar_lea.hbm %s6234_s0, 32 }
  0x1a   : > { %p3528_p0 = scmp.ne.s32.totalorder %s6234_s0, %s3527_s26  ;;  %p3534_p4 = scmp.lt.u32.totalorder %s3527_s26, %s6234_s0 }
  0x1c   : > { %p3530_p2 = pnand %p3529_p1, %p3528_p0 }
  0x1e   : > { %p3531_p3 = pneg %p3530_p2 }
  0x20   : > { %p3536_p6 = pnand %p3534_p4, %p3531_p3 }
  0x22   : > { %3539 = shalt.err (!%p3536_p6)
}
  0x23   : > { %s3610_s3 = smov [#allocation3]   ;;  %s6235_s1 = sld [smem:[#allocation91_spill]] }
  0x24   : > { %3454 = dma.hbm_to_smem (!%p3452_p13), %s6234_s0, 32, %s3610_s3, [#allocation5]  }
  0x25   : > { %s120_s9 = scalar_lea.vmem [#allocation6], %s3441_s22  ;;  %s3711_s15 = scalar_lea.sflag [#allocation4], %s116_s20 }
  0x26   : > { %s127_s12 = sshll.u32 %s120_s9, 4  ;;  %p3542_p10 = pneg %p3685_p12  ;;  %s3709_s12 = int_to_ptr.vmem [resolvable:$true] %s127_s12 }
  0x29   : > { %s3707_s8 = scalar_lea.hbm %s6235_s1, %s3442_s23  ;;  %s3545_s25 = scalar_lea.hbm %s6235_s1, 1536 }
  0x2a   : > { %s3540_s16 = scalar_lea.hbm %s3707_s8, 768  ;;  %p3546_p0 = scmp.lt.u32.totalorder %s3707_s8, %s6235_s1 }
  0x2b   : > { %p3541_p7 = scmp.ne.s32.totalorder %s3707_s8, %s3540_s16  ;;  %p3547_p1 = scmp.lt.u32.totalorder %s3545_s25, %s3540_s16 }
  0x2c   : > { %p3549_p3 = scmp.lt.u32.totalorder %s3540_s16, %s3707_s8 }
  0x2d   : > { %p3543_p11 = pnand %p3542_p10, %p3541_p7  ;;  %p3548_p2 = por %p3547_p1, %p3546_p0 }
  0x2f   : > { %p3544_p13 = pneg %p3543_p11  ;;  %p3550_p4 = por %p3549_p3, %p3548_p2 }
  0x31   : > { %p3551_p6 = pnand %p3550_p4, %p3544_p13 }
  0x33   : > { %3554 = shalt.err (!%p3551_p6)
}
  0x34   : > { %s3555_s20 = scalar_lea.vmem %s3709_s12, 768  ;;  %s3611_s22 = smov [#allocation6]  }
  0x35   : > { %p3556_p7 = scmp.ne.s32.totalorder %s3709_s12, %s3555_s20  ;;  %s3560_s28 = sshll.u32 %s3611_s22, 4  ;;  %s3561_s28 = int_to_ptr.vmem [resolvable:$false] %s3560_s28 }
  0x36   : > { %s3562_s29 = scalar_lea.vmem %s3561_s28, 1536  ;;  %p3563_p8 = scmp.lt.s32.totalorder %s3709_s12, %s3561_s28 }
  0x37   : > { %p3558_p11 = pnand %p3556_p7, %p3542_p10  ;;  %p3564_p0 = scmp.lt.s32.totalorder %s3562_s29, %s3555_s20 }
  0x39   : > { %p3559_p5 = pneg %p3558_p11  ;;  %p3565_p1 = por %p3564_p0, %p3563_p8 }
  0x3b   : > { %p3566_p2 = pnand %p3565_p1, %p3559_p5 }
  0x3d   : > { %3569 = shalt.err (!%p3566_p2)
}
  0x3e   : > { %s3612_s30 = smov 128   ;;  %s3613_s3 = smov 8  }
  0x3f   : > { %3458 = dma.hbm_to_vmem [thread:$0]  (!%p3685_p12), %s3707_s8, 768, %s3709_s12, %s3711_s15, %s3612_s30, %s3612_s30, %s3613_s3  }
  0x40   : > { %139 = sbr.rel (%p3677_p9) target bundleno = 993 (0x3e1), region = 28 }
  0x47   : > { %p6236_p10 = scmp.eq.s32.totalorder %s3653_s13, 0 }
  0x49   : > { %3587 = dma.done.wait (%p6236_p10), [#allocation5], 32   ;;  %p6237_p13 = pmov %p6236_p10 }
  0x4a   : > { %s145_s4 = sand.u32 1, %s3600_s10   ;;  %p6238_p5 = scmp.ne.s32.totalorder %s6231_s18, 0 }
  0x4b   : > { %3589 = vsyncadd (%p6237_p13), [#allocation5], 4294967264  ;;  %s3443_s5 = smul.u32 48, %s145_s4  ;;  %s146_s6 = scalar_lea.sflag [#allocation4], %s145_s4 }
  0x4d   : > { %s149_s7 = scalar_lea.vmem [#allocation6], %s3443_s5 }
  0x4e   : > { %3591 = dma.done.wait (%p6238_p5), %s146_s6, 768  }
  0x4f   : > { %3593 = vsyncadd (%p6238_p5), %s146_s6, 4294966528 }
  0x50   : > { %154 = sfence }
  0x51   : > { %v3235_v0 = vld [vmem:[%s149_s7 + $0x10] sm:$0xff]  ;;  %v187_v1 = vld [vmem:[%s149_s7] sm:$0xff]  ;;  %vm176_vm0 = vcmask 179200   ;;  %s3614_s19 = smov 3   ;;  %vm179_vm1 = vcmask 177152   ;;  %v3236_v2 = vld [vmem:[%s149_s7 + $0x18] sm:$0xff] }
  0x52   : > { %205 = vrot.lane.b32.xlu1 %v3235_v0, %s3614_s19  ;;  %191 = vrot.lane.b32.xlu0 %v187_v1, %s3614_s19  ;;  %v188_v3 = vld [vmem:[%s149_s7 + $0x8] sm:$0xff]  ;;  %v3615_v4 = vmov 0.0   ;;  %v3237_v6 = vld [vmem:[%s149_s7 + $0x20] sm:$0xff]  ;;  %vm197_vm2 = vcmask 154648   ;;  %s3241_s18 = sld [smem:[#allocation3 + $0xe]]  ;;  %s3242_s21 = sld [smem:[#allocation3 + $0x27]] }
  0x53   : > { %181 = vst.msk [vmem:[#allocation2 + $0x18] sm:$0xff] %vm176_vm0, %v3615_v4  ;;  %182 = vst.msk [vmem:[#allocation2 + $0x20] sm:$0xff] %vm176_vm0, %v3615_v4  ;;  %v3238_v5 = vld [vmem:[%s149_s7 + $0x28] sm:$0xff]  ;;  %s3245_s8 = sld [smem:[#allocation3 + $0x40]]  ;;  %s6175_s9 = smov 2   ;;  %vm475_vm3 = vcmask 1041408  }
  0x54   : > { %177 = vst.msk [vmem:[#allocation2] sm:$0xff] %vm176_vm0, %v3615_v4  ;;  %178 = vst.msk [vmem:[#allocation2 + $0x8] sm:$0xff] %vm176_vm0, %v3615_v4  ;;  %s3246_s12 = sld [smem:[#allocation3 + $0x59]]  ;;  %s3249_s15 = sld [smem:[#allocation3 + $0x72]]  ;;  %vm423_vm4 = vcmask 138242   ;;  %vm425_vm5 = vcmask 138240  }
  0x55   : > { %184 = vst.msk [vmem:[#allocation2 + $0x30] sm:$0xff] %vm176_vm0, %v3615_v4  ;;  %185 = vst.msk [vmem:[#allocation2 + $0x38] sm:$0xff] %vm176_vm0, %v3615_v4  ;;  %s3250_s16 = sld [smem:[#allocation3 + $0x8b]]  ;;  %s3258_s23 = sld [smem:[#allocation3 + $0x9]]  ;;  %vm427_vm6 = vcmask 134144   ;;  %vm909_vm7 = vcmask 138243  }
  0x56   : > { %183 = vst.msk [vmem:[#allocation2 + $0x28] sm:$0x3f] %vm179_vm1, %v3615_v4  ;;  %180 = vst.msk [vmem:[#allocation2 + $0x10] sm:$0x3f] %vm179_vm1, %v3615_v4  ;;  %207 = vrot.lane.b32.xlu1 %v3236_v2, %s3614_s19  ;;  %193 = vrot.lane.b32.xlu0 %v188_v3, %s3614_s19  ;;  %s3259_s24 = sld [smem:[#allocation3 + $0x22]]  ;;  %s3266_s25 = sld [smem:[#allocation3 + $0x3b]] }
  0x57   : > { %186 = vst.msk [vmem:[#allocation2 + $0x40] sm:$0x3f] %vm179_vm1, %v3615_v4  ;;  %s3267_s26 = sld [smem:[#allocation3 + $0x54]]  ;;  %s3274_s27 = sld [smem:[#allocation3 + $0x6d]]  ;;  %vm1393_vm8 = vcmask 138244   ;;  %vm912_vm9 = vcmask 135168  }
  0x58   : > { %v248_v11 = vstv %s3241_s18  ;;  %v268_v20 = vstv %s3242_s21  ;;  %s3275_s20 = sld [smem:[#allocation3 + $0x86]]  ;;  %s3288_s22 = sld [smem:[#allocation3 + $0x4]]  ;;  %vm1396_vm10 = vcmask 136192  }
  0x59   : > { %v304_v21 = vstv %s3245_s8  ;;  %s3289_s28 = sld [smem:[#allocation3 + $0x1d]]  ;;  %s3260_s29 = sld [smem:[#allocation3 + $0x18]] }
  0x5a   : > { %221 = vrot.lane.b32.xlu1 %v3238_v5, %s3614_s19  ;;  %219 = vrot.lane.b32.xlu0 %v3237_v6, %s3614_s19  ;;  %v324_v31 = vstv %s3246_s12  ;;  %v360_v32 = vstv %s3249_s15  ;;  %s3261_s30 = sld [smem:[#allocation3 + $0x31]]  ;;  %s3268_s3 = sld [smem:[#allocation3 + $0x4a]] }
  0x5b   : > { %v380_v42 = vstv %s3250_s16  ;;  %v507_v45 = vstv %s3258_s23  ;;  %s3269_s4 = sld [smem:[#allocation3 + $0x63]]  ;;  %s3276_s5 = sld [smem:[#allocation3 + $0x7c]] }
  0x5c   : > { %v527_v50 = vstv %s3259_s24  ;;  %v651_v53 = vstv %s3266_s25  ;;  %s3277_s6 = sld [smem:[#allocation3 + $0x95]]  ;;  %s3290_s7 = sld [smem:[#allocation3 + $0x13]] }
  0x5d   : > { %v671_v58 = vstv %s3267_s26  ;;  %v795_v61 = vstv %s3274_s27  ;;  %s3291_s19 = sld [smem:[#allocation3 + $0x2c]]  ;;  %s3296_s18 = sld [smem:[#allocation3 + $0x36]] }
  0x5e   : > { %v815_v2 = vstv %s3275_s20  ;;  %v991_v5 = vstv %s3288_s22  ;;  %s3297_s21 = sld [smem:[#allocation3 + $0x4f]]  ;;  %s3298_s8 = sld [smem:[#allocation3 + $0x45]] }
  0x5f   : > { %s3299_s12 = sld [smem:[#allocation3 + $0x5e]]  ;;  %s3304_s15 = sld [smem:[#allocation3 + $0x68]] }
  0x60   : > { %s3305_s16 = sld [smem:[#allocation3 + $0x81]]  ;;  %s3306_s23 = sld [smem:[#allocation3 + $0x77]] }
  0x61   : > { %s3307_s24 = sld [smem:[#allocation3 + $0x90]]  ;;  %s3316_s25 = sld [smem:[#allocation3 + $0xd]] }
  0x62   : > { %s3239_s26 = sld [smem:[#allocation3 + $0xb]]  ;;  %s3317_s27 = sld [smem:[#allocation3 + $0x26]] }
  0x63   : > { %s3243_s20 = sld [smem:[#allocation3 + $0x3d]]  ;;  %s3320_s22 = sld [smem:[#allocation3 + $0x3f]] }
  0x64   : > { %s4253_s0 = sld [smem:[#allocation3 + $0x7e]]  ;;  %s4255_s1 = sld [smem:[#allocation3 + $0x74]] }
  0x65   : > { %s4263_s17 = sld [smem:[#allocation3 + $0x8d]]  ;;  %s4265_s11 = sld [smem:[#allocation3 + $0x3c]] }
  0x66   : > { %p171_p8 = scmp.lt.s32.totalorder %s3653_s13, 1 }
  0x68   : > { %s6574_s13 = smov (!%p171_p8, %s3653_s13), 1 }
  0xc4   : > { %v206_v7 = vpop.permute.xlu1 %205  ;;  %v192_v8 = vpop.permute.xlu0 %191 }
  0xc5   : > { %212 = vst.msk [vmem:[#allocation2 + $0x1b] sm:$0xff] %vm197_vm2, %v206_v7  ;;  %198 = vst.msk [vmem:[#allocation2 + $0x3] sm:$0xff] %vm197_vm2, %v192_v8 }
  0xc8   : > { %v208_v9 = vpop.permute.xlu1 %207  ;;  %v194_v10 = vpop.permute.xlu0 %193 }
  0xc9   : > { %213 = vst.msk [vmem:[#allocation2 + $0x23] sm:$0xff] %vm197_vm2, %v208_v9  ;;  %199 = vst.msk [vmem:[#allocation2 + $0xb] sm:$0xff] %vm197_vm2, %v194_v10  ;;  %v1011_v10 = vstv %s3289_s28  ;;  %s3240_s28 = sld [smem:[#allocation3 + $0x24]] }
  0xcc   : > { %v3754_v12 = vld [vmem:[#allocation2] sm:$0xff]  ;;  %v222_v13 = vpop.permute.xlu1 %221  ;;  %v220_v14 = vpop.permute.xlu0 %219  ;;  %v3770_v24 = vld [vmem:[#allocation2 + $0x18] sm:$0xff] }
  0xcd   : > { %227 = vst.msk [vmem:[#allocation2 + $0x3b] sm:$0xff] %vm197_vm2, %v222_v13  ;;  %226 = vst.msk [vmem:[#allocation2 + $0x33] sm:$0xff] %vm197_vm2, %v220_v14  ;;  %v249_v15 = vmul.f32 %v248_v11, %v3754_v12  ;;  %v269_v22 = vmul.f32 %v268_v20, %v3754_v12  ;;  %v305_v25 = vmul.f32 %v304_v21, %v3770_v24 }
  0xce   : > { %v325_v33 = vmul.f32 %v324_v31, %v3770_v24  ;;  %v508_v47 = vmul.f32 %v507_v45, %v3754_v12  ;;  %v528_v51 = vmul.f32 %v527_v50, %v3754_v12  ;;  %v652_v55 = vmul.f32 %v651_v53, %v3770_v24 }
  0xcf   : > { %255 = vrot.lane.b32.xlu0 %v249_v15, %s6175_s9  ;;  %v672_v59 = vmul.f32 %v671_v58, %v3770_v24  ;;  %v992_v7 = vmul.f32 %v991_v5, %v3754_v12  ;;  %v1012_v13 = vmul.f32 %v1011_v10, %v3754_v12 }
  0xd0   : > { %v3760_v16 = vld [vmem:[#allocation2 + $0x8] sm:$0xff]  ;;  %v3762_v17 = vld [vmem:[#allocation2 + $0x10] sm:$0x3f]  ;;  %v3781_v29 = vld [vmem:[#allocation2 + $0x20] sm:$0xff] }
  0xd1   : > { %v250_v18 = vmul.f32 %v248_v11, %v3760_v16  ;;  %v251_v19 = vmul.f32 %v248_v11, %v3762_v17  ;;  %v270_v23 = vmul.f32 %v268_v20, %v3760_v16  ;;  %v271_v26 = vmul.f32 %v268_v20, %v3762_v17  ;;  %v3776_v27 = vld [vmem:[#allocation2 + $0x28] sm:$0x3f] }
  0xd2   : > { %v307_v28 = vmul.f32 %v304_v21, %v3776_v27  ;;  %v306_v30 = vmul.f32 %v304_v21, %v3781_v29  ;;  %v326_v34 = vmul.f32 %v324_v31, %v3781_v29  ;;  %v327_v38 = vmul.f32 %v324_v31, %v3776_v27 }
  0xd3   : > { %257 = vrot.lane.b32.xlu1 %v250_v18, %s6175_s9  ;;  %259 = vrot.lane.b32.xlu0 %v251_v19, %s6175_s9  ;;  %v509_v48 = vmul.f32 %v507_v45, %v3760_v16  ;;  %v510_v49 = vmul.f32 %v507_v45, %v3762_v17  ;;  %v529_v52 = vmul.f32 %v527_v50, %v3760_v16  ;;  %v547_v11 = vstv %s3260_s29  ;;  %s3247_s29 = sld [smem:[#allocation3 + $0x6f]] }
  0xd4   : > { %v3788_v35 = vld [vmem:[#allocation2 + $0x30] sm:$0xff]  ;;  %v3793_v37 = vld [vmem:[#allocation2 + $0x40] sm:$0x3f]  ;;  %v3796_v39 = vld [vmem:[#allocation2 + $0x38] sm:$0xff]  ;;  %v530_v54 = vmul.f32 %v527_v50, %v3762_v17  ;;  %v653_v56 = vmul.f32 %v651_v53, %v3781_v29  ;;  %v654_v57 = vmul.f32 %v651_v53, %v3776_v27  ;;  %v673_v60 = vmul.f32 %v671_v58, %v3781_v29 }
  0xd5   : > { %v361_v36 = vmul.f32 %v360_v32, %v3788_v35  ;;  %v362_v40 = vmul.f32 %v360_v32, %v3796_v39  ;;  %v363_v41 = vmul.f32 %v360_v32, %v3793_v37  ;;  %v381_v43 = vmul.f32 %v380_v42, %v3788_v35 }
  0xd6   : > { %v382_v44 = vmul.f32 %v380_v42, %v3796_v39  ;;  %v383_v46 = vmul.f32 %v380_v42, %v3793_v37  ;;  %v674_v62 = vmul.f32 %v671_v58, %v3776_v27  ;;  %v796_v63 = vmul.f32 %v795_v61, %v3788_v35 }
  0xd7   : > { %275 = vrot.lane.b32.xlu1 %v269_v22, %s6175_s9  ;;  %277 = vrot.lane.b32.xlu0 %v270_v23, %s6175_s9  ;;  %v797_v0 = vmul.f32 %v795_v61, %v3796_v39  ;;  %v798_v1 = vmul.f32 %v795_v61, %v3793_v37  ;;  %v816_v3 = vmul.f32 %v815_v2, %v3788_v35  ;;  %v572_v18 = vstv %s3261_s30  ;;  %s4055_s30 = sld [smem:[#allocation3 + $0x56]] }
  0xd8   : > { %v817_v4 = vmul.f32 %v815_v2, %v3796_v39  ;;  %v818_v6 = vmul.f32 %v815_v2, %v3793_v37  ;;  %v993_v8 = vmul.f32 %v991_v5, %v3760_v16  ;;  %v994_v9 = vmul.f32 %v991_v5, %v3762_v17 }
  0xd9   : > { %v1013_v14 = vmul.f32 %v1011_v10, %v3760_v16  ;;  %v548_v15 = vmul.f32 %v547_v11, %v3754_v12  ;;  %v691_v19 = vstv %s3268_s3  ;;  %v1014_v20 = vmul.f32 %v1011_v10, %v3762_v17  ;;  %s4060_s3 = sld [smem:[#allocation3 + $0x58]] }
  0xda   : > { %v573_v22 = vmul.f32 %v572_v18, %v3754_v12  ;;  %v692_v23 = vmul.f32 %v691_v19, %v3770_v24  ;;  %v694_v50 = vmul.f32 %v691_v19, %v3776_v27  ;;  %v1031_v5 = vstv %s3290_s7  ;;  %s6177_s7 = smov 125  }
  0xdb   : > { %279 = vrot.lane.b32.xlu1 %v271_v26, %s6175_s9  ;;  %311 = vrot.lane.b32.xlu0 %v305_v25, %s6175_s9  ;;  %v554_v21 = vrot.slane %v548_v15, 6  ;;  %v716_v25 = vstv %s3269_s4  ;;  %v835_v26 = vstv %s3276_s5  ;;  %s4071_s4 = sld [smem:[#allocation3 + $0x88]]  ;;  %s4085_s5 = sld [smem:[#allocation3 + $0x71]] }
  0xdc   : > { %v717_v31 = vmul.f32 %v716_v25, %v3770_v24  ;;  %v836_v32 = vmul.f32 %v835_v26, %v3788_v35  ;;  %v719_v58 = vmul.f32 %v716_v25, %v3776_v27  ;;  %v837_v61 = vmul.f32 %v835_v26, %v3796_v39 }
  0xde   : > { %v843_v2 = vrot.slane %v837_v61, 6 }
  0xdf   : > { %313 = vrot.lane.b32.xlu1 %v306_v30, %s6175_s9  ;;  %315 = vrot.lane.b32.xlu0 %v307_v28, %s6175_s9  ;;  %v579_v28 = vrot.slane %v573_v22, 6  ;;  %v698_v30 = vrot.slane %v692_v23, 6  ;;  %v1056_v23 = vstv %s3291_s19  ;;  %s4195_s19 = sld [smem:[#allocation3 + $0x6]] }
  0xe3   : > { %331 = vrot.lane.b32.xlu1 %v325_v33, %s6175_s9  ;;  %333 = vrot.lane.b32.xlu0 %v326_v34, %s6175_s9  ;;  %v860_v33 = vstv %s3277_s6  ;;  %v549_v34 = vmul.f32 %v547_v11, %v3760_v16  ;;  %s4113_s6 = sld [smem:[#allocation3 + $0x8a]] }
  0xe5   : > { %v555_v42 = vrot.slane %v549_v34, 6 }
  0xe7   : > { %335 = vrot.lane.b32.xlu1 %v327_v38, %s6175_s9  ;;  %367 = vrot.lane.b32.xlu0 %v361_v36, %s6175_s9  ;;  %v550_v36 = vmul.f32 %v547_v11, %v3762_v17  ;;  %v723_v38 = vrot.slane %v717_v31, 6  ;;  %v556_v53 = vsel %vm475_vm3, %v554_v21, %v555_v42  ;;  %v1057_v31 = vmul.f32 %v1056_v23, %v3754_v12 }
  0xeb   : > { %369 = vrot.lane.b32.xlu1 %v362_v40, %s6175_s9  ;;  %371 = vrot.lane.b32.xlu0 %v363_v41, %s6175_s9  ;;  %v842_v40 = vrot.slane %v836_v32, 6  ;;  %v861_v41 = vmul.f32 %v860_v33, %v3788_v35 }
  0xed   : > { %v867_v45 = vrot.slane %v861_v41, 6  ;;  %v844_v11 = vsel %vm475_vm3, %v842_v40, %v843_v2  ;;  %v1063_v41 = vrot.slane %v1057_v31, 6 }
  0xef   : > { %387 = vrot.lane.b32.xlu1 %v381_v43, %s6175_s9  ;;  %389 = vrot.lane.b32.xlu0 %v382_v44, %s6175_s9  ;;  %v557_v43 = vrot.slane %v550_v36, 6  ;;  %v574_v44 = vmul.f32 %v572_v18, %v3760_v16 }
  0xf3   : > { %391 = vrot.lane.b32.xlu1 %v383_v46, %s6175_s9  ;;  %514 = vrot.lane.b32.xlu0 %v508_v47, %s6175_s9  ;;  %v575_v46 = vmul.f32 %v572_v18, %v3762_v17  ;;  %v693_v47 = vmul.f32 %v691_v19, %v3781_v29  ;;  %v1033_v18 = vmul.f32 %v1031_v5, %v3760_v16 }
  0xf4   : > { %v1034_v19 = vmul.f32 %v1031_v5, %v3762_v17 }
  0xf7   : > { %516 = vrot.lane.b32.xlu1 %v509_v48, %s6175_s9  ;;  %518 = vrot.lane.b32.xlu0 %v510_v49, %s6175_s9  ;;  %v558_v48 = vsel %vm475_vm3, %v555_v42, %v557_v43  ;;  %v580_v49 = vrot.slane %v574_v44, 6 }
  0xfb   : > { %534 = vrot.lane.b32.xlu1 %v528_v51, %s6175_s9  ;;  %536 = vrot.lane.b32.xlu0 %v529_v52, %s6175_s9  ;;  %v582_v51 = vrot.slane %v575_v46, 6  ;;  %v699_v52 = vrot.slane %v693_v47, 6  ;;  %v1135_v46 = vstv %s3296_s18  ;;  %s4197_s18 = sld [smem:[#allocation3 + $0x15]] }
  0xff   : > { %538 = vrot.lane.b32.xlu1 %v530_v54, %s6175_s9  ;;  %658 = vrot.lane.b32.xlu0 %v652_v55, %s6175_s9  ;;  %v581_v54 = vsel %vm475_vm3, %v579_v28, %v580_v49  ;;  %v701_v55 = vrot.slane %v694_v50, 6 }
 0x103   : > { %660 = vrot.lane.b32.xlu1 %v653_v56, %s6175_s9  ;;  %662 = vrot.lane.b32.xlu0 %v654_v57, %s6175_s9  ;;  %v718_v56 = vmul.f32 %v716_v25, %v3781_v29  ;;  %v583_v57 = vsel %vm475_vm3, %v580_v49, %v582_v51  ;;  %v1136_v49 = vmul.f32 %v1135_v46, %v3770_v24 }
 0x107   : > { %678 = vrot.lane.b32.xlu1 %v672_v59, %s6175_s9  ;;  %680 = vrot.lane.b32.xlu0 %v673_v60, %s6175_s9  ;;  %v702_v59 = vsel %vm475_vm3, %v699_v52, %v701_v55  ;;  %v724_v60 = vrot.slane %v718_v56, 6  ;;  %v1155_v55 = vstv %s3297_s21  ;;  %v1175_v56 = vstv %s3298_s8  ;;  %s4199_s21 = sld [smem:[#allocation3 + $0x1f]]  ;;  %s4205_s8 = sld [smem:[#allocation3 + $0x2e]] }
 0x108   : > { %v1176_v61 = vmul.f32 %v1175_v56, %v3770_v24 }
 0x10b   : > { %682 = vrot.lane.b32.xlu1 %v674_v62, %s6175_s9  ;;  %802 = vrot.lane.b32.xlu0 %v796_v63, %s6175_s9  ;;  %v838_v62 = vmul.f32 %v835_v26, %v3793_v37  ;;  %v700_v63 = vsel %vm475_vm3, %v698_v30, %v699_v52  ;;  %v1039_v26 = vrot.slane %v1033_v18, 6 }
 0x10f   : > { %804 = vrot.lane.b32.xlu1 %v797_v0, %s6175_s9  ;;  %806 = vrot.lane.b32.xlu0 %v798_v1, %s6175_s9  ;;  %v726_v0 = vrot.slane %v719_v58, 6  ;;  %v725_v1 = vsel %vm475_vm3, %v723_v38, %v724_v60 }
 0x113   : > { %822 = vrot.lane.b32.xlu1 %v816_v3, %s6175_s9  ;;  %824 = vrot.lane.b32.xlu0 %v817_v4, %s6175_s9  ;;  %v845_v3 = vrot.slane %v838_v62, 6  ;;  %v862_v4 = vmul.f32 %v860_v33, %v3796_v39  ;;  %v1177_v62 = vmul.f32 %v1175_v56, %v3781_v29 }
 0x117   : > { %826 = vrot.lane.b32.xlu1 %v818_v6, %s6175_s9  ;;  %998 = vrot.lane.b32.xlu0 %v992_v7, %s6175_s9  ;;  %v727_v6 = vsel %vm475_vm3, %v724_v60, %v726_v0  ;;  %v846_v7 = vsel %vm475_vm3, %v843_v2, %v845_v3  ;;  %v1157_v60 = vmul.f32 %v1155_v55, %v3781_v29  ;;  %v1200_v0 = vstv %s3299_s12  ;;  %s4207_s12 = sld [smem:[#allocation3 + $0x1]] }
 0x118   : > { %v1158_v3 = vmul.f32 %v1155_v55, %v3776_v27 }
 0x11b   : > { %1000 = vrot.lane.b32.xlu1 %v993_v8, %s6175_s9  ;;  %1002 = vrot.lane.b32.xlu0 %v994_v9, %s6175_s9  ;;  %v868_v8 = vrot.slane %v862_v4, 6  ;;  %v863_v9 = vmul.f32 %v860_v33, %v3793_v37  ;;  %v1182_v4 = vrot.slane %v1176_v61, 6 }
 0x11d   : > { %v870_v15 = vrot.slane %v863_v9, 6 }
 0x11f   : > { %1018 = vrot.lane.b32.xlu1 %v1012_v13, %s6175_s9  ;;  %1020 = vrot.lane.b32.xlu0 %v1013_v14, %s6175_s9  ;;  %v1032_v13 = vmul.f32 %v1031_v5, %v3754_v12  ;;  %v869_v14 = vsel %vm475_vm3, %v867_v45, %v868_v8  ;;  %v871_v25 = vsel %vm475_vm3, %v868_v8, %v870_v15 }
 0x120   : > { %v1201_v5 = vmul.f32 %v1200_v0, %v3770_v24  ;;  %v1202_v8 = vmul.f32 %v1200_v0, %v3781_v29 }
 0x121   : > { %v1038_v22 = vrot.slane %v1032_v13, 6 }
 0x122   : > { %v1207_v13 = vrot.slane %v1201_v5, 6  ;;  %v1208_v18 = vrot.slane %v1202_v8, 6 }
 0x123   : > { %1022 = vrot.lane.b32.xlu1 %v1014_v20, %s6175_s9  ;;  %559 = vrot.lane.b32.xlu0 %v554_v21, %s6175_s9  ;;  %v1040_v34 = vsel %vm475_vm3, %v1038_v22, %v1039_v26 }
 0x127   : > { %584 = vrot.lane.b32.xlu1 %v579_v28, %s6175_s9  ;;  %703 = vrot.lane.b32.xlu0 %v698_v30, %s6175_s9  ;;  %v1041_v28 = vrot.slane %v1034_v19, 6  ;;  %v1058_v30 = vmul.f32 %v1056_v23, %v3760_v16  ;;  %v1203_v19 = vmul.f32 %v1200_v0, %v3776_v27 }
 0x129   : > { %v1042_v36 = vsel %vm475_vm3, %v1039_v26, %v1041_v28  ;;  %v1210_v26 = vrot.slane %v1203_v19, 6  ;;  %v1279_v28 = vstv %s3304_s15  ;;  %s4209_s15 = sld [smem:[#allocation3 + $0x10]] }
 0x12b   : > { %728 = vrot.lane.b32.xlu1 %v723_v38, %s6175_s9  ;;  %847 = vrot.lane.b32.xlu0 %v842_v40, %s6175_s9  ;;  %v1064_v38 = vrot.slane %v1058_v30, 6  ;;  %v1059_v40 = vmul.f32 %v1056_v23, %v3762_v17 }
 0x12d   : > { %v1065_v44 = vsel %vm475_vm3, %v1063_v41, %v1064_v38 }
 0x12f   : > { %872 = vrot.lane.b32.xlu1 %v867_v45, %s6175_s9  ;;  %563 = vrot.lane.b32.xlu0 %v558_v48, %s6175_s9  ;;  %v1066_v45 = vrot.slane %v1059_v40, 6 }
 0x131   : > { %v1067_v50 = vsel %vm475_vm3, %v1064_v38, %v1066_v45  ;;  %v1299_v45 = vstv %s3305_s16  ;;  %s4211_s16 = sld [smem:[#allocation3 + $0x1a]] }
 0x133   : > { %561 = vrot.lane.b32.xlu1 %v556_v53, %s6175_s9  ;;  %586 = vrot.lane.b32.xlu0 %v581_v54, %s6175_s9  ;;  %v1137_v53 = vmul.f32 %v1135_v46, %v3781_v29  ;;  %v1138_v54 = vmul.f32 %v1135_v46, %v3776_v27  ;;  %v1319_v46 = vstv %s3306_s23  ;;  %s4213_s23 = sld [smem:[#allocation3 + $0x29]] }
 0x137   : > { %588 = vrot.lane.b32.xlu1 %v583_v57, %s6175_s9  ;;  %707 = vrot.lane.b32.xlu0 %v702_v59, %s6175_s9  ;;  %v1156_v59 = vmul.f32 %v1155_v55, %v3770_v24  ;;  %v1320_v55 = vmul.f32 %v1319_v46, %v3788_v35 }
 0x139   : > { %v1326_v0 = vrot.slane %v1320_v55, 6 }
 0x13b   : > { %705 = vrot.lane.b32.xlu1 %v700_v63, %s6175_s9  ;;  %730 = vrot.lane.b32.xlu0 %v725_v1, %s6175_s9  ;;  %v1178_v63 = vmul.f32 %v1175_v56, %v3776_v27  ;;  %v1321_v56 = vmul.f32 %v1319_v46, %v3796_v39 }
 0x13f   : > { %732 = vrot.lane.b32.xlu1 %v727_v6, %s6175_s9  ;;  %851 = vrot.lane.b32.xlu0 %v846_v7, %s6175_s9  ;;  %v1183_v6 = vrot.slane %v1177_v62, 6  ;;  %v1185_v7 = vrot.slane %v1178_v63, 6  ;;  %v1302_v63 = vmul.f32 %v1299_v45, %v3793_v37 }
 0x141   : > { %v3900_v10 = vpop.permute.xlu0 %255  ;;  %v1186_v15 = vsel %vm475_vm3, %v1183_v6, %v1185_v7 }
 0x143   : > { %849 = vrot.lane.b32.xlu1 %v844_v11, %s6175_s9  ;;  %874 = vrot.lane.b32.xlu0 %v869_v14, %s6175_s9  ;;  %v1184_v14 = vsel %vm475_vm3, %v1182_v4, %v1183_v6 }
 0x145   : > { %v3909_v20 = vpop.permute.xlu1 %257  ;;  %v3911_v21 = vpop.permute.xlu0 %259 }
 0x147   : > { %876 = vrot.lane.b32.xlu1 %v871_v25, %s6175_s9  ;;  %1043 = vrot.lane.b32.xlu0 %v1038_v22, %s6175_s9  ;;  %v1209_v25 = vsel %vm475_vm3, %v1207_v13, %v1208_v18 }
 0x149   : > { %v3918_v32 = vpop.permute.xlu1 %275  ;;  %v3920_v33 = vpop.permute.xlu0 %277 }
 0x14b   : > { %1045 = vrot.lane.b32.xlu1 %v1040_v34, %s6175_s9  ;;  %1047 = vrot.lane.b32.xlu0 %v1042_v36, %s6175_s9  ;;  %v1280_v34 = vmul.f32 %v1279_v28, %v3788_v35  ;;  %v1211_v36 = vsel %vm475_vm3, %v1208_v18, %v1210_v26 }
 0x14d   : > { %v3927_v42 = vpop.permute.xlu1 %279  ;;  %v3929_v43 = vpop.permute.xlu0 %311 }
 0x14f   : > { %1068 = vrot.lane.b32.xlu1 %v1063_v41, %s6175_s9  ;;  %1070 = vrot.lane.b32.xlu0 %v1065_v44, %s6175_s9  ;;  %v1281_v41 = vmul.f32 %v1279_v28, %v3796_v39  ;;  %v1282_v44 = vmul.f32 %v1279_v28, %v3793_v37 }
 0x151   : > { %v3934_v47 = vpop.permute.xlu1 %313  ;;  %v3936_v48 = vpop.permute.xlu0 %315 }
 0x153   : > { %1072 = vrot.lane.b32.xlu1 %v1067_v50, %s6175_s9  ;;  %1142 = vrot.lane.b32.xlu0 %v1136_v49, %s6175_s9 }
 0x155   : > { %v3942_v51 = vpop.permute.xlu1 %331  ;;  %v3944_v52 = vpop.permute.xlu0 %333 }
 0x157   : > { %1144 = vrot.lane.b32.xlu1 %v1137_v53, %s6175_s9  ;;  %1146 = vrot.lane.b32.xlu0 %v1138_v54, %s6175_s9  ;;  %v1300_v53 = vmul.f32 %v1299_v45, %v3788_v35  ;;  %v1301_v54 = vmul.f32 %v1299_v45, %v3796_v39 }
 0x159   : > { %v3950_v57 = vpop.permute.xlu1 %335  ;;  %v3952_v58 = vpop.permute.xlu0 %367 }
 0x15b   : > { %1162 = vrot.lane.b32.xlu1 %v1156_v59, %s6175_s9  ;;  %1164 = vrot.lane.b32.xlu0 %v1157_v60, %s6175_s9  ;;  %v1322_v59 = vmul.f32 %v1319_v46, %v3793_v37  ;;  %v1344_v60 = vstv %s3307_s24  ;;  %v4043_v46 = vld [vmem:[#allocation2 + $0x10] sm:$0x3f]  ;;  %s4215_s24 = sld [smem:[#allocation3 + $0xa]] }
 0x15c   : > { %v1345_v5 = vmul.f32 %v1344_v60, %v3788_v35  ;;  %v1346_v6 = vmul.f32 %v1344_v60, %v3796_v39  ;;  %6246 = vst [vmem:[#allocation18_spill] sm:$0xff] %v4043_v46 }
 0x15d   : > { %v3961_v1 = vpop.permute.xlu1 %369  ;;  %v3963_v2 = vpop.permute.xlu0 %371 }
 0x15e   : > { %v1351_v18 = vrot.slane %v1345_v5, 6  ;;  %v1352_v19 = vrot.slane %v1346_v6, 6 }
 0x15f   : > { %1166 = vrot.lane.b32.xlu1 %v1158_v3, %s6175_s9  ;;  %1187 = vrot.lane.b32.xlu0 %v1182_v4, %s6175_s9  ;;  %v1327_v3 = vrot.slane %v1321_v56, 6  ;;  %v1329_v4 = vrot.slane %v1322_v59, 6 }
 0x160   : > { %v1353_v28 = vsel %vm475_vm3, %v1351_v18, %v1352_v19 }
 0x161   : > { %v3970_v9 = vpop.permute.xlu1 %387  ;;  %v3972_v11 = vpop.permute.xlu0 %389 }
 0x163   : > { %1189 = vrot.lane.b32.xlu1 %v1184_v14, %s6175_s9  ;;  %1191 = vrot.lane.b32.xlu0 %v1186_v15, %s6175_s9  ;;  %v1328_v14 = vsel %vm475_vm3, %v1326_v0, %v1327_v3  ;;  %v1330_v15 = vsel %vm475_vm3, %v1327_v3, %v1329_v4  ;;  %v288_v3 = vstv %s3243_s20  ;;  %s4227_s20 = sld [smem:[#allocation3 + $0x60]] }
 0x165   : > { %v3979_v22 = vpop.permute.xlu1 %391  ;;  %v3981_v23 = vpop.permute.xlu0 %514 }
 0x167   : > { %1212 = vrot.lane.b32.xlu1 %v1207_v13, %s6175_s9  ;;  %1214 = vrot.lane.b32.xlu0 %v1209_v25, %s6175_s9  ;;  %v1347_v13 = vmul.f32 %v1344_v60, %v3793_v37 }
 0x169   : > { %v3986_v30 = vpop.permute.xlu1 %516  ;;  %v3988_v31 = vpop.permute.xlu0 %518 }
 0x16b   : > { %1216 = vrot.lane.b32.xlu1 %v1211_v36, %s6175_s9  ;;  %1286 = vrot.lane.b32.xlu0 %v1280_v34, %s6175_s9  ;;  %v1354_v34 = vrot.slane %v1347_v13, 6  ;;  %v1446_v36 = vstv %s3316_s25  ;;  %s4217_s25 = sld [smem:[#allocation3 + $0x38]] }
 0x16c   : > { %v1447_v45 = vmul.f32 %v1446_v36, %v3754_v12  ;;  %v1448_v59 = vmul.f32 %v1446_v36, %v3760_v16  ;;  %v1449_v60 = vmul.f32 %v1446_v36, %v4043_v46 }
 0x16d   : > { %v3994_v38 = vpop.permute.xlu1 %534  ;;  %v3996_v40 = vpop.permute.xlu0 %536 }
 0x16f   : > { %1288 = vrot.lane.b32.xlu1 %v1281_v41, %s6175_s9  ;;  %1290 = vrot.lane.b32.xlu0 %v1282_v44, %s6175_s9 }
 0x171   : > { %v4002_v49 = vpop.permute.xlu1 %538  ;;  %v4004_v50 = vpop.permute.xlu0 %658 }
 0x173   : > { %1306 = vrot.lane.b32.xlu1 %v1300_v53, %s6175_s9  ;;  %1308 = vrot.lane.b32.xlu0 %v1301_v54, %s6175_s9  ;;  %v1355_v53 = vsel %vm475_vm3, %v1352_v19, %v1354_v34  ;;  %v238_v54 = vstv %s3239_s26  ;;  %v1502_v19 = vstv %s3320_s22  ;;  %s4219_s26 = sld [smem:[#allocation3 + $0x51]]  ;;  %s4229_s22 = sld [smem:[#allocation3 + $0x33]] }
 0x174   : > { %v243_v34 = vstv %s3240_s28  ;;  %s4231_s28 = sld [smem:[#allocation3 + $0x4c]] }
 0x175   : > { %v4013_v61 = vpop.permute.xlu1 %660  ;;  %v4015_v62 = vpop.permute.xlu0 %662 }
 0x176   : > { %6239 = vst [vmem:[#allocation11_spill] sm:$0xff] %v4013_v61  ;;  %6240 = vst [vmem:[#allocation12_spill] sm:$0xff] %v4015_v62 }
 0x177   : > { %1310 = vrot.lane.b32.xlu1 %v1302_v63, %s6175_s9  ;;  %1331 = vrot.lane.b32.xlu0 %v1326_v0, %s6175_s9  ;;  %v239_v63 = vmul.f32 %v238_v54, %v3754_v12  ;;  %v1466_v0 = vstv %s3317_s27  ;;  %s4225_s27 = sld [smem:[#allocation3 + $0x47]] }
 0x178   : > { %v1467_v13 = vmul.f32 %v1466_v0, %v3754_v12 }
 0x179   : > { %v4022_v7 = vpop.permute.xlu1 %678  ;;  %v4024_v8 = vpop.permute.xlu0 %680  ;;  %v264_v4 = vadd.f32 %v3900_v10, %v239_v63  ;;  %v1503_v63 = vmul.f32 %v1502_v19, %v3770_v24 }
 0x17a   : > { %6241 = vst [vmem:[#allocation13_spill] sm:$0xff] %v4024_v8  ;;  %v4360_v8 = vstv %s4265_s11  ;;  %s5132_s11 = sld [smem:[#allocation3 + $0x2d]] }
 0x17b   : > { %1333 = vrot.lane.b32.xlu1 %v1328_v14, %s6175_s9  ;;  %1335 = vrot.lane.b32.xlu0 %v1330_v15, %s6175_s9  ;;  %v1468_v14 = vmul.f32 %v1466_v0, %v3760_v16  ;;  %v240_v15 = vmul.f32 %v238_v54, %v3760_v16  ;;  %6285 = vst [vmem:[#allocation57_spill] sm:$0xff] %v4360_v8 }
 0x17d   : > { %v4031_v25 = vpop.permute.xlu1 %682  ;;  %v4033_v26 = vpop.permute.xlu0 %802  ;;  %v265_v10 = vadd.f32 %v3909_v20, %v240_v15  ;;  %v244_v20 = vmul.f32 %v243_v34, %v3754_v12  ;;  %v296_v15 = vstv %s4055_s30  ;;  %s4235_s30 = sld [smem:[#allocation3 + $0x5b]] }
 0x17e   : > { %6242 = vst [vmem:[#allocation14_spill] sm:$0xff] %v4031_v25  ;;  %6243 = vst [vmem:[#allocation15_spill] sm:$0xff] %v4033_v26  ;;  %v4343_v25 = vstv %s4253_s0  ;;  %s3444_s0 = smul.u32 432, %s6574_s13 }
 0x17f   : > { %1356 = vrot.lane.b32.xlu1 %v1351_v18, %s6175_s9  ;;  %1358 = vrot.lane.b32.xlu0 %v1353_v28, %s6175_s9  ;;  %v289_v18 = vmul.f32 %v288_v3, %v3770_v24  ;;  %v241_v28 = vmul.f32 %v238_v54, %v3762_v17  ;;  %v1469_v54 = vmul.f32 %v1466_v0, %v4043_v46  ;;  %v4093_v0 = vld [vmem:[#allocation2 + $0x28] sm:$0x3f] }
 0x180   : > { %6253 = vst [vmem:[#allocation25_spill] sm:$0xff] %v4093_v0  ;;  %v284_v12 = vadd.f32 %v3918_v32, %v244_v20  ;;  %v298_v32 = vmul.f32 %v296_v15, %v3781_v29  ;;  %v352_v20 = vstv %s4071_s4  ;;  %s4239_s4 = sld [smem:[#allocation3 + $0x83]]  ;;  %s4891_s13 = scalar_lea.vmem %s6172_s2, %s3444_s0 }
 0x181   : > { %v4038_v41 = vpop.permute.xlu1 %804  ;;  %v4040_v44 = vpop.permute.xlu0 %806  ;;  %v292_v36 = vadd.f32 %v289_v18, %v264_v4  ;;  %v291_v4 = vmul.f32 %v288_v3, %v3776_v27  ;;  %s3334_s0 = sld [smem:[#allocation3 + $0x14]] }
 0x182   : > { %6244 = vst [vmem:[#allocation16_spill] sm:$0xff] %v4038_v41  ;;  %6245 = vst [vmem:[#allocation17_spill] sm:$0xff] %v4040_v44  ;;  %v297_v44 = vmul.f32 %v296_v15, %v3770_v24 }
 0x183   : > { %1360 = vrot.lane.b32.xlu1 %v1355_v53, %s6175_s9  ;;  %1453 = vrot.lane.b32.xlu0 %v1447_v45, %s6175_s9  ;;  %v266_v45 = vadd.f32 %v3911_v21, %v241_v28  ;;  %v344_v53 = vstv %s3247_s29  ;;  %v245_v21 = vmul.f32 %v243_v34, %v3760_v16  ;;  %v1504_v28 = vmul.f32 %v1502_v19, %v3781_v29  ;;  %s4233_s29 = sld [smem:[#allocation3 + $0x42]] }
 0x185   : > { %v4048_v55 = vpop.permute.xlu1 %822  ;;  %v4050_v56 = vpop.permute.xlu0 %824  ;;  %v285_v16 = vadd.f32 %v3920_v33, %v245_v21 }
 0x186   : > { %6247 = vst [vmem:[#allocation19_spill] sm:$0xff] %v4048_v55  ;;  %6248 = vst [vmem:[#allocation20_spill] sm:$0xff] %v4050_v56 }
 0x187   : > { %1455 = vrot.lane.b32.xlu1 %v1448_v59, %s6175_s9  ;;  %1457 = vrot.lane.b32.xlu0 %v1449_v60, %s6175_s9 }
 0x189   : > { %v4062_v5 = vpop.permute.xlu1 %826  ;;  %v4064_v6 = vpop.permute.xlu0 %998 }
 0x18a   : > { %6249 = vst [vmem:[#allocation21_spill] sm:$0xff] %v4062_v5  ;;  %6250 = vst [vmem:[#allocation22_spill] sm:$0xff] %v4064_v6  ;;  %v294_v5 = vadd.f32 %v291_v4, %v266_v45  ;;  %v299_v4 = vmul.f32 %v296_v15, %v3776_v27 }
 0x18b   : > { %1473 = vrot.lane.b32.xlu1 %v1467_v13, %s6175_s9  ;;  %1475 = vrot.lane.b32.xlu0 %v1468_v14, %s6175_s9  ;;  %v320_v13 = vadd.f32 %v3929_v43, %v292_v36  ;;  %v290_v14 = vmul.f32 %v288_v3, %v3781_v29  ;;  %v345_v43 = vmul.f32 %v344_v53, %v3788_v35  ;;  %v1522_v36 = vstv %s4060_s3  ;;  %s4237_s3 = sld [smem:[#allocation3 + $0x6a]] }
 0x18c   : > { %v322_v41 = vadd.f32 %v3936_v48, %v294_v5  ;;  %v1523_v48 = vmul.f32 %v1522_v36, %v3770_v24  ;;  %v1524_v21 = vmul.f32 %v1522_v36, %v3781_v29  ;;  %v354_v29 = vmul.f32 %v352_v20, %v3796_v39 }
 0x18d   : > { %v4077_v59 = vpop.permute.xlu1 %1000  ;;  %v4079_v60 = vpop.permute.xlu0 %1002  ;;  %v293_v18 = vadd.f32 %v290_v14, %v265_v10  ;;  %v348_v14 = vadd.f32 %v345_v43, %v320_v13 }
 0x18e   : > { %6251 = vst [vmem:[#allocation23_spill] sm:$0xff] %v4077_v59  ;;  %6252 = vst [vmem:[#allocation24_spill] sm:$0xff] %v4079_v60 }
 0x18f   : > { %1477 = vrot.lane.b32.xlu1 %v1469_v54, %s6175_s9  ;;  %1509 = vrot.lane.b32.xlu0 %v1503_v63, %s6175_s9  ;;  %v1505_v54 = vmul.f32 %v1502_v19, %v4093_v0  ;;  %v246_v63 = vmul.f32 %v243_v34, %v3762_v17  ;;  %v321_v10 = vadd.f32 %v3934_v47, %v293_v18 }
 0x190   : > { %v376_v33 = vadd.f32 %v3952_v58, %v348_v14  ;;  %v346_v17 = vmul.f32 %v344_v53, %v3796_v39  ;;  %v347_v47 = vmul.f32 %v344_v53, %v3793_v37  ;;  %v300_v19 = vadd.f32 %v297_v44, %v284_v12 }
 0x191   : > { %v4100_v3 = vpop.permute.xlu1 %1018  ;;  %v4102_v56 = vpop.permute.xlu0 %1020  ;;  %v286_v5 = vadd.f32 %v3927_v42, %v246_v63  ;;  %v301_v34 = vadd.f32 %v298_v32, %v285_v16  ;;  %v1558_v58 = vstv %s4085_s5  ;;  %v353_v44 = vmul.f32 %v352_v20, %v3788_v35  ;;  %v4141_v16 = vld [vmem:[#allocation2 + $0x40] sm:$0x3f]  ;;  %s4245_s5 = sld [smem:[#allocation3 + $0x79]] }
 0x192   : > { %6254 = vst [vmem:[#allocation26_spill] sm:$0xff] %v4100_v3  ;;  %6255 = vst [vmem:[#allocation27_spill] sm:$0xff] %v4102_v56  ;;  %v349_v18 = vadd.f32 %v346_v17, %v321_v10  ;;  %v340_v43 = vadd.f32 %v3942_v51, %v300_v19  ;;  %v399_v24 = vadd.f32 3.0, %v376_v33  ;;  %v1578_v10 = vstv %s4113_s6  ;;  %s4247_s6 = sld [smem:[#allocation3 + $0x92]] }
 0x193   : > { %1511 = vrot.lane.b32.xlu1 %v1504_v28, %s6175_s9  ;;  %1513 = vrot.lane.b32.xlu0 %v1505_v54, %s6175_s9  ;;  %v341_v53 = vadd.f32 %v3944_v52, %v301_v34  ;;  %v350_v28 = vadd.f32 %v347_v47, %v322_v41  ;;  %v302_v27 = vadd.f32 %v299_v4, %v286_v5  ;;  %v4326_v56 = vstv %s4237_s3  ;;  %s3373_s3 = sld [smem:[#allocation3 + $0x35]] }
 0x194   : > { %v377_v42 = vadd.f32 %v3961_v1, %v349_v18  ;;  %v1525_v52 = vmul.f32 %v1522_v36, %v4093_v0  ;;  %v1559_v41 = vmul.f32 %v1558_v58, %v3788_v35  ;;  %6257 = vst [vmem:[#allocation29_spill] sm:$0xff] %v4141_v16  ;;  %v356_v1 = vadd.f32 %v353_v44, %v340_v43 }
 0x195   : > { %v4120_v45 = vpop.permute.xlu1 %1022  ;;  %v4122_v13 = vpop.permute.xlu0 %559  ;;  %v378_v15 = vadd.f32 %v3963_v2, %v350_v28  ;;  %v342_v54 = vadd.f32 %v3950_v57, %v302_v27  ;;  %v357_v63 = vadd.f32 %v354_v29, %v341_v53  ;;  %v402_v2 = vmax.f32 %v399_v24, 0.0 }
 0x196   : > { %6256 = vst [vmem:[#allocation28_spill] sm:$0xff] %v4120_v45  ;;  %v400_v14 = vadd.f32 3.0, %v377_v42  ;;  %v355_v32 = vmul.f32 %v352_v20, %v3793_v37  ;;  %v1560_v33 = vmul.f32 %v1558_v58, %v3796_v39  ;;  %v396_v17 = vadd.f32 %v3970_v9, %v356_v1  ;;  %v4319_v45 = vld [vmem:[#allocation2] sm:$0xff] }
 0x197   : > { %1529 = vrot.lane.b32.xlu1 %v1523_v48, %s6175_s9  ;;  %1531 = vrot.lane.b32.xlu0 %v1524_v21, %s6175_s9  ;;  %v401_v36 = vadd.f32 3.0, %v378_v15  ;;  %v397_v47 = vadd.f32 %v3972_v11, %v357_v63  ;;  %v1561_v5 = vmul.f32 %v1558_v58, %v4141_v16  ;;  %v405_v34 = vmin.f32 %v402_v2, 6.0  ;;  %6280 = vst [vmem:[#allocation52_spill] sm:$0xff] %v4319_v45 }
 0x198   : > { %v358_v19 = vadd.f32 %v355_v32, %v342_v54  ;;  %v403_v37 = vmax.f32 %v400_v14, 0.0  ;;  %v1579_v20 = vmul.f32 %v1578_v10, %v3788_v35  ;;  %v1580_v21 = vmul.f32 %v1578_v10, %v3796_v39 }
 0x199   : > { %v4135_v12 = vpop.permute.xlu1 %584  ;;  %v4137_v51 = vpop.permute.xlu0 %703  ;;  %v404_v9 = vmax.f32 %v401_v36, 0.0  ;;  %v429_v4 = vadd.f32 3.0, %v396_v17  ;;  %v430_v11 = vadd.f32 3.0, %v397_v47  ;;  %v408_v58 = vmul.f32 0.16666667, %v405_v34 }
 0x19a   : > { %v398_v18 = vadd.f32 %v3979_v22, %v358_v19  ;;  %v406_v28 = vmin.f32 %v403_v37, 6.0  ;;  %v1581_v24 = vmul.f32 %v1578_v10, %v4141_v16  ;;  %v4337_v59 = vstv %s4247_s6  ;;  %s3376_s6 = sld [smem:[#allocation3 + $0x5d]] }
 0x19b   : > { %1533 = vrot.lane.b32.xlu1 %v1525_v52, %s6175_s9  ;;  %1565 = vrot.lane.b32.xlu0 %v1559_v41, %s6175_s9  ;;  %v407_v35 = vmin.f32 %v404_v9, 6.0  ;;  %v432_v42 = vmax.f32 %v429_v4, 0.0  ;;  %v433_v39 = vmax.f32 %v430_v11, 0.0  ;;  %v458_v11 = vstv %s4195_s19  ;;  %s4275_s19 = sld [smem:[#allocation3 + $0x55]] }
 0x19c   : > { %v431_v44 = vadd.f32 3.0, %v398_v18  ;;  %v409_v22 = vmul.f32 0.16666667, %v406_v28  ;;  %v468_v18 = vstv %s4197_s18  ;;  %s4277_s18 = sld [smem:[#allocation3 + $0x6e]] }
 0x19d   : > { %v4151_v48 = vpop.permute.xlu1 %728  ;;  %v4153_v57 = vpop.permute.xlu0 %847  ;;  %v410_v15 = vmul.f32 0.16666667, %v407_v35  ;;  %v435_v52 = vmin.f32 %v432_v42, 6.0  ;;  %v436_v41 = vmin.f32 %v433_v39, 6.0  ;;  %v488_v35 = vstv %s4205_s8  ;;  %s3337_s8 = sld [smem:[#allocation3 + $0x21]] }
 0x19e   : > { %6258 = vst [vmem:[#allocation30_spill] sm:$0xff] %v4153_v57  ;;  %v434_v54 = vmax.f32 %v431_v44, 0.0  ;;  %v4272_v42 = vstv %s4207_s12  ;;  %v953_v39 = vstv %s4209_s15  ;;  %v4280_v44 = vstv %s4211_s16  ;;  %s3338_s12 = sld [smem:[#allocation3 + $0x17]]  ;;  %s6428_s15 = smov 2  }
 0x19f   : > { %1567 = vrot.lane.b32.xlu1 %v1560_v33, %s6175_s9  ;;  %1569 = vrot.lane.b32.xlu0 %v1561_v5, %s6175_s9  ;;  %v438_v10 = vmul.f32 0.16666667, %v435_v52  ;;  %v439_v2 = vmul.f32 0.16666667, %v436_v41  ;;  %v4287_v52 = vstv %s4215_s24  ;;  %v4292_v41 = vstv %s4219_s26  ;;  %s3339_s16 = sld [smem:[#allocation3 + $0x30]]  ;;  %s3345_s24 = sld [smem:[#allocation3 + $0x53]] }
 0x1a0   : > { %v437_v14 = vmin.f32 %v434_v54, 6.0  ;;  %6276 = vst [vmem:[#allocation48_spill] sm:$0xff] %v4287_v52  ;;  %v4295_v54 = vstv %s4225_s27  ;;  %v489_v60 = vmul.f32 %v4319_v45, %v488_v35  ;;  %s3347_s26 = sld [smem:[#allocation3 + $0x62]]  ;;  %s3352_s27 = sld [smem:[#allocation3 + $0x6c]] }
 0x1a1   : > { %v4161_v43 = vpop.permute.xlu1 %872  ;;  %v4163_v53 = vpop.permute.xlu0 %563  ;;  %v4363_v61 = vstv %s4275_s19  ;;  %s3381_s19 = sld [smem:[#allocation3 + $0x67]] }
 0x1a2   : > { %6259 = vst [vmem:[#allocation31_spill] sm:$0xff] %v4161_v43  ;;  %v440_v36 = vmul.f32 0.16666667, %v437_v14  ;;  %v4303_v14 = vld [vmem:[#allocation2 + $0x8] sm:$0xff]  ;;  %6286 = vst [vmem:[#allocation58_spill] sm:$0xff] %v4363_v61  ;;  %v4366_v46 = vstv %s4277_s18  ;;  %v954_v61 = vmul.f32 %v4319_v45, %v953_v39  ;;  %s3382_s18 = sld [smem:[#allocation3 + $0x80]] }
 0x1a3   : > { %1585 = vrot.lane.b32.xlu1 %v1579_v20, %s6175_s9  ;;  %1587 = vrot.lane.b32.xlu0 %v1580_v21, %s6175_s9  ;;  %6277 = vst [vmem:[#allocation49_spill] sm:$0xff] %v4303_v14  ;;  %6287 = vst [vmem:[#allocation59_spill] sm:$0xff] %v4366_v46 }
 0x1a5   : > { %v4168_v29 = vpop.permute.xlu1 %561  ;;  %v4170_v27 = vpop.permute.xlu0 %586 }
 0x1a7   : > { %1589 = vrot.lane.b32.xlu1 %v1581_v24, %s6175_s9  ;;  %414 = vrot.lane.b32.xlu0 %v408_v58, %s6177_s7  ;;  %s4249_s9 = sld [smem:[#allocation3 + $0x65]]  ;;  %v4268_v24 = vstv %s4199_s21  ;;  %s4289_s21 = sld [smem:[#allocation3 + $0x87]] }
 0x1a8   : > { %v464_v6 = vmul.f32 %v4319_v45, %v4268_v24 }
 0x1a9   : > { %v4174_v1 = vpop.permute.xlu1 %588  ;;  %v4176_v63 = vpop.permute.xlu0 %707 }
 0x1aa   : > { %6260 = vst [vmem:[#allocation32_spill] sm:$0xff] %v4174_v1  ;;  %6261 = vst [vmem:[#allocation33_spill] sm:$0xff] %v4176_v63 }
 0x1ab   : > { %416 = vrot.lane.b32.xlu1 %v409_v22, %s6177_s7  ;;  %418 = vrot.lane.b32.xlu0 %v410_v15, %s6177_s7  ;;  %v972_v22 = vstv %s4213_s23  ;;  %v4284_v15 = vstv %s4217_s25  ;;  %s3344_s23 = sld [smem:[#allocation3 + $0x3a]]  ;;  %s3346_s25 = sld [smem:[#allocation3 + $0x49]] }
 0x1ad   : > { %v4180_v32 = vpop.permute.xlu1 %705  ;;  %v4182_v33 = vpop.permute.xlu0 %730  ;;  %v4340_v16 = vstv %s4249_s9  ;;  %s6420_s9 = smov 125  }
 0x1ae   : > { %6262 = vst [vmem:[#allocation34_spill] sm:$0xff] %v4180_v32  ;;  %6263 = vst [vmem:[#allocation35_spill] sm:$0xff] %v4182_v33 }
 0x1af   : > { %444 = vrot.lane.b32.xlu1 %v438_v10, %s6177_s7  ;;  %446 = vrot.lane.b32.xlu0 %v439_v2, %s6177_s7  ;;  %v4298_v10 = vstv %s4227_s20  ;;  %v4301_v2 = vstv %s4229_s22  ;;  %s3353_s20 = sld [smem:[#allocation3 + $0x85]]  ;;  %s3365_s22 = sld [smem:[#allocation3 + $0x3]] }
 0x1b1   : > { %v4186_v17 = vpop.permute.xlu1 %732  ;;  %v4188_v47 = vpop.permute.xlu0 %851 }
 0x1b2   : > { %6264 = vst [vmem:[#allocation36_spill] sm:$0xff] %v4186_v17  ;;  %6265 = vst [vmem:[#allocation37_spill] sm:$0xff] %v4188_v47  ;;  %v4317_v47 = vstv %s4235_s30  ;;  %s3368_s30 = sld [smem:[#allocation3 + $0x2b]] }
 0x1b3   : > { %448 = vrot.lane.b32.xlu1 %v440_v36, %s6177_s7  ;;  %s4251_s7 = sld [smem:[#allocation3 + $0x23]]  ;;  %v470_v36 = vmul.f32 %v4303_v14, %v468_v18 }
 0x1b5   : > { %v4191_v5 = vpop.permute.xlu1 %849  ;;  %v4193_v19 = vpop.permute.xlu0 %874  ;;  %v477_v43 = vrot.slane %v470_v36, 6  ;;  %v955_v36 = vmul.f32 %v4303_v14, %v953_v39 }
 0x1b6   : > { %6266 = vst [vmem:[#allocation38_spill] sm:$0xff] %v4191_v5  ;;  %6267 = vst [vmem:[#allocation39_spill] sm:$0xff] %v4193_v19  ;;  %v4310_v19 = vstv %s4233_s29  ;;  %s3367_s29 = sld [smem:[#allocation3 + $0x12]] }
 0x1b7   : > { %v961_v1 = vrot.slane %v955_v36, 6 }
 0x1b9   : > { %v4201_v34 = vpop.permute.xlu1 %876  ;;  %v4203_v37 = vpop.permute.xlu0 %1043  ;;  %v4349_v33 = vstv %s4251_s7  ;;  %s3336_s7 = sld [smem:[#allocation3 + $0x8]] }
 0x1ba   : > { %6268 = vst [vmem:[#allocation40_spill] sm:$0xff] %v4201_v34  ;;  %6269 = vst [vmem:[#allocation41_spill] sm:$0xff] %v4203_v37  ;;  %v4307_v34 = vstv %s4231_s28  ;;  %s3366_s28 = sld [smem:[#allocation3 + $0x1c]] }
 0x1bb   : > { %6281 = vst [vmem:[#allocation53_spill] sm:$0xff] %v4349_v33  ;;  %v4370_v33 = vstv %s4289_s21  ;;  %s3354_s21 = sld [smem:[#allocation3 + $0x7b]] }
 0x1bc   : > { %6288 = vst [vmem:[#allocation60_spill] sm:$0xff] %v4370_v33 }
 0x1bd   : > { %v4221_v20 = vpop.permute.xlu1 %1045  ;;  %v4223_v21 = vpop.permute.xlu0 %1047 }
 0x1be   : > { %6270 = vst [vmem:[#allocation42_spill] sm:$0xff] %v4221_v20  ;;  %6271 = vst [vmem:[#allocation43_spill] sm:$0xff] %v4223_v21  ;;  %v4322_v20 = vld [vmem:[#allocation2 + $0x10] sm:$0x3f]  ;;  %v4334_v21 = vstv %s4245_s5  ;;  %s3375_s5 = sld [smem:[#allocation3 + $0x44]] }
 0x1bf   : > { %v471_v17 = vmul.f32 %v4322_v20, %v468_v18  ;;  %v956_v8 = vmul.f32 %v4322_v20, %v953_v39  ;;  %v973_v39 = vmul.f32 %v4319_v45, %v972_v22 }
 0x1c1   : > { %v4241_v9 = vpop.permute.xlu1 %1068  ;;  %v4243_v4 = vpop.permute.xlu0 %1070  ;;  %v479_v3 = vrot.slane %v471_v17, 6 }
 0x1c2   : > { %6272 = vst [vmem:[#allocation44_spill] sm:$0xff] %v4241_v9  ;;  %6273 = vst [vmem:[#allocation45_spill] sm:$0xff] %v4243_v4  ;;  %v469_v4 = vmul.f32 %v4319_v45, %v468_v18  ;;  %v4346_v18 = vstv %s4255_s1  ;;  %v4357_v9 = vstv %s4263_s17  ;;  %s3618_s17 = smov 124   ;;  %s5130_s1 = sld [smem:[#allocation3 + $0x5]] }
 0x1c3   : > { %6284 = vst [vmem:[#allocation56_spill] sm:$0xff] %v4357_v9  ;;  %v480_v57 = vsel %vm475_vm3, %v477_v43, %v479_v3  ;;  %v963_v3 = vrot.slane %v956_v8, 6  ;;  %v945_v8 = vmul.f32 %v4303_v14, %v4272_v42 }
 0x1c4   : > { %v476_v55 = vrot.slane %v469_v4, 6  ;;  %v495_v4 = vrot.slane %v489_v60, 6 }
 0x1c5   : > { %v4259_v58 = vpop.permute.xlu1 %1072  ;;  %v4261_v28 = vpop.permute.xlu0 %1142 }
 0x1c6   : > { %6274 = vst [vmem:[#allocation46_spill] sm:$0xff] %v4259_v58  ;;  %6275 = vst [vmem:[#allocation47_spill] sm:$0xff] %v4261_v28  ;;  %v4329_v28 = vstv %s4239_s4  ;;  %v478_v17 = vsel %vm475_vm3, %v476_v55, %v477_v43  ;;  %s3374_s4 = sld [smem:[#allocation3 + $0x4e]] }
 0x1c9   : > { %v4312_v5 = vpop.permute.xlu1 %1144  ;;  %v4314_v58 = vpop.permute.xlu0 %1146 }
 0x1ca   : > { %6278 = vst [vmem:[#allocation50_spill] sm:$0xff] %v4312_v5  ;;  %6279 = vst [vmem:[#allocation51_spill] sm:$0xff] %v4314_v58  ;;  %v490_v5 = vmul.f32 %v4303_v14, %v488_v35  ;;  %v491_v58 = vmul.f32 %v4322_v20, %v488_v35  ;;  %v459_v35 = vmul.f32 %v4319_v45, %v458_v11 }
 0x1cc   : > { %v496_v37 = vrot.slane %v490_v5, 6  ;;  %v498_v63 = vrot.slane %v491_v58, 6  ;;  %v974_v5 = vmul.f32 %v4303_v14, %v972_v22  ;;  %v484_v33 = vadd.f32 %v476_v55, %v459_v35 }
 0x1cd   : > { %v4352_v0 = vpop.permute.xlu1 %1162  ;;  %v4354_v32 = vpop.permute.xlu0 %1164  ;;  %v466_v55 = vmul.f32 %v4322_v20, %v4268_v24  ;;  %v503_v35 = vadd.f32 %v495_v4, %v464_v6  ;;  %v979_v6 = vrot.slane %v973_v39, 6 }
 0x1ce   : > { %6282 = vst [vmem:[#allocation54_spill] sm:$0xff] %v4352_v0  ;;  %6283 = vst [vmem:[#allocation55_spill] sm:$0xff] %v4354_v32  ;;  %v460_v32 = vmul.f32 %v4303_v14, %v458_v11  ;;  %v461_v0 = vmul.f32 %v4322_v20, %v458_v11  ;;  %v975_v11 = vmul.f32 %v4322_v20, %v972_v22  ;;  %v980_v26 = vrot.slane %v974_v5, 6  ;;  %v4423_v5 = vld [vmem:[#allocation2 + $0x18] sm:$0xff] }
 0x1cf   : > { %v497_v52 = vsel %vm475_vm3, %v495_v4, %v496_v37  ;;  %v499_v60 = vsel %vm475_vm3, %v496_v37, %v498_v63  ;;  %v523_v37 = vadd.f32 %v3981_v23, %v484_v33  ;;  %v949_v23 = vmul.f32 %v4319_v45, %v4280_v44  ;;  %6293 = vst [vmem:[#allocation65_spill] sm:$0xff] %v4423_v5 }
 0x1d0   : > { %v4390_v62 = vadd.f32 %v478_v17, %v460_v32  ;;  %v4396_v43 = vadd.f32 %v480_v57, %v461_v0  ;;  %v4405_v22 = vadd.f32 %v499_v60, %v466_v55  ;;  %v982_v36 = vrot.slane %v975_v11, 6 }
 0x1d1   : > { %v4379_v58 = vpop.permute.xlu1 %1166  ;;  %v4381_v46 = vpop.permute.xlu0 %1187  ;;  %v946_v0 = vmul.f32 %v4322_v20, %v4272_v42  ;;  %v964_v57 = vsel %vm475_vm3, %v961_v1, %v963_v3  ;;  %v568_v33 = vadd.f32 %v4122_v13, %v523_v37  ;;  %v950_v17 = vmul.f32 %v4303_v14, %v4280_v44  ;;  %v4446_v37 = vld [vmem:[#allocation2 + $0x30] sm:$0xff] }
 0x1d2   : > { %6289 = vst [vmem:[#allocation61_spill] sm:$0xff] %v4379_v58  ;;  %6290 = vst [vmem:[#allocation62_spill] sm:$0xff] %v4381_v46  ;;  %v465_v58 = vmul.f32 %v4303_v14, %v4268_v24  ;;  %v960_v46 = vrot.slane %v954_v61, 6  ;;  %v944_v24 = vmul.f32 %v4319_v45, %v4272_v42  ;;  %v981_v4 = vsel %vm475_vm3, %v979_v6, %v980_v26 }
 0x1d3   : > { %v983_v13 = vsel %vm475_vm3, %v980_v26, %v982_v36  ;;  %v598_v60 = vmul.f32 %v4423_v5, %v4284_v15  ;;  %v4438_v39 = vadd.f32 %v964_v57, %v946_v0  ;;  %v4440_v55 = vadd.f32 %v979_v6, %v949_v23  ;;  %6298 = vst [vmem:[#allocation70_spill] sm:$0xff] %v4446_v37  ;;  %v4462_v6 = vld [vmem:[#allocation2 + $0x20] sm:$0xff]  ;;  %v4466_v57 = vld [vmem:[#allocation2 + $0x28] sm:$0x3f] }
 0x1d4   : > { %v4403_v32 = vadd.f32 %v497_v52, %v465_v58  ;;  %v962_v61 = vsel %vm475_vm3, %v960_v46, %v961_v1  ;;  %v4418_v52 = vadd.f32 %v960_v46, %v944_v24  ;;  %v614_v58 = vmul.f32 %v4423_v5, %v4295_v54  ;;  %6301 = vst [vmem:[#allocation73_spill] sm:$0xff] %v4462_v6 }
 0x1d5   : > { %v4398_v9 = vpop.permute.xlu1 %1189  ;;  %v4400_v63 = vpop.permute.xlu0 %1191  ;;  %v4431_v11 = vadd.f32 %v962_v61, %v945_v8  ;;  %v951_v46 = vmul.f32 %v4322_v20, %v4280_v44  ;;  %6297 = vst [vmem:[#allocation69_spill] sm:$0xff] %v4438_v39  ;;  %v4444_v3 = vmul.f32 %v4423_v5, %v4298_v10  ;;  %v4450_v24 = vmul.f32 %v4446_v37, %v4334_v21 }
 0x1d6   : > { %6291 = vst [vmem:[#allocation63_spill] sm:$0xff] %v4398_v9  ;;  %6292 = vst [vmem:[#allocation64_spill] sm:$0xff] %v4400_v63  ;;  %v4452_v20 = vadd.f32 %v981_v4, %v950_v17  ;;  %v601_v26 = vadd.f32 %v598_v60, %v568_v33  ;;  %v606_v44 = vmul.f32 %v4423_v5, %v4292_v41  ;;  %v620_v61 = vrot.slane %v614_v58, 6  ;;  %v4500_v63 = vld [vmem:[#allocation2 + $0x38] sm:$0xff] }
 0x1d7   : > { %6296 = vst [vmem:[#allocation68_spill] sm:$0xff] %v4431_v11  ;;  %v4458_v36 = vmul.f32 %v4446_v37, %v4326_v56  ;;  %v4460_v8 = vadd.f32 %v983_v13, %v951_v46  ;;  %v615_v0 = vmul.f32 %v4462_v6, %v4295_v54  ;;  %v616_v23 = vmul.f32 %v4466_v57, %v4295_v54 }
 0x1d8   : > { %6299 = vst [vmem:[#allocation71_spill] sm:$0xff] %v4452_v20  ;;  %v543_v4 = vadd.f32 %v3994_v38, %v503_v35  ;;  %v4477_v46 = vmul.f32 %v4446_v37, %v4337_v59  ;;  %v634_v58 = vmul.f32 %v4462_v6, %v4298_v10  ;;  %v635_v13 = vmul.f32 %v4466_v57, %v4298_v10 }
 0x1d9   : > { %v4427_v42 = vpop.permute.xlu1 %1212  ;;  %v4429_v1 = vpop.permute.xlu0 %1214  ;;  %6300 = vst [vmem:[#allocation72_spill] sm:$0xff] %v4460_v8  ;;  %v639_v60 = vrot.slane %v4444_v3, 6  ;;  %v4486_v54 = vmul.f32 %v4446_v37, %v4329_v28  ;;  %v600_v38 = vmul.f32 %v4466_v57, %v4284_v15  ;;  %v4494_v9 = vmul.f32 %v4462_v6, %v4284_v15  ;;  %6304 = vst [vmem:[#allocation76_spill] sm:$0xff] %v4500_v63 }
 0x1da   : > { %6294 = vst [vmem:[#allocation66_spill] sm:$0xff] %v4427_v42  ;;  %6295 = vst [vmem:[#allocation67_spill] sm:$0xff] %v4429_v1  ;;  %v593_v35 = vadd.f32 %v4135_v12, %v543_v4  ;;  %v628_v1 = vadd.f32 %v620_v61, %v601_v26  ;;  %v4498_v10 = vmul.f32 %v4462_v6, %v4292_v41  ;;  %v621_v3 = vrot.slane %v615_v0, 6  ;;  %v4504_v42 = vld [vmem:[#allocation2 + $0x40] sm:$0x3f] }
 0x1db   : > { %v760_v12 = vmul.f32 %v4504_v42, %v4334_v21  ;;  %v640_v8 = vrot.slane %v634_v58, 6  ;;  %v642_v20 = vrot.slane %v635_v13, 6  ;;  %v778_v0 = vmul.f32 %v4500_v63, %v4337_v59 }
 0x1dc   : > { %v4521_v11 = vmul.f32 %v4504_v42, %v4326_v56  ;;  %v779_v4 = vmul.f32 %v4504_v42, %v4337_v59  ;;  %v609_v58 = vadd.f32 %v606_v44, %v593_v35  ;;  %v667_v13 = vadd.f32 %v4004_v50, %v628_v1 }
 0x1dd   : > { %v4470_v33 = vpop.permute.xlu1 %1216  ;;  %v4472_v17 = vpop.permute.xlu0 %1286  ;;  %v4540_v39 = vsel %vm475_vm3, %v620_v61, %v621_v3  ;;  %v525_v50 = vadd.f32 %v3988_v31, %v4396_v43  ;;  %v4549_v1 = vsel %vm475_vm3, %v639_v60, %v640_v8  ;;  %v784_v44 = vrot.slane %v778_v0, 6 }
 0x1de   : > { %6302 = vst [vmem:[#allocation74_spill] sm:$0xff] %v4470_v33  ;;  %6303 = vst [vmem:[#allocation75_spill] sm:$0xff] %v4472_v17  ;;  %v623_v17 = vrot.slane %v616_v23, 6  ;;  %v759_v33 = vmul.f32 %v4500_v63, %v4334_v21  ;;  %v4517_v23 = vmul.f32 %v4466_v57, %v4292_v41  ;;  %v4525_v21 = vmul.f32 %v4500_v63, %v4326_v56 }
 0x1df   : > { %6307 = vst [vmem:[#allocation79_spill] sm:$0xff] %v4521_v11  ;;  %v4536_v41 = vmul.f32 %v4504_v42, %v4329_v28  ;;  %v4556_v61 = vmul.f32 %v4423_v5, %v4310_v19  ;;  %v1100_v35 = vmul.f32 %v4466_v57, %v4310_v19  ;;  %v712_v31 = vadd.f32 %v4137_v51, %v667_v13 }
 0x1e0   : > { %6308 = vst [vmem:[#allocation80_spill] sm:$0xff] %v4525_v21  ;;  %v765_v56 = vrot.slane %v759_v33, 6  ;;  %v767_v21 = vrot.slane %v760_v12, 6  ;;  %v1099_v33 = vmul.f32 %v4462_v6, %v4310_v19  ;;  %v647_v43 = vadd.f32 %v639_v60, %v609_v58 }
 0x1e1   : > { %v4508_v26 = vpop.permute.xlu1 %1288  ;;  %v4510_v15 = vpop.permute.xlu0 %1290  ;;  %v4573_v12 = vmul.f32 %v4423_v5, %v4317_v47  ;;  %v1119_v51 = vmul.f32 %v4466_v57, %v4317_v47  ;;  %v6313_v60 = vrot.slane %v4450_v24, 6  ;;  %v4595_v13 = vmul.f32 %v4462_v6, %v4301_v2 }
 0x1e2   : > { %6305 = vst [vmem:[#allocation77_spill] sm:$0xff] %v4508_v26  ;;  %6306 = vst [vmem:[#allocation78_spill] sm:$0xff] %v4510_v15  ;;  %v4532_v26 = vmul.f32 %v4500_v63, %v4329_v28  ;;  %v624_v15 = vsel %vm475_vm3, %v621_v3, %v623_v17  ;;  %v4552_v28 = vsel %vm475_vm3, %v640_v8, %v642_v20  ;;  %v786_v17 = vrot.slane %v779_v4, 6 }
 0x1e3   : > { %v570_v3 = vadd.f32 %v4163_v53, %v525_v50  ;;  %v4566_v20 = vmul.f32 %v4423_v5, %v4301_v2  ;;  %v4569_v8 = vsel %vm475_vm3, %v765_v56, %v767_v21  ;;  %v1118_v4 = vmul.f32 %v4462_v6, %v4317_v47  ;;  %6315 = vst [vmem:[#allocation85_spill] sm:$0xff] %v4595_v13 }
 0x1e4   : > { %v4586_v0 = vsel %vm475_vm3, %v6313_v60, %v765_v56  ;;  %v6314_v21 = vrot.slane %v4477_v46, 6  ;;  %v4599_v47 = vmul.f32 %v4466_v57, %v4301_v2  ;;  %v4602_v50 = vsel %vm475_vm3, %v784_v44, %v786_v17 }
 0x1e5   : > { %v4542_v11 = vpop.permute.xlu1 %1306  ;;  %v4544_v59 = vpop.permute.xlu0 %1308  ;;  %6316 = vst [vmem:[#allocation86_spill] sm:$0xff] %v4602_v50  ;;  %v1105_v56 = vrot.slane %v1099_v33, 6  ;;  %v1107_v60 = vrot.slane %v1100_v35, 6  ;;  %v4611_v13 = vmul.f32 %v4423_v5, %v4307_v34  ;;  %v6192_v2 = vrot.slane %v4573_v12, 6 }
 0x1e6   : > { %6309 = vst [vmem:[#allocation81_spill] sm:$0xff] %v4542_v11  ;;  %6310 = vst [vmem:[#allocation82_spill] sm:$0xff] %v4544_v59  ;;  %v4591_v58 = vsel %vm475_vm3, %v6314_v21, %v784_v44  ;;  %v524_v59 = vadd.f32 %v3986_v30, %v4390_v62  ;;  %v745_v21 = vadd.f32 %v4458_v36, %v712_v31  ;;  %v1124_v44 = vrot.slane %v1118_v4, 6 }
 0x1e7   : > { %v687_v11 = vadd.f32 %v4022_v7, %v647_v43  ;;  %v1126_v17 = vrot.slane %v1119_v51, 6  ;;  %v4621_v30 = vmul.f32 %v4462_v6, %v4307_v34  ;;  %v4625_v62 = vmul.f32 %v4466_v57, %v4307_v34 }
 0x1e8   : > { %v569_v35 = vadd.f32 %v4168_v29, %v524_v59  ;;  %v4629_v7 = vmul.f32 %v4446_v37, %v4340_v16  ;;  %v544_v36 = vadd.f32 %v3996_v40, %v4403_v32  ;;  %v4639_v29 = vsel %vm475_vm3, %v1105_v56, %v1107_v60 }
 0x1e9   : > { %v4579_v19 = vpop.permute.xlu1 %1310  ;;  %v4581_v53 = vpop.permute.xlu0 %1331  ;;  %v4643_v59 = vmul.f32 %v4500_v63, %v4340_v16  ;;  %v737_v34 = vadd.f32 %v4151_v48, %v687_v11  ;;  %v6319_v57 = vrot.slane %v4450_v24, 6  ;;  %v4650_v40 = vmul.f32 %v4504_v42, %v4340_v16 }
 0x1ea   : > { %6311 = vst [vmem:[#allocation83_spill] sm:$0xff] %v4579_v19  ;;  %6312 = vst [vmem:[#allocation84_spill] sm:$0xff] %v4581_v53  ;;  %v6193_v19 = vrot.slane %v4556_v61, 6  ;;  %v603_v53 = vadd.f32 %v600_v38, %v570_v3  ;;  %v594_v32 = vadd.f32 %v4170_v27, %v544_v36  ;;  %v4656_v3 = vsel %vm475_vm3, %v6192_v2, %v1124_v44  ;;  %v6323_v36 = vld [vmem:[#allocation12_spill] sm:$0xff] }
 0x1eb   : > { %v772_v31 = vadd.f32 %v6319_v57, %v745_v21  ;;  %v4659_v4 = vsel %vm475_vm3, %v1124_v44, %v1126_v17  ;;  %v4663_v48 = vmul.f32 %v4446_v37, %v4343_v25  ;;  %v602_v16 = vadd.f32 %v4494_v9, %v569_v35  ;;  %v6322_v17 = vld [vmem:[#allocation15_spill] sm:$0xff] }
 0x1ec   : > { %v4636_v38 = vsel %vm475_vm3, %v6193_v19, %v1105_v56  ;;  %v630_v43 = vadd.f32 %v624_v15, %v603_v53  ;;  %v4672_v27 = vmul.f32 %v4446_v37, %v4346_v18  ;;  %v1243_v15 = vmul.f32 %v4500_v63, %v4346_v18  ;;  %v6321_v56 = vld [vmem:[#allocation56_spill] sm:$0xff] }
 0x1ed   : > { %v4614_v50 = vpop.permute.xlu1 %1333  ;;  %v4616_v33 = vpop.permute.xlu0 %1335  ;;  %v1244_v51 = vmul.f32 %v4504_v42, %v4346_v18  ;;  %v545_v53 = vadd.f32 %v4002_v49, %v4405_v22  ;;  %v4682_v60 = vmul.f32 %v4446_v37, %v6321_v56  ;;  %v1262_v9 = vmul.f32 %v4500_v63, %v6321_v56  ;;  %v6325_v22 = vld [vmem:[#allocation32_spill] sm:$0xff] }
 0x1ee   : > { %6317 = vst [vmem:[#allocation87_spill] sm:$0xff] %v4614_v50  ;;  %6318 = vst [vmem:[#allocation88_spill] sm:$0xff] %v4616_v33  ;;  %v1263_v21 = vmul.f32 %v4504_v42, %v6321_v56  ;;  %v753_v44 = vadd.f32 %v4486_v54, %v737_v34  ;;  %v811_v35 = vadd.f32 %v6322_v17, %v772_v31  ;;  %v6328_v56 = vld [vmem:[#allocation48_spill] sm:$0xff]  ;;  %v1249_v17 = vrot.slane %v1243_v15, 6 }
 0x1ef   : > { %v669_v57 = vadd.f32 %v6323_v36, %v630_v43  ;;  %v4693_v18 = vmul.f32 %v4500_v63, %v4343_v25  ;;  %v610_v49 = vadd.f32 %v4498_v10, %v594_v32  ;;  %v595_v2 = vadd.f32 %v6325_v22, %v545_v53  ;;  %v6329_v10 = vld [vmem:[#allocation22_spill] sm:$0xff] }
 0x1f0   : > { %v4699_v19 = vmul.f32 %v4504_v42, %v4343_v25  ;;  %v1437_v54 = vmul.f32 %v4319_v45, %v6328_v56  ;;  %v629_v31 = vadd.f32 %v4540_v39, %v602_v16  ;;  %v6194_v43 = vrot.slane %v4672_v27, 6  ;;  %v6330_v42 = vld [vmem:[#allocation30_spill] sm:$0xff] }
 0x1f1   : > { %v4665_v11 = vpop.permute.xlu1 %1356  ;;  %v4667_v24 = vpop.permute.xlu0 %1358  ;;  %6324 = vst [vmem:[#allocation56_spill] sm:$0xff] %v4693_v18  ;;  %v1251_v36 = vrot.slane %v1244_v51, 6  ;;  %v1007_v32 = vadd.f32 %v6329_v10, %v4418_v52  ;;  %v1268_v22 = vrot.slane %v1262_v9, 6  ;;  %v1270_v25 = vrot.slane %v1263_v21, 6  ;;  %v6333_v51 = vld [vmem:[#allocation41_spill] sm:$0xff]  ;;  %v6334_v53 = vld [vmem:[#allocation18_spill] sm:$0xff] }
 0x1f2   : > { %6320 = vst [vmem:[#allocation89_spill] sm:$0xff] %v4667_v24  ;;  %6326 = vst [vmem:[#allocation15_spill] sm:$0xff] %v4699_v19  ;;  %v856_v50 = vadd.f32 %v6330_v42, %v811_v35  ;;  %v6332_v19 = vld [vmem:[#allocation33_spill] sm:$0xff]  ;;  %v1438_v39 = vmul.f32 %v4303_v14, %v6328_v56  ;;  %v611_v16 = vadd.f32 %v4517_v23, %v595_v2  ;;  %v6335_v35 = vld [vmem:[#allocation11_spill] sm:$0xff] }
 0x1f3   : > { %v714_v18 = vadd.f32 %v6332_v19, %v669_v57  ;;  %v648_v15 = vadd.f32 %v4549_v1, %v610_v49  ;;  %v1052_v52 = vadd.f32 %v6333_v51, %v1007_v32  ;;  %v1439_v9 = vmul.f32 %v6328_v56, %v6334_v53  ;;  %v6338_v23 = vld [vmem:[#allocation53_spill] sm:$0xff]  ;;  %v6339_v2 = vld [vmem:[#allocation26_spill] sm:$0xff]  ;;  %v6345_v32 = vld [vmem:[#allocation79_spill] sm:$0xff] }
 0x1f4   : > { %v668_v42 = vadd.f32 %v6335_v35, %v629_v31  ;;  %v4728_v19 = vsel %vm475_vm3, %v1249_v17, %v1251_v36  ;;  %v4732_v1 = vmul.f32 %v4319_v45, %v6338_v23  ;;  %v4742_v49 = vsel %vm475_vm3, %v1268_v22, %v1270_v25  ;;  %v6347_v35 = vld [vmem:[#allocation13_spill] sm:$0xff]  ;;  %v6348_v25 = vld [vmem:[#allocation44_spill] sm:$0xff] }
 0x1f5   : > { %v4701_v24 = vpop.permute.xlu1 %1360  ;;  %v1454_v34 = vpop.permute.xlu0 %1453  ;;  %6337 = vst [vmem:[#allocation48_spill] sm:$0xff] %v4728_v19  ;;  %6342 = vst [vmem:[#allocation30_spill] sm:$0xff] %v4742_v49  ;;  %v4746_v56 = vmul.f32 %v4303_v14, %v6338_v23  ;;  %v884_v31 = vadd.f32 3.0, %v856_v50  ;;  %v747_v51 = vadd.f32 %v6345_v32, %v714_v18  ;;  %v6350_v50 = vld [vmem:[#allocation34_spill] sm:$0xff]  ;;  %v6358_v32 = vld [vmem:[#allocation24_spill] sm:$0xff] }
 0x1f6   : > { %6327 = vst [vmem:[#allocation12_spill] sm:$0xff] %v4701_v24  ;;  %v6331_v24 = vrot.slane %v4477_v46, 6  ;;  %v4725_v46 = vsel %vm475_vm3, %v6194_v43, %v1249_v17  ;;  %v6344_v17 = vld [vmem:[#allocation19_spill] sm:$0xff]  ;;  %v713_v49 = vadd.f32 %v6350_v50, %v668_v42 }
 0x1f7   : > { %6336 = vst [vmem:[#allocation32_spill] sm:$0xff] %v4725_v46  ;;  %6343 = vst [vmem:[#allocation33_spill] sm:$0xff] %v4746_v56  ;;  %v6359_v50 = vld [vmem:[#allocation31_spill] sm:$0xff]  ;;  %v6361_v46 = vld [vmem:[#allocation14_spill] sm:$0xff] }
 0x1f8   : > { %v791_v33 = vadd.f32 %v6331_v24, %v753_v44  ;;  %v1027_v24 = vadd.f32 %v6339_v2, %v4440_v55  ;;  %v6340_v44 = vrot.slane %v4682_v60, 6  ;;  %v4752_v55 = vmul.f32 %v6338_v23, %v6334_v53  ;;  %v6352_v23 = vld [vmem:[#allocation25_spill] sm:$0xff]  ;;  %v6363_v56 = vld [vmem:[#allocation80_spill] sm:$0xff] }
 0x1f9   : > { %v1456_v10 = vpop.permute.xlu1 %1455  ;;  %v1458_v21 = vpop.permute.xlu0 %1457  ;;  %v688_v2 = vadd.f32 %v6347_v35, %v648_v15  ;;  %v746_v19 = vadd.f32 %v6363_v56, %v713_v49 }
 0x1fa   : > { %v4739_v57 = vsel %vm475_vm3, %v6340_v44, %v1268_v22  ;;  %v831_v36 = vadd.f32 %v6344_v17, %v791_v33  ;;  %6346 = vst [vmem:[#allocation41_spill] sm:$0xff] %v4752_v55  ;;  %v649_v44 = vadd.f32 %v4552_v28, %v611_v16  ;;  %v1085_v22 = vadd.f32 %v4566_v20, %v1052_v52  ;;  %v6351_v33 = vld [vmem:[#allocation57_spill] sm:$0xff]  ;;  %v6353_v17 = vld [vmem:[#allocation58_spill] sm:$0xff]  ;;  %v6356_v52 = vld [vmem:[#allocation59_spill] sm:$0xff] }
 0x1fb   : > { %6341 = vst [vmem:[#allocation22_spill] sm:$0xff] %v4739_v57  ;;  %v1077_v43 = vadd.f32 %v6348_v25, %v1027_v24  ;;  %v1487_v18 = vmul.f32 %v4423_v5, %v6351_v33  ;;  %v1488_v53 = vmul.f32 %v4462_v6, %v6351_v33  ;;  %v1489_v15 = vmul.f32 %v6351_v33, %v6352_v23  ;;  %v6357_v24 = vld [vmem:[#allocation69_spill] sm:$0xff]  ;;  %v6360_v55 = vld [vmem:[#allocation35_spill] sm:$0xff] }
 0x1fc   : > { %v4769_v28 = vmul.f32 %v4423_v5, %v6353_v17  ;;  %v4773_v20 = vmul.f32 %v4462_v6, %v6353_v17  ;;  %v4777_v16 = vmul.f32 %v6353_v17, %v6352_v23  ;;  %v1543_v42 = vmul.f32 %v4446_v37, %v6356_v52 }
 0x1fd   : > { %v1474_v45 = vpop.permute.xlu1 %1473  ;;  %v4758_v14 = vpop.permute.xlu0 %1475  ;;  %v1009_v35 = vadd.f32 %v6358_v32, %v6357_v24  ;;  %v887_v25 = vmax.f32 %v884_v31, 0.0  ;;  %v881_v33 = vadd.f32 %v6359_v50, %v831_v36  ;;  %v774_v5 = vadd.f32 %v4569_v8, %v747_v51  ;;  %v6364_v8 = vld [vmem:[#allocation29_spill] sm:$0xff]  ;;  %v6366_v51 = vld [vmem:[#allocation23_spill] sm:$0xff] }
 0x1fe   : > { %6349 = vst [vmem:[#allocation18_spill] sm:$0xff] %v4758_v14  ;;  %6354 = vst [vmem:[#allocation11_spill] sm:$0xff] %v4773_v20  ;;  %v738_v57 = vadd.f32 %v6360_v55, %v688_v2  ;;  %v689_v6 = vadd.f32 %v6361_v46, %v649_v44  ;;  %v1093_v20 = vadd.f32 %v4611_v13, %v1077_v43  ;;  %v6362_v23 = vrot.slane %v4556_v61, 6  ;;  %v6365_v46 = vld [vmem:[#allocation68_spill] sm:$0xff]  ;;  %v6367_v43 = vld [vmem:[#allocation43_spill] sm:$0xff] }
 0x1ff   : > { %6355 = vst [vmem:[#allocation53_spill] sm:$0xff] %v4777_v16  ;;  %v1462_v24 = vadd.f32 %v1454_v34, %v1437_v54  ;;  %v4795_v31 = vmul.f32 %v4500_v63, %v6356_v52  ;;  %v4799_v36 = vmul.f32 %v6356_v52, %v6364_v8  ;;  %v1008_v13 = vadd.f32 %v6366_v51, %v6365_v46  ;;  %v6368_v55 = vld [vmem:[#allocation47_spill] sm:$0xff]  ;;  %v6369_v44 = vld [vmem:[#allocation60_spill] sm:$0xff]  ;;  %v6372_v50 = vld [vmem:[#allocation17_spill] sm:$0xff] }
 0x200   : > { %v1112_v17 = vadd.f32 %v6362_v23, %v1085_v22  ;;  %v1054_v61 = vadd.f32 %v6367_v43, %v1009_v35  ;;  %v4807_v22 = vmul.f32 %v4446_v37, %v6369_v44  ;;  %v6370_v54 = vld [vmem:[#allocation71_spill] sm:$0xff]  ;;  %v890_v56 = vmin.f32 %v887_v25, 6.0  ;;  %v6373_v8 = vld [vmem:[#allocation36_spill] sm:$0xff] }
 0x201   : > { %v4790_v16 = vpop.permute.xlu1 %1477  ;;  %v1510_v14 = vpop.permute.xlu0 %1509  ;;  %v6371_v34 = vld [vmem:[#allocation27_spill] sm:$0xff]  ;;  %v4811_v32 = vadd.f32 3.0, %v881_v33  ;;  %v813_v52 = vadd.f32 %v6372_v50, %v774_v5  ;;  %v754_v23 = vadd.f32 %v4532_v26, %v738_v57  ;;  %v739_v46 = vadd.f32 %v6373_v8, %v689_v6  ;;  %v6376_v33 = vld [vmem:[#allocation42_spill] sm:$0xff]  ;;  %v6377_v50 = vld [vmem:[#allocation45_spill] sm:$0xff] }
 0x202   : > { %v1151_v2 = vadd.f32 %v6368_v55, %v1112_v17  ;;  %v1028_v49 = vadd.f32 %v6371_v34, %v6370_v54  ;;  %v6374_v35 = vrot.slane %v4573_v12, 6  ;;  %v6375_v17 = vld [vmem:[#allocation62_spill] sm:$0xff]  ;;  %v773_v63 = vadd.f32 %v4586_v0, %v746_v19  ;;  %v6379_v8 = vld [vmem:[#allocation72_spill] sm:$0xff] }
 0x203   : > { %v1463_v44 = vadd.f32 %v1456_v10, %v1438_v39  ;;  %v1464_v54 = vadd.f32 %v1458_v21, %v1439_v9  ;;  %v1490_v25 = vadd.f32 %v1487_v18, %v1462_v24  ;;  %v1053_v34 = vadd.f32 %v6376_v33, %v1008_v13  ;;  %v6378_v57 = vld [vmem:[#allocation54_spill] sm:$0xff]  ;;  %v6380_v12 = vld [vmem:[#allocation28_spill] sm:$0xff] }
 0x204   : > { %v1131_v51 = vadd.f32 %v6374_v35, %v1093_v20  ;;  %v1196_v43 = vadd.f32 %v6375_v17, %v1151_v2  ;;  %v1087_v5 = vadd.f32 %v4599_v47, %v1054_v61  ;;  %v1078_v26 = vadd.f32 %v6377_v50, %v1028_v49  ;;  %v6381_v2 = vld [vmem:[#allocation37_spill] sm:$0xff]  ;;  %v6382_v47 = vld [vmem:[#allocation66_spill] sm:$0xff]  ;;  %v6383_v24 = vld [vmem:[#allocation16_spill] sm:$0xff] }
 0x205   : > { %v1512_v55 = vpop.permute.xlu1 %1511  ;;  %v1514_v37 = vpop.permute.xlu0 %1513  ;;  %v1029_v20 = vadd.f32 %v6380_v12, %v6379_v8  ;;  %v4826_v35 = vmul.f32 0.16666667, %v890_v56  ;;  %v858_v17 = vadd.f32 %v6381_v2, %v813_v52  ;;  %v1518_v0 = vadd.f32 %v1510_v14, %v1490_v25  ;;  %v6384_v14 = vld [vmem:[#allocation85_spill] sm:$0xff]  ;;  %v6385_v50 = vld [vmem:[#allocation46_spill] sm:$0xff] }
 0x206   : > { %v1171_v6 = vadd.f32 %v6378_v57, %v1131_v51  ;;  %v917_v39 = vmax.f32 %v4811_v32, 0.0  ;;  %v792_v10 = vadd.f32 %v4591_v58, %v754_v23  ;;  %v1229_v9 = vadd.f32 %v4629_v7, %v1196_v43  ;;  %v6391_v57 = vld [vmem:[#allocation75_spill] sm:$0xff] }
 0x207   : > { %v812_v13 = vadd.f32 %v6383_v24, %v773_v63  ;;  %v1482_v61 = vadd.f32 %v1474_v45, %v4732_v1  ;;  %v1491_v49 = vadd.f32 %v1488_v53, %v1463_v44  ;;  %v1492_v56 = vadd.f32 %v1489_v15, %v1464_v54  ;;  %v6386_v63 = vld [vmem:[#allocation51_spill] sm:$0xff]  ;;  %v6388_v44 = vld [vmem:[#allocation38_spill] sm:$0xff] }
 0x208   : > { %v1221_v21 = vadd.f32 %v6382_v47, %v1171_v6  ;;  %v755_v52 = vadd.f32 %v4536_v41, %v739_v46  ;;  %v1086_v51 = vadd.f32 %v6384_v14, %v1053_v34  ;;  %v1094_v25 = vadd.f32 %v4621_v30, %v1078_v26  ;;  %v6390_v26 = vld [vmem:[#allocation64_spill] sm:$0xff]  ;;  %v6398_v14 = vld [vmem:[#allocation81_spill] sm:$0xff]  ;;  %v6411_v32 = vld [vmem:[#allocation15_spill] sm:$0xff] }
 0x209   : > { %v1530_v19 = vpop.permute.xlu1 %1529  ;;  %v4833_v18 = vpop.permute.xlu0 %1531  ;;  %v1114_v58 = vadd.f32 %v4639_v29, %v1087_v5  ;;  %v4842_v7 = vadd.f32 3.0, %v858_v17  ;;  %v1519_v23 = vadd.f32 %v1512_v55, %v1491_v49  ;;  %v1520_v43 = vadd.f32 %v1514_v37, %v1492_v56  ;;  %v6389_v55 = vld [vmem:[#allocation20_spill] sm:$0xff]  ;;  %v6397_v56 = vld [vmem:[#allocation63_spill] sm:$0xff] }
 0x20a   : > { %v1546_v33 = vadd.f32 %v1543_v42, %v1518_v0  ;;  %v1079_v45 = vadd.f32 %v6385_v50, %v1029_v20  ;;  %v1237_v41 = vadd.f32 %v4663_v48, %v1221_v21  ;;  %v6387_v53 = vrot.slane %v4672_v27, 6  ;;  %v6394_v0 = vld [vmem:[#allocation84_spill] sm:$0xff]  ;;  %v6395_v21 = vld [vmem:[#allocation86_spill] sm:$0xff] }
 0x20b   : > { %v1153_v1 = vadd.f32 %v6386_v63, %v1114_v58  ;;  %v4852_v46 = vadd.f32 %v6388_v44, %v812_v13  ;;  %v832_v37 = vadd.f32 %v6389_v55, %v792_v10  ;;  %v1498_v42 = vadd.f32 %v4769_v28, %v1482_v61  ;;  %v6401_v55 = vld [vmem:[#allocation21_spill] sm:$0xff] }
 0x20c   : > { %v1256_v15 = vadd.f32 %v6387_v53, %v1229_v9  ;;  %v1113_v34 = vadd.f32 %v4636_v38, %v1086_v51  ;;  %v1132_v5 = vadd.f32 %v4656_v3, %v1094_v25  ;;  %v1547_v12 = vadd.f32 %v4795_v31, %v1519_v23  ;;  %v6392_v38 = vld [vmem:[#allocation50_spill] sm:$0xff]  ;;  %v6396_v31 = vld [vmem:[#allocation55_spill] sm:$0xff] }
 0x20d   : > { %v4849_v30 = vpop.permute.xlu1 %1533  ;;  %v1566_v29 = vpop.permute.xlu0 %1565  ;;  %v1198_v48 = vadd.f32 %v6390_v26, %v1153_v1  ;;  %v1538_v6 = vadd.f32 %v1530_v19, %v1498_v42  ;;  %v1548_v28 = vadd.f32 %v4799_v36, %v1520_v43  ;;  %v1095_v20 = vadd.f32 %v4625_v62, %v1079_v45  ;;  %v6399_v43 = vld [vmem:[#allocation67_spill] sm:$0xff] }
 0x20e   : > { %v1574_v54 = vadd.f32 %v1566_v29, %v1546_v33  ;;  %v1295_v27 = vadd.f32 %v6391_v57, %v1256_v15  ;;  %v1152_v2 = vadd.f32 %v6392_v38, %v1113_v34  ;;  %v6393_v3 = vrot.slane %v4682_v60, 6  ;;  %v6400_v29 = vld [vmem:[#allocation39_spill] sm:$0xff]  ;;  %v6407_v38 = vld [vmem:[#allocation18_spill] sm:$0xff] }
 0x20f   : > { %v793_v24 = vadd.f32 %v6395_v21, %v755_v52  ;;  %v1172_v49 = vadd.f32 %v6396_v31, %v1132_v5  ;;  %v1231_v62 = vadd.f32 %v4650_v40, %v1198_v48  ;;  %v1554_v23 = vadd.f32 %v4807_v22, %v1538_v6  ;;  %v6408_v21 = vld [vmem:[#allocation78_spill] sm:$0xff]  ;;  %v6410_v31 = vld [vmem:[#allocation32_spill] sm:$0xff] }
 0x210   : > { %v1597_v8 = vadd.f32 3.0, %v1574_v54  ;;  %v1275_v17 = vadd.f32 %v6393_v3, %v1237_v41  ;;  %v1340_v10 = vadd.f32 %v6394_v0, %v1295_v27  ;;  %v1197_v36 = vadd.f32 %v6397_v56, %v1152_v2  ;;  %v6402_v54 = vld [vmem:[#allocation61_spill] sm:$0xff]  ;;  %v6405_v27 = vld [vmem:[#allocation74_spill] sm:$0xff] }
 0x211   : > { %v1568_v9 = vpop.permute.xlu1 %1567  ;;  %v1570_v47 = vpop.permute.xlu0 %1569  ;;  %v1133_v52 = vadd.f32 %v4659_v4, %v1095_v20  ;;  %v1222_v33 = vadd.f32 %v6399_v43, %v1172_v49  ;;  %v882_v44 = vadd.f32 %v6400_v29, %v832_v37  ;;  %v833_v42 = vadd.f32 %v6401_v55, %v793_v24  ;;  %v6404_v37 = vld [vmem:[#allocation56_spill] sm:$0xff]  ;;  %v6406_v20 = vld [vmem:[#allocation33_spill] sm:$0xff]  ;;  %v6419_v55 = vld [vmem:[#allocation82_spill] sm:$0xff] }
 0x212   : > { %v1600_v19 = vmax.f32 %v1597_v8, 0.0  ;;  %v1575_v13 = vadd.f32 %v1568_v9, %v1547_v12  ;;  %v1576_v61 = vadd.f32 %v1570_v47, %v1548_v28  ;;  %v1315_v51 = vadd.f32 %v6398_v14, %v1275_v17 }
 0x213   : > { %v1368_v50 = vadd.f32 3.0, %v1340_v10  ;;  %v1173_v22 = vadd.f32 %v6402_v54, %v1133_v52  ;;  %v1230_v4 = vadd.f32 %v4643_v59, %v1197_v36  ;;  %v1238_v57 = vadd.f32 %v6404_v37, %v1222_v33  ;;  %v6412_v36 = vld [vmem:[#allocation22_spill] sm:$0xff]  ;;  %v6415_v52 = vld [vmem:[#allocation11_spill] sm:$0xff] }
 0x214   : > { %v1603_v60 = vmin.f32 %v1600_v19, 6.0  ;;  %v1598_v25 = vadd.f32 3.0, %v1575_v13  ;;  %v1599_v58 = vadd.f32 3.0, %v1576_v61  ;;  %v1365_v45 = vadd.f32 %v4665_v11, %v1315_v51  ;;  %v6403_v11 = vld [vmem:[#allocation48_spill] sm:$0xff] }
 0x215   : > { %v1586_v63 = vpop.permute.xlu1 %1585  ;;  %v4882_v1 = vpop.permute.xlu0 %1587  ;;  %v1258_v34 = vadd.f32 %v6403_v11, %v1231_v62  ;;  %v1223_v6 = vadd.f32 %v6405_v27, %v1173_v22  ;;  %v1371_v8 = vmax.f32 %v1368_v50, 0.0  ;;  %v1483_v2 = vadd.f32 %v6407_v38, %v6406_v20  ;;  %v6409_v13 = vld [vmem:[#allocation40_spill] sm:$0xff]  ;;  %v6421_v22 = vld [vmem:[#allocation30_spill] sm:$0xff]  ;;  %v6422_v11 = vld [vmem:[#allocation87_spill] sm:$0xff] }
 0x216   : > { %v1606_v40 = vmul.f32 0.16666667, %v1603_v60  ;;  %v1601_v41 = vmax.f32 %v1598_v25, 0.0  ;;  %v1602_v53 = vmax.f32 %v1599_v58, 0.0  ;;  %v1594_v15 = vadd.f32 %v1586_v63, %v1554_v23  ;;  %v6414_v58 = vld [vmem:[#allocation41_spill] sm:$0xff]  ;;  %v6425_v38 = vld [vmem:[#allocation83_spill] sm:$0xff] }
 0x217   : > { %v1398_v59 = vadd.f32 3.0, %v1365_v45  ;;  %v920_v10 = vmin.f32 %v917_v39, 6.0  ;;  %v889_v9 = vmax.f32 %v4842_v7, 0.0  ;;  %v885_v47 = vadd.f32 3.0, %v4852_v46  ;;  %v6413_v46 = vld [vmem:[#allocation88_spill] sm:$0xff]  ;;  %v6416_v63 = vld [vmem:[#allocation77_spill] sm:$0xff] }
 0x218   : > { %v1604_v5 = vmin.f32 %v1601_v41, 6.0  ;;  %v1605_v26 = vmin.f32 %v1602_v53, 6.0  ;;  %v1625_v48 = vadd.f32 3.0, %v1594_v15  ;;  %1612 = vrot.lane.b32.xlu0 %v1606_v40, %s3618_s17  ;;  %v1297_v24 = vadd.f32 %v6408_v21, %v1258_v34  ;;  %v6417_v41 = vld [vmem:[#allocation60_spill] sm:$0xff]  ;;  %v6423_v27 = vld [vmem:[#allocation89_spill] sm:$0xff] }
 0x219   : > { %v4897_v12 = vpop.permute.xlu1 %1589  ;;  %v415_v28 = vpop.permute.xlu0 %414  ;;  %v915_v19 = vadd.f32 3.0, %v882_v44  ;;  %v883_v61 = vadd.f32 %v6409_v13, %v833_v42  ;;  %v1257_v49 = vadd.f32 %v6410_v31, %v1230_v4  ;;  %v1239_v39 = vadd.f32 %v6411_v32, %v1223_v6  ;;  %v6418_v53 = vld [vmem:[#allocation76_spill] sm:$0xff] }
 0x21a   : > { %v1607_v3 = vmul.f32 0.16666667, %v1604_v5  ;;  %v1608_v17 = vmul.f32 0.16666667, %v1605_v26  ;;  %v1628_v0 = vmax.f32 %v1625_v48, 0.0  ;;  %v1276_v7 = vadd.f32 %v6412_v36, %v1238_v57  ;;  %v6426_v13 = vld [vmem:[#allocation12_spill] sm:$0xff] }
 0x21b   : > { %424 = vst.msk [vmem:[%s4891_s13 - $0x2] sm:$0xfc] %vm423_vm4, %v415_v28  ;;  %v1374_v62 = vmin.f32 %v1371_v8, 6.0  ;;  %v1342_v14 = vadd.f32 %v6413_v46, %v1297_v24  ;;  %v1401_v25 = vmax.f32 %v1398_v59, 0.0  ;;  %v1484_v23 = vadd.f32 %v4790_v16, %v6414_v58  ;;  %v6424_v8 = vld [vmem:[#allocation53_spill] sm:$0xff] }
 0x21c   : > { %v1631_v56 = vmin.f32 %v1628_v0, 6.0  ;;  %1614 = vrot.lane.b32.xlu1 %v1607_v3, %s3618_s17  ;;  %1616 = vrot.lane.b32.xlu0 %v1608_v17, %s3618_s17  ;;  %v1499_v43 = vadd.f32 %v6415_v52, %v1483_v2  ;;  %v923_v50 = vmul.f32 0.16666667, %v920_v10  ;;  %v892_v45 = vmin.f32 %v889_v9, 6.0 }
 0x21d   : > { %v417_v51 = vpop.permute.xlu1 %416  ;;  %v419_v60 = vpop.permute.xlu0 %418  ;;  %v1296_v40 = vadd.f32 %v6416_v63, %v1257_v49  ;;  %v1552_v15 = vmul.f32 %v6418_v53, %v6417_v41  ;;  %v888_v29 = vmax.f32 %v885_v47, 0.0  ;;  %v918_v44 = vmax.f32 %v915_v19, 0.0 }
 0x21e   : > { %v1634_v33 = vmul.f32 0.16666667, %v1631_v56  ;;  %426 = vst.msk [vmem:[%s4891_s13 + $0x6] sm:$0xff] %vm425_vm5, %v417_v51  ;;  %v1316_v16 = vadd.f32 %v6419_v55, %v1276_v7  ;;  %v1539_v42 = vadd.f32 %v4833_v18, %v1499_v43  ;;  %v916_v54 = vadd.f32 3.0, %v883_v61 }
 0x21f   : > { %428 = vst.msk [vmem:[%s4891_s13 + $0xe] sm:$0xf] %vm427_vm6, %v419_v60  ;;  %v1277_v4 = vadd.f32 %v6421_v22, %v1239_v39  ;;  %v1341_v34 = vadd.f32 %v6422_v11, %v1296_v40  ;;  %v1370_v5 = vadd.f32 3.0, %v1342_v14  ;;  %v1377_v37 = vmul.f32 0.16666667, %v1374_v62 }
 0x220   : > { %1640 = vrot.lane.b32.xlu1 %v1634_v33, %s3618_s17  ;;  %899 = vrot.lane.b32.xlu0 %v4826_v35, %s6420_s9  ;;  %v1404_v57 = vmin.f32 %v1401_v25, 6.0  ;;  %v1366_v6 = vadd.f32 %v6423_v27, %v1316_v16  ;;  %v1500_v59 = vadd.f32 %v6424_v8, %v1484_v23  ;;  %v895_v18 = vmul.f32 0.16666667, %v892_v45  ;;  %v4938_v35 = vld [vmem:[#allocation2 + $0x40] sm:$0x3f]  ;;  %v6429_v16 = vld [vmem:[#allocation49_spill] sm:$0xff] }
 0x221   : > { %v445_v26 = vpop.permute.xlu1 %444  ;;  %v447_v48 = vpop.permute.xlu0 %446  ;;  %v1553_v28 = vmul.f32 %v4938_v35, %v6417_v41  ;;  %v891_v20 = vmin.f32 %v888_v29, 6.0  ;;  %v1317_v2 = vadd.f32 %v6425_v38, %v1277_v4  ;;  %v1555_v17 = vadd.f32 %v1552_v15, %v1539_v42 }
 0x222   : > { %3251 = vst.msk [vmem:[%s4891_s13 + $0xd6] sm:$0xfc] %vm423_vm4, %v445_v26  ;;  %v1540_v3 = vadd.f32 %v4849_v30, %v1500_v59  ;;  %v921_v0 = vmin.f32 %v918_v44, 6.0  ;;  %v919_v10 = vmax.f32 %v916_v54, 0.0  ;;  %v1369_v9 = vadd.f32 3.0, %v1341_v34  ;;  %v6427_v44 = vld [vmem:[#allocation52_spill] sm:$0xff] }
 0x223   : > { %3252 = vst.msk [vmem:[%s4891_s13 + $0xde] sm:$0xff] %vm425_vm5, %v447_v48  ;;  %v1373_v47 = vmax.f32 %v1370_v5, 0.0  ;;  %v1407_v24 = vmul.f32 0.16666667, %v1404_v57  ;;  %v1399_v19 = vadd.f32 3.0, %v1366_v6  ;;  %v1367_v61 = vadd.f32 %v6426_v13, %v1317_v2 }
 0x224   : > { %929 = vrot.lane.b32.xlu1 %v923_v50, %s6420_s9  ;;  %1383 = vrot.lane.b32.xlu0 %v1377_v37, %s6420_s9  ;;  %v1595_v31 = vadd.f32 %v4882_v1, %v1555_v17  ;;  %v894_v49 = vmul.f32 0.16666667, %v891_v20  ;;  %v1556_v30 = vadd.f32 %v1553_v28, %v1540_v3  ;;  %v924_v56 = vmul.f32 0.16666667, %v921_v0  ;;  %v4965_v54 = vld [vmem:[#allocation2 + $0x10] sm:$0x3f] }
 0x225   : > { %v449_v21 = vpop.permute.xlu1 %448  ;;  %v922_v32 = vmin.f32 %v919_v10, 6.0  ;;  %v1372_v39 = vmax.f32 %v1369_v9, 0.0  ;;  %v1376_v36 = vmin.f32 %v1373_v47, 6.0  ;;  %v1402_v7 = vmax.f32 %v1399_v19, 0.0  ;;  %v6430_v47 = vld [vmem:[#allocation65_spill] sm:$0xff] }
 0x226   : > { %3253 = vst.msk [vmem:[%s4891_s13 + $0xe6] sm:$0xf] %vm427_vm6, %v449_v21  ;;  %v1400_v62 = vadd.f32 3.0, %v1367_v61  ;;  %v1626_v46 = vadd.f32 3.0, %v1595_v31  ;;  %v1596_v14 = vadd.f32 %v4897_v12, %v1556_v30  ;;  %v1702_v15 = vstv %s3336_s7  ;;  %v6431_v19 = vld [vmem:[#allocation73_spill] sm:$0xff]  ;;  %s5136_s7 = sld [smem:[#allocation3 + $0x1e]] }
 0x227   : > { %v925_v1 = vmul.f32 0.16666667, %v922_v32  ;;  %v1375_v51 = vmin.f32 %v1372_v39, 6.0  ;;  %v1379_v60 = vmul.f32 0.16666667, %v1376_v36  ;;  %v1405_v25 = vmin.f32 %v1402_v7, 6.0 }
 0x228   : > { %1413 = vrot.lane.b32.xlu1 %v1407_v24, %s6420_s9  ;;  %903 = vrot.lane.b32.xlu0 %v895_v18, %s6420_s9  ;;  %v1403_v58 = vmax.f32 %v1400_v62, 0.0  ;;  %v1629_v23 = vmax.f32 %v1626_v46, 0.0  ;;  %v1627_v52 = vadd.f32 3.0, %v1596_v14  ;;  %v1703_v55 = vmul.f32 %v6427_v44, %v1702_v15  ;;  %v4995_v61 = vld [vmem:[#allocation2 + $0x28] sm:$0x3f] }
 0x229   : > { %v1378_v43 = vmul.f32 0.16666667, %v1375_v51  ;;  %v1408_v33 = vmul.f32 0.16666667, %v1405_v25  ;;  %v1704_v42 = vmul.f32 %v6429_v16, %v1702_v15  ;;  %v1705_v22 = vmul.f32 %v4965_v54, %v1702_v15 }
 0x22a   : > { %v1406_v50 = vmin.f32 %v1403_v58, 6.0  ;;  %v1632_v12 = vmin.f32 %v1629_v23, 6.0  ;;  %v1630_v45 = vmax.f32 %v1627_v52, 0.0  ;;  %v1722_v4 = vstv %s3337_s8  ;;  %s5138_s8 = sld [smem:[#allocation3 + $0x94]] }
 0x22b   : > { %v1742_v11 = vstv %s3338_s12  ;;  %v1723_v34 = vmul.f32 %v6427_v44, %v1722_v4  ;;  %v1724_v5 = vmul.f32 %v6429_v16, %v1722_v4  ;;  %v1725_v57 = vmul.f32 %v4965_v54, %v1722_v4  ;;  %v5033_v4 = vld [vmem:[#allocation2] sm:$0xff]  ;;  %s5140_s12 = sld [smem:[#allocation3 + $0x37]] }
 0x22c   : > { %901 = vrot.lane.b32.xlu1 %v894_v49, %s6420_s9  ;;  %931 = vrot.lane.b32.xlu0 %v924_v56, %s6420_s9  ;;  %v1409_v63 = vmul.f32 0.16666667, %v1406_v50  ;;  %v1635_v40 = vmul.f32 0.16666667, %v1632_v12  ;;  %v1633_v41 = vmin.f32 %v1630_v45, 6.0  ;;  %v1743_v26 = vmul.f32 %v6427_v44, %v1742_v11 }
 0x22d   : > { %v1744_v48 = vmul.f32 %v6429_v16, %v1742_v11  ;;  %v1745_v37 = vmul.f32 %v4965_v54, %v1742_v11  ;;  %v1767_v6 = vstv %s3339_s16  ;;  %v1846_v9 = vstv %s3344_s23  ;;  %s5150_s16 = sld [smem:[#allocation3 + $0x76]]  ;;  %s5154_s23 = sld [smem:[#allocation3 + $0x50]] }
 0x22e   : > { %v1636_v29 = vmul.f32 0.16666667, %v1633_v41  ;;  %v1749_v27 = vrot.slane %v1743_v26, 6  ;;  %v1769_v18 = vmul.f32 %v6429_v16, %v1767_v6  ;;  %v1768_v28 = vmul.f32 %v6427_v44, %v1767_v6 }
 0x22f   : > { %v1750_v8 = vrot.slane %v1744_v48, 6  ;;  %v1752_v59 = vrot.slane %v1745_v37, 6  ;;  %v1770_v3 = vmul.f32 %v4965_v54, %v1767_v6  ;;  %v1847_v21 = vmul.f32 %v6430_v47, %v1846_v9 }
 0x230   : > { %933 = vrot.lane.b32.xlu1 %v925_v1, %s6420_s9  ;;  %1387 = vrot.lane.b32.xlu0 %v1379_v60, %s6420_s9  ;;  %v1775_v2 = vrot.slane %v1769_v18, 6  ;;  %v1774_v17 = vrot.slane %v1768_v28, 6  ;;  %v1848_v13 = vmul.f32 %v6431_v19, %v1846_v9  ;;  %v1849_v31 = vmul.f32 %v4995_v61, %v1846_v9 }
 0x231   : > { %v1751_v20 = vsel %vm475_vm3, %v1749_v27, %v1750_v8  ;;  %v1753_v38 = vsel %vm475_vm3, %v1750_v8, %v1752_v59  ;;  %v1777_v10 = vrot.slane %v1770_v3, 6  ;;  %v1866_v49 = vstv %s3345_s24  ;;  %s5156_s24 = sld [smem:[#allocation3 + $0x46]] }
 0x232   : > { %v1776_v0 = vsel %vm475_vm3, %v1774_v17, %v1775_v2  ;;  %v1886_v30 = vstv %s3346_s25  ;;  %v1867_v56 = vmul.f32 %v6430_v47, %v1866_v49  ;;  %v1868_v32 = vmul.f32 %v6431_v19, %v1866_v49  ;;  %s5176_s25 = sld [smem:[#allocation3 + $0x8f]] }
 0x233   : > { %v1778_v24 = vsel %vm475_vm3, %v1775_v2, %v1777_v10  ;;  %v1887_v39 = vmul.f32 %v6430_v47, %v1886_v30  ;;  %v1888_v36 = vmul.f32 %v6431_v19, %v1886_v30  ;;  %v1889_v7 = vmul.f32 %v4995_v61, %v1886_v30  ;;  %v5066_v30 = vld [vmem:[#allocation2 + $0x18] sm:$0xff] }
 0x234   : > { %1385 = vrot.lane.b32.xlu1 %v1378_v43, %s6420_s9  ;;  %1415 = vrot.lane.b32.xlu0 %v1408_v33, %s6420_s9  ;;  %v1911_v62 = vstv %s3347_s26  ;;  %v1869_v46 = vmul.f32 %v4995_v61, %v1866_v49  ;;  %v1990_v45 = vstv %s3352_s27  ;;  %s5200_s26 = sld [smem:[#allocation3 + $0x5f]]  ;;  %s5260_s27 = sld [smem:[#allocation3 + $0x78]] }
 0x235   : > { %v1893_v14 = vrot.slane %v1887_v39, 6  ;;  %v1894_v1 = vrot.slane %v1888_v36, 6  ;;  %v1896_v51 = vrot.slane %v1889_v7, 6  ;;  %v1912_v60 = vmul.f32 %v6430_v47, %v1911_v62  ;;  %v5076_v7 = vld [vmem:[#allocation2 + $0x20] sm:$0xff] }
 0x236   : > { %v1913_v25 = vmul.f32 %v6431_v19, %v1911_v62  ;;  %v1914_v58 = vmul.f32 %v4995_v61, %v1911_v62  ;;  %v1992_v15 = vmul.f32 %v6418_v53, %v1990_v45  ;;  %v2010_v44 = vstv %s3353_s20  ;;  %s5262_s20 = sld [smem:[#allocation3 + $0x91]] }
 0x237   : > { %v1895_v23 = vsel %vm475_vm3, %v1893_v14, %v1894_v1  ;;  %v1897_v52 = vsel %vm475_vm3, %v1894_v1, %v1896_v51  ;;  %v1918_v43 = vrot.slane %v1912_v60, 6  ;;  %v2012_v16 = vmul.f32 %v6418_v53, %v2010_v44 }
 0x238   : > { %1417 = vrot.lane.b32.xlu1 %v1409_v63, %s6420_s9  ;;  %1642 = vrot.lane.b32.xlu0 %v1635_v40, %s3618_s17  ;;  %v1919_v33 = vrot.slane %v1913_v25, 6  ;;  %v1921_v12 = vrot.slane %v1914_v58, 6  ;;  %v6432_v63 = vld [vmem:[#allocation70_spill] sm:$0xff]  ;;  %v2204_v26 = vstv %s3366_s28  ;;  %v2224_v48 = vstv %s3367_s29  ;;  %s5272_s28 = sld [smem:[#allocation3 + $0x69]]  ;;  %s5279_s29 = sld [smem:[#allocation3 + $0xf]] }
 0x239   : > { %v1991_v40 = vmul.f32 %v6432_v63, %v1990_v45  ;;  %v2205_v37 = vmul.f32 %v5033_v4, %v2204_v26  ;;  %v2227_v8 = vmul.f32 %v4965_v54, %v2224_v48  ;;  %v2207_v59 = vmul.f32 %v4965_v54, %v2204_v26 }
 0x23a   : > { %v1920_v50 = vsel %vm475_vm3, %v1918_v43, %v1919_v33  ;;  %v1922_v41 = vsel %vm475_vm3, %v1919_v33, %v1921_v12  ;;  %v2249_v28 = vstv %s3368_s30  ;;  %v2368_v1 = vstv %s3375_s5  ;;  %s5281_s30 = sld [smem:[#allocation3 + $0x82]]  ;;  %s5326_s5 = sld [smem:[#allocation3 + $0x4b]] }
 0x23b   : > { %v2250_v3 = vmul.f32 %v5033_v4, %v2249_v28  ;;  %v2252_v9 = vmul.f32 %v4965_v54, %v2249_v28  ;;  %v2393_v33 = vstv %s3376_s6  ;;  %s5331_s6 = sld [smem:[#allocation3 + $0x41]] }
 0x23c   : > { %1644 = vrot.lane.b32.xlu1 %v1636_v29, %s3618_s17  ;;  %1709 = vrot.lane.b32.xlu0 %v1703_v55, %s6428_s15  ;;  %v1993_v29 = vmul.f32 %v4938_v35, %v1990_v45  ;;  %v2011_v55 = vmul.f32 %v6432_v63, %v2010_v44 }
 0x23d   : > { %v2256_v47 = vrot.slane %v2250_v3, 6  ;;  %v2259_v19 = vrot.slane %v2252_v9, 6 }
 0x240   : > { %1711 = vrot.lane.b32.xlu1 %v1704_v42, %s6428_s15  ;;  %1713 = vrot.lane.b32.xlu0 %v1705_v22, %s6428_s15  ;;  %v2184_v42 = vstv %s3365_s22  ;;  %v2013_v22 = vmul.f32 %v4938_v35, %v2010_v44  ;;  %s5269_s22 = sld [smem:[#allocation3]] }
 0x241   : > { %v2185_v11 = vmul.f32 %v5033_v4, %v2184_v42 }
 0x244   : > { %1729 = vrot.lane.b32.xlu1 %v1723_v34, %s6428_s15  ;;  %1731 = vrot.lane.b32.xlu0 %v1724_v5, %s6428_s15  ;;  %v5038_v34 = vld [vmem:[#allocation2 + $0x8] sm:$0xff]  ;;  %v2187_v5 = vmul.f32 %v4965_v54, %v2184_v42 }
 0x245   : > { %v2186_v53 = vmul.f32 %v5038_v34, %v2184_v42  ;;  %v2226_v6 = vmul.f32 %v5038_v34, %v2224_v48  ;;  %v2251_v2 = vmul.f32 %v5038_v34, %v2249_v28 }
 0x247   : > { %v2257_v10 = vrot.slane %v2251_v2, 6 }
 0x248   : > { %1733 = vrot.lane.b32.xlu1 %v1725_v57, %s6428_s15  ;;  %1754 = vrot.lane.b32.xlu0 %v1749_v27, %s6428_s15  ;;  %v2206_v57 = vmul.f32 %v5038_v34, %v2204_v26  ;;  %v2225_v27 = vmul.f32 %v5033_v4, %v2224_v48 }
 0x24a   : > { %v2231_v18 = vrot.slane %v2225_v27, 6 }
 0x24c   : > { %1756 = vrot.lane.b32.xlu1 %v1751_v20, %s6428_s15  ;;  %1758 = vrot.lane.b32.xlu0 %v1753_v38, %s6428_s15  ;;  %v2232_v20 = vrot.slane %v2226_v6, 6  ;;  %v2234_v38 = vrot.slane %v2227_v8, 6  ;;  %v5122_v8 = vld [vmem:[#allocation2 + $0x30] sm:$0xff] }
 0x250   : > { %1779 = vrot.lane.b32.xlu1 %v1774_v17, %s6428_s15  ;;  %1781 = vrot.lane.b32.xlu0 %v1776_v0, %s6428_s15  ;;  %v2233_v17 = vsel %vm475_vm3, %v2231_v18, %v2232_v20  ;;  %v2235_v0 = vsel %vm475_vm3, %v2232_v20, %v2234_v38  ;;  %v5142_v38 = vld [vmem:[#allocation2 + $0x38] sm:$0xff] }
 0x254   : > { %1783 = vrot.lane.b32.xlu1 %v1778_v24, %s6428_s15  ;;  %1853 = vrot.lane.b32.xlu0 %v1847_v21, %s6428_s15  ;;  %v2258_v24 = vsel %vm475_vm3, %v2256_v47, %v2257_v10 }
 0x258   : > { %1855 = vrot.lane.b32.xlu1 %v1848_v13, %s6428_s15  ;;  %1857 = vrot.lane.b32.xlu0 %v1849_v31, %s6428_s15  ;;  %v2328_v13 = vstv %s3373_s3  ;;  %s5289_s3 = sld [smem:[#allocation3 + $0x28]] }
 0x259   : > { %v2330_v62 = vmul.f32 %v5076_v7, %v2328_v13 }
 0x25c   : > { %1873 = vrot.lane.b32.xlu1 %v1867_v56, %s6428_s15  ;;  %1875 = vrot.lane.b32.xlu0 %v1868_v32, %s6428_s15  ;;  %v2329_v56 = vmul.f32 %v5066_v30, %v2328_v13  ;;  %v2260_v32 = vsel %vm475_vm3, %v2257_v10, %v2259_v19  ;;  %v1664_v10 = vstv %s3334_s0  ;;  %s5367_s0 = sld [smem:[#allocation3 + $0x64]] }
 0x260   : > { %1877 = vrot.lane.b32.xlu1 %v1869_v46, %s6428_s15  ;;  %1898 = vrot.lane.b32.xlu0 %v1893_v14, %s6428_s15  ;;  %v2331_v46 = vmul.f32 %v4995_v61, %v2328_v13  ;;  %v2348_v14 = vstv %s3374_s4  ;;  %v1667_v13 = vmul.f32 %v4965_v54, %v1664_v10  ;;  %s5318_s4 = sld [smem:[#allocation3 + $0x32]] }
 0x261   : > { %v2349_v25 = vmul.f32 %v5066_v30, %v2348_v14  ;;  %v2350_v58 = vmul.f32 %v5076_v7, %v2348_v14  ;;  %v2351_v45 = vmul.f32 %v4995_v61, %v2348_v14 }
 0x264   : > { %1900 = vrot.lane.b32.xlu1 %v1895_v23, %s6428_s15  ;;  %1902 = vrot.lane.b32.xlu0 %v1897_v52, %s6428_s15  ;;  %v2369_v23 = vmul.f32 %v5066_v30, %v2368_v1  ;;  %v2370_v52 = vmul.f32 %v5076_v7, %v2368_v1 }
 0x266   : > { %v2375_v63 = vrot.slane %v2369_v23, 6 }
 0x268   : > { %1923 = vrot.lane.b32.xlu1 %v1918_v43, %s6428_s15  ;;  %1925 = vrot.lane.b32.xlu0 %v1920_v50, %s6428_s15  ;;  %v2371_v43 = vmul.f32 %v4995_v61, %v2368_v1 }
 0x26c   : > { %1927 = vrot.lane.b32.xlu1 %v1922_v41, %s6428_s15  ;;  %1997 = vrot.lane.b32.xlu0 %v1991_v40, %s6428_s15  ;;  %v2376_v40 = vrot.slane %v2370_v52, 6  ;;  %v2378_v41 = vrot.slane %v2371_v43, 6 }
 0x26e   : > { %v2377_v42 = vsel %vm475_vm3, %v2375_v63, %v2376_v40 }
 0x270   : > { %1999 = vrot.lane.b32.xlu1 %v1992_v15, %s6428_s15  ;;  %2001 = vrot.lane.b32.xlu0 %v1993_v29, %s6428_s15  ;;  %v2394_v15 = vmul.f32 %v5066_v30, %v2393_v33  ;;  %v2395_v29 = vmul.f32 %v5076_v7, %v2393_v33 }
 0x274   : > { %2017 = vrot.lane.b32.xlu1 %v2011_v55, %s6428_s15  ;;  %2019 = vrot.lane.b32.xlu0 %v2012_v16, %s6428_s15  ;;  %v2396_v16 = vmul.f32 %v4995_v61, %v2393_v33 }
 0x278   : > { %2021 = vrot.lane.b32.xlu1 %v2013_v22, %s6428_s15  ;;  %2191 = vrot.lane.b32.xlu0 %v2185_v11, %s6428_s15  ;;  %v2379_v22 = vsel %vm475_vm3, %v2376_v40, %v2378_v41  ;;  %v2400_v11 = vrot.slane %v2394_v15, 6  ;;  %v5197_v15 = vstv %s5154_s23  ;;  %s5462_s23 = sld [smem:[#allocation3 + $0x57]] }
 0x27c   : > { %2193 = vrot.lane.b32.xlu1 %v2186_v53, %s6428_s15  ;;  %2195 = vrot.lane.b32.xlu0 %v2187_v5, %s6428_s15  ;;  %v2401_v53 = vrot.slane %v2395_v29, 6  ;;  %v1808_v29 = vstv %s5156_s24  ;;  %s5473_s24 = sld [smem:[#allocation3 + $0x89]] }
 0x27e   : > { %v2402_v48 = vsel %vm475_vm3, %v2400_v11, %v2401_v53 }
 0x280   : > { %2211 = vrot.lane.b32.xlu1 %v2205_v37, %s6428_s15  ;;  %2213 = vrot.lane.b32.xlu0 %v2206_v57, %s6428_s15  ;;  %v2403_v37 = vrot.slane %v2396_v16, 6  ;;  %v2472_v57 = vstv %s3381_s19  ;;  %s5345_s19 = sld [smem:[#allocation3 + $0x5a]] }
 0x281   : > { %v2474_v2 = vmul.f32 %v5142_v38, %v2472_v57  ;;  %v2475_v3 = vmul.f32 %v4938_v35, %v2472_v57 }
 0x284   : > { %2215 = vrot.lane.b32.xlu1 %v2207_v59, %s6428_s15  ;;  %2236 = vrot.lane.b32.xlu0 %v2231_v18, %s6428_s15  ;;  %v2473_v59 = vmul.f32 %v5122_v8, %v2472_v57  ;;  %v2404_v18 = vsel %vm475_vm3, %v2401_v53, %v2403_v37 }
 0x288   : > { %2238 = vrot.lane.b32.xlu1 %v2233_v17, %s6428_s15  ;;  %2240 = vrot.lane.b32.xlu0 %v2235_v0, %s6428_s15  ;;  %v2492_v17 = vstv %s3382_s18  ;;  %v2030_v0 = vstv %s3354_s21  ;;  %s5358_s18 = sld [smem:[#allocation3 + $0xc]]  ;;  %s5360_s21 = sld [smem:[#allocation3 + $0x3e]] }
 0x289   : > { %v2493_v9 = vmul.f32 %v5122_v8, %v2492_v17  ;;  %v2494_v19 = vmul.f32 %v5142_v38, %v2492_v17  ;;  %v2495_v1 = vmul.f32 %v4938_v35, %v2492_v17 }
 0x28a   : > { %v1613_v21 = vpop.permute.xlu0 %1612 }
 0x28b   : > { %3326 = vst.msk [vmem:[%s4891_s13 + $0x16] sm:$0xfc] %vm423_vm4, %v1613_v21 }
 0x28c   : > { %2261 = vrot.lane.b32.xlu1 %v2256_v47, %s6428_s15  ;;  %2263 = vrot.lane.b32.xlu0 %v2258_v24, %s6428_s15  ;;  %v1666_v47 = vmul.f32 %v5038_v34, %v1664_v10 }
 0x28e   : > { %v1615_v31 = vpop.permute.xlu1 %1614  ;;  %v1617_v49 = vpop.permute.xlu0 %1616  ;;  %v1672_v14 = vrot.slane %v1666_v47, 6 }
 0x28f   : > { %3327 = vst.msk [vmem:[%s4891_s13 + $0x1e] sm:$0xff] %vm425_vm5, %v1615_v31  ;;  %v2031_v31 = vmul.f32 %v5122_v8, %v2030_v0 }
 0x290   : > { %3328 = vst.msk [vmem:[%s4891_s13 + $0x26] sm:$0xf] %vm427_vm6, %v1617_v49  ;;  %2265 = vrot.lane.b32.xlu1 %v2260_v32, %s6428_s15  ;;  %2335 = vrot.lane.b32.xlu0 %v2329_v56, %s6428_s15  ;;  %v2032_v49 = vmul.f32 %v5142_v38, %v2030_v0  ;;  %v1654_v56 = vstv %s5130_s1  ;;  %s5374_s1 = sld [smem:[#allocation3 + $0x70]] }
 0x291   : > { %v1683_v32 = vstv %s5132_s11  ;;  %v2037_v52 = vrot.slane %v2031_v31, 6  ;;  %v1655_v40 = vmul.f32 %v5033_v4, %v1654_v56  ;;  %s5376_s11 = sld [smem:[#allocation3 + $0x73]] }
 0x292   : > { %v1641_v39 = vpop.permute.xlu1 %1640  ;;  %v900_v36 = vpop.permute.xlu0 %899  ;;  %v1684_v43 = vmul.f32 %v5033_v4, %v1683_v32  ;;  %v2038_v33 = vrot.slane %v2032_v49, 6 }
 0x293   : > { %3329 = vst.msk [vmem:[%s4891_s13 + $0xee] sm:$0xfc] %vm423_vm4, %v1641_v39  ;;  %v2033_v39 = vmul.f32 %v4938_v35, %v2030_v0 }
 0x294   : > { %3278 = vst.msk [vmem:[%s4891_s13 + $0x45] sm:$0xf8] %vm909_vm7, %v900_v36  ;;  %2337 = vrot.lane.b32.xlu1 %v2330_v62, %s6428_s15  ;;  %2339 = vrot.lane.b32.xlu0 %v2331_v46, %s6428_s15  ;;  %v1665_v36 = vmul.f32 %v5033_v4, %v1664_v10  ;;  %v1659_v62 = vstv %s5136_s7  ;;  %v1690_v53 = vrot.slane %v1684_v43, 6  ;;  %s5398_s7 = sld [smem:[#allocation3 + $0x7d]] }
 0x295   : > { %v2055_v46 = vstv %s5138_s8  ;;  %v1662_v49 = vmul.f32 %v4965_v54, %v1659_v62  ;;  %s5417_s8 = sld [smem:[#allocation3 + $0x8c]] }
 0x296   : > { %v930_v51 = vpop.permute.xlu1 %929  ;;  %v1384_v60 = vpop.permute.xlu0 %1383  ;;  %v1671_v41 = vrot.slane %v1665_v36, 6 }
 0x297   : > { %3281 = vst.msk [vmem:[%s4891_s13 + $0x11d] sm:$0xf8] %vm909_vm7, %v930_v51  ;;  %v1685_v51 = vmul.f32 %v5038_v34, %v1683_v32 }
 0x298   : > { %3308 = vst.msk [vmem:[%s4891_s13 + $0x8c] sm:$0xf0] %vm1393_vm8, %v1384_v60  ;;  %2355 = vrot.lane.b32.xlu1 %v2349_v25, %s6428_s15  ;;  %2357 = vrot.lane.b32.xlu0 %v2350_v58, %s6428_s15  ;;  %v5181_v60 = vstv %s5140_s12  ;;  %v1674_v58 = vrot.slane %v1667_v13, 6  ;;  %s5435_s12 = sld [smem:[#allocation3 + $0x16]] }
 0x299   : > { %v1691_v16 = vrot.slane %v1685_v51, 6  ;;  %v1793_v36 = vmul.f32 %v5066_v30, %v5181_v60 }
 0x29a   : > { %v1414_v50 = vpop.permute.xlu1 %1413  ;;  %v904_v12 = vpop.permute.xlu0 %903 }
 0x29b   : > { %3311 = vst.msk [vmem:[%s4891_s13 + $0x164] sm:$0xf0] %vm1393_vm8, %v1414_v50  ;;  %v2040_v50 = vrot.slane %v2033_v39, 6 }
 0x29c   : > { %3280 = vst.msk [vmem:[%s4891_s13 + $0x55] sm:$0x1f] %vm912_vm9, %v904_v12  ;;  %2359 = vrot.lane.b32.xlu1 %v2351_v45, %s6428_s15  ;;  %2380 = vrot.lane.b32.xlu0 %v2375_v63, %s6428_s15  ;;  %v2056_v12 = vmul.f32 %v5122_v8, %v2055_v46  ;;  %v5190_v45 = vmul.f32 %v5142_v38, %v2055_v46  ;;  %v2512_v63 = vstv %s5150_s16  ;;  %s5452_s16 = sld [smem:[#allocation3 + $0x25]] }
 0x29d   : > { %v2041_v37 = vsel %vm475_vm3, %v2038_v33, %v2040_v50  ;;  %v2513_v0 = vmul.f32 %v5122_v8, %v2512_v63  ;;  %v2515_v13 = vmul.f32 %v4938_v35, %v2512_v63 }
 0x29e   : > { %v902_v44 = vpop.permute.xlu1 %901  ;;  %v932_v55 = vpop.permute.xlu0 %931  ;;  %v2062_v57 = vrot.slane %v2056_v12, 6 }
 0x29f   : > { %3279 = vst.msk [vmem:[%s4891_s13 + $0x4d] sm:$0xff] %vm425_vm5, %v902_v44  ;;  %3282 = vst.msk [vmem:[%s4891_s13 + $0x125] sm:$0xff] %vm425_vm5, %v932_v55  ;;  %v1656_v44 = vmul.f32 %v5038_v34, %v1654_v56  ;;  %v1657_v55 = vmul.f32 %v4965_v54, %v1654_v56  ;;  %v2519_v51 = vrot.slane %v2513_v0, 6 }
 0x2a0   : > { %2382 = vrot.lane.b32.xlu1 %v2377_v42, %s6428_s15  ;;  %2384 = vrot.lane.b32.xlu0 %v2379_v22, %s6428_s15  ;;  %v1686_v42 = vmul.f32 %v4965_v54, %v1683_v32  ;;  %v1673_v22 = vsel %vm475_vm3, %v1671_v41, %v1672_v14 }
 0x2a2   : > { %v934_v5 = vpop.permute.xlu1 %933  ;;  %v1388_v26 = vpop.permute.xlu0 %1387  ;;  %v1693_v17 = vrot.slane %v1686_v42, 6  ;;  %v1811_v42 = vmul.f32 %v4995_v61, %v1808_v29 }
 0x2a3   : > { %3283 = vst.msk [vmem:[%s4891_s13 + $0x12d] sm:$0x1f] %vm912_vm9, %v934_v5 }
 0x2a4   : > { %3310 = vst.msk [vmem:[%s4891_s13 + $0x9c] sm:$0x3f] %vm1396_vm10, %v1388_v26  ;;  %2405 = vrot.lane.b32.xlu1 %v2400_v11, %s6428_s15  ;;  %2407 = vrot.lane.b32.xlu0 %v2402_v48, %s6428_s15  ;;  %v1675_v11 = vsel %vm475_vm3, %v1672_v14, %v1674_v58  ;;  %v2039_v48 = vsel %vm475_vm3, %v2037_v52, %v2038_v33  ;;  %v5231_v14 = vstv %s5200_s26  ;;  %v2522_v33 = vrot.slane %v2515_v13, 6  ;;  %s5508_s26 = sld [smem:[#allocation3 + $0x39]] }
 0x2a5   : > { %v1681_v10 = vadd.f32 %v1675_v11, %v1657_v55  ;;  %v1795_v55 = vmul.f32 %v4995_v61, %v5181_v60 }
 0x2a6   : > { %v1386_v27 = vpop.permute.xlu1 %1385  ;;  %v1416_v6 = vpop.permute.xlu0 %1415 }
 0x2a7   : > { %3309 = vst.msk [vmem:[%s4891_s13 + $0x94] sm:$0xff] %vm425_vm5, %v1386_v27  ;;  %3312 = vst.msk [vmem:[%s4891_s13 + $0x16c] sm:$0xff] %vm425_vm5, %v1416_v6  ;;  %v2063_v27 = vrot.slane %v5190_v45, 6  ;;  %v2058_v6 = vmul.f32 %v4938_v35, %v2055_v46  ;;  %v1809_v46 = vmul.f32 %v5066_v30, %v1808_v29 }
 0x2a8   : > { %2409 = vrot.lane.b32.xlu1 %v2404_v18, %s6428_s15  ;;  %2479 = vrot.lane.b32.xlu0 %v2473_v59, %s6428_s15  ;;  %v1679_v59 = vadd.f32 %v1671_v41, %v1655_v40  ;;  %v1660_v18 = vmul.f32 %v5033_v4, %v1659_v62  ;;  %v1810_v41 = vmul.f32 %v5076_v7, %v1808_v29 }
 0x2a9   : > { %v2064_v56 = vsel %vm475_vm3, %v2062_v57, %v2063_v27  ;;  %v2065_v32 = vrot.slane %v2058_v6, 6 }
 0x2aa   : > { %v1418_v28 = vpop.permute.xlu1 %1417  ;;  %v1643_v20 = vpop.permute.xlu0 %1642 }
 0x2ab   : > { %3313 = vst.msk [vmem:[%s4891_s13 + $0x174] sm:$0x3f] %vm1396_vm10, %v1418_v28  ;;  %v1661_v28 = vmul.f32 %v5038_v34, %v1659_v62  ;;  %v1794_v62 = vmul.f32 %v5076_v7, %v5181_v60  ;;  %v2066_v40 = vsel %vm475_vm3, %v2063_v27, %v2065_v32 }
 0x2ac   : > { %3330 = vst.msk [vmem:[%s4891_s13 + $0xf6] sm:$0xff] %vm425_vm5, %v1643_v20  ;;  %2481 = vrot.lane.b32.xlu1 %v2474_v2, %s6428_s15  ;;  %2483 = vrot.lane.b32.xlu0 %v2475_v3, %s6428_s15  ;;  %v2537_v20 = vstv %s5176_s25  ;;  %v1680_v2 = vadd.f32 %v1673_v22, %v1656_v44  ;;  %v1692_v3 = vsel %vm475_vm3, %v1690_v53, %v1691_v16  ;;  %s5496_s25 = sld [smem:[#allocation3 + $0x7]] }
 0x2ad   : > { %v1699_v39 = vadd.f32 %v1692_v3, %v1661_v28  ;;  %v2538_v50 = vmul.f32 %v5122_v8, %v2537_v20  ;;  %v5238_v12 = vmul.f32 %v5142_v38, %v2537_v20  ;;  %v2540_v28 = vmul.f32 %v4938_v35, %v2537_v20 }
 0x2ae   : > { %v1645_v21 = vpop.permute.xlu1 %1644  ;;  %v5160_v24 = vpop.permute.xlu0 %1709  ;;  %v1829_v3 = vmul.f32 %v5076_v7, %v5231_v14  ;;  %v1801_v20 = vmul.f32 %v5066_v30, %v5197_v15 }
 0x2af   : > { %3331 = vst.msk [vmem:[%s4891_s13 + $0xfe] sm:$0xf] %vm427_vm6, %v1645_v21  ;;  %v1718_v31 = vadd.f32 %v5160_v24, %v1679_v59  ;;  %v2544_v27 = vrot.slane %v2538_v50, 6  ;;  %v2545_v60 = vrot.slane %v5238_v12, 6 }
 0x2b0   : > { %2499 = vrot.lane.b32.xlu1 %v2493_v9, %s6428_s15  ;;  %2501 = vrot.lane.b32.xlu0 %v2494_v19, %s6428_s15  ;;  %v1698_v9 = vadd.f32 %v1690_v53, %v1660_v18  ;;  %v2514_v19 = vmul.f32 %v5142_v38, %v2512_v63  ;;  %v1816_v18 = vrot.slane %v1810_v41, 6 }
 0x2b2   : > { %v5183_v25 = vpop.permute.xlu1 %1711  ;;  %v5185_v23 = vpop.permute.xlu0 %1713  ;;  %v2520_v43 = vrot.slane %v2514_v19, 6  ;;  %v2546_v19 = vsel %vm475_vm3, %v2544_v27, %v2545_v60 }
 0x2b3   : > { %v1719_v45 = vadd.f32 %v5183_v25, %v1680_v2  ;;  %v1720_v63 = vadd.f32 %v5185_v23, %v1681_v10  ;;  %v1828_v2 = vmul.f32 %v5066_v30, %v5231_v14 }
 0x2b4   : > { %2503 = vrot.lane.b32.xlu1 %v2495_v1, %s6428_s15  ;;  %2042 = vrot.lane.b32.xlu0 %v2037_v52, %s6428_s15  ;;  %v1694_v1 = vsel %vm475_vm3, %v1691_v16, %v1693_v17  ;;  %v1815_v16 = vrot.slane %v1809_v46, 6  ;;  %v1830_v46 = vmul.f32 %v4995_v61, %v5231_v14 }
 0x2b5   : > { %v1700_v44 = vadd.f32 %v1694_v1, %v1662_v49 }
 0x2b6   : > { %v5207_v5 = vpop.permute.xlu1 %1729  ;;  %v1732_v26 = vpop.permute.xlu0 %1731  ;;  %v1817_v49 = vsel %vm475_vm3, %v1815_v16, %v1816_v18 }
 0x2b7   : > { %v1739_v22 = vadd.f32 %v1732_v26, %v1699_v39  ;;  %v1738_v6 = vadd.f32 %v5207_v5, %v1698_v9  ;;  %v1818_v26 = vrot.slane %v1811_v42, 6  ;;  %v1802_v9 = vmul.f32 %v5076_v7, %v5197_v15 }
 0x2b8   : > { %2044 = vrot.lane.b32.xlu1 %v2039_v48, %s6428_s15  ;;  %2046 = vrot.lane.b32.xlu0 %v2041_v37, %s6428_s15  ;;  %v2521_v37 = vsel %vm475_vm3, %v2519_v51, %v2520_v43  ;;  %v1834_v39 = vrot.slane %v1828_v2, 6  ;;  %v2136_v42 = vstv %s5269_s22  ;;  %v1944_v2 = vstv %s5281_s30  ;;  %s5565_s22 = sld [smem:[#allocation3 + $0x7a]]  ;;  %s5612_s30 = sld [smem:[#allocation3 + $0x61]] }
 0x2b9   : > { %v1819_v32 = vsel %vm475_vm3, %v1816_v18, %v1818_v26 }
 0x2ba   : > { %v1734_v47 = vpop.permute.xlu1 %1733  ;;  %v1755_v21 = vpop.permute.xlu0 %1754 }
 0x2bb   : > { %v1763_v24 = vadd.f32 %v1755_v21, %v1718_v31  ;;  %v1740_v29 = vadd.f32 %v1734_v47, %v1700_v44 }
 0x2bc   : > { %2067 = vrot.lane.b32.xlu1 %v2062_v57, %s6428_s15  ;;  %2069 = vrot.lane.b32.xlu0 %v2064_v56, %s6428_s15  ;;  %v2523_v57 = vsel %vm475_vm3, %v2520_v43, %v2522_v33  ;;  %v2547_v56 = vrot.slane %v2540_v28, 6  ;;  %v1803_v43 = vmul.f32 %v4995_v61, %v5197_v15 }
 0x2bd   : > { %v1796_v11 = vadd.f32 %v1793_v36, %v1763_v24  ;;  %v1835_v36 = vrot.slane %v1829_v3, 6 }
 0x2be   : > { %v1757_v58 = vpop.permute.xlu1 %1756  ;;  %v1759_v52 = vpop.permute.xlu0 %1758  ;;  %v2548_v14 = vsel %vm475_vm3, %v2545_v60, %v2547_v56 }
 0x2bf   : > { %v1764_v25 = vadd.f32 %v1757_v58, %v1719_v45  ;;  %v1765_v53 = vadd.f32 %v1759_v52, %v1720_v63  ;;  %v1823_v10 = vadd.f32 %v1815_v16, %v1796_v11  ;;  %v1836_v12 = vsel %vm475_vm3, %v1834_v39, %v1835_v36 }
 0x2c0   : > { %2071 = vrot.lane.b32.xlu1 %v2066_v40, %s6428_s15  ;;  %2524 = vrot.lane.b32.xlu0 %v2519_v51, %s6428_s15  ;;  %v1837_v45 = vrot.slane %v1830_v46, 6  ;;  %v1952_v63 = vstv %s5260_s27  ;;  %v5323_v46 = vmul.f32 %v4938_v35, %v1944_v2  ;;  %s5512_s27 = sld [smem:[#allocation3 + $0x48]] }
 0x2c1   : > { %v1797_v17 = vadd.f32 %v1794_v62, %v1764_v25  ;;  %v1798_v5 = vadd.f32 %v1795_v55, %v1765_v53  ;;  %v1971_v55 = vstv %s5262_s20  ;;  %v1936_v25 = vstv %s5272_s28  ;;  %s5556_s20 = sld [smem:[#allocation3 + $0x2f]]  ;;  %s5570_s28 = sld [smem:[#allocation3 + $0x6b]] }
 0x2c2   : > { %v1780_v23 = vpop.permute.xlu1 %1779  ;;  %v1782_v48 = vpop.permute.xlu0 %1781  ;;  %v5295_v53 = vmul.f32 %v5122_v8, %v1952_v63  ;;  %v1973_v60 = vmul.f32 %v5142_v38, %v1971_v55  ;;  %v1937_v28 = vmul.f32 %v5122_v8, %v1936_v25  ;;  %v1938_v26 = vmul.f32 %v5142_v38, %v1936_v25 }
 0x2c3   : > { %v1789_v59 = vadd.f32 %v1782_v48, %v1739_v22  ;;  %v1788_v0 = vadd.f32 %v1780_v23, %v1738_v6  ;;  %v1824_v62 = vadd.f32 %v1817_v49, %v1797_v17  ;;  %v1825_v51 = vadd.f32 %v1819_v32, %v1798_v5 }
 0x2c4   : > { %2526 = vrot.lane.b32.xlu1 %v2521_v37, %s6428_s15  ;;  %2528 = vrot.lane.b32.xlu0 %v2523_v57, %s6428_s15  ;;  %v1838_v23 = vsel %vm475_vm3, %v1835_v36, %v1837_v45  ;;  %v1954_v48 = vmul.f32 %v5142_v38, %v1952_v63  ;;  %v1955_v37 = vmul.f32 %v4938_v35, %v1952_v63  ;;  %v1979_v49 = vrot.slane %v1973_v60, 6 }
 0x2c5   : > { %v1804_v1 = vadd.f32 %v1801_v20, %v1788_v0  ;;  %v1805_v24 = vadd.f32 %v1802_v9, %v1789_v59  ;;  %v5301_v57 = vmul.f32 %v5122_v8, %v1971_v55  ;;  %v1974_v6 = vmul.f32 %v4938_v35, %v1971_v55 }
 0x2c6   : > { %v1784_v47 = vpop.permute.xlu1 %1783  ;;  %v1854_v21 = vpop.permute.xlu0 %1853  ;;  %v2146_v59 = vstv %s5279_s29  ;;  %v1959_v0 = vrot.slane %v5295_v53, 6  ;;  %v1960_v20 = vrot.slane %v1954_v48, 6  ;;  %v1962_v9 = vrot.slane %v1955_v37, 6  ;;  %s5606_s29 = sld [smem:[#allocation3 + $0x20]] }
 0x2c7   : > { %v1790_v13 = vadd.f32 %v1784_v47, %v1740_v29  ;;  %v1862_v31 = vadd.f32 %v1854_v21, %v1823_v10  ;;  %v1842_v41 = vadd.f32 %v1834_v39, %v1804_v1  ;;  %v1843_v44 = vadd.f32 %v1836_v12, %v1805_v24 }
 0x2c8   : > { %2549 = vrot.lane.b32.xlu1 %v2544_v27, %s6428_s15  ;;  %2551 = vrot.lane.b32.xlu0 %v2546_v19, %s6428_s15  ;;  %v2148_v3 = vmul.f32 %v5038_v34, %v2146_v59  ;;  %v2149_v10 = vmul.f32 %v4965_v54, %v2146_v59  ;;  %v2147_v47 = vmul.f32 %v5033_v4, %v2146_v59  ;;  %v2165_v21 = vstv %s5289_s3  ;;  %s5620_s3 = sld [smem:[#allocation3 + $0x52]] }
 0x2c9   : > { %v1806_v40 = vadd.f32 %v1803_v43, %v1790_v13  ;;  %v1939_v19 = vmul.f32 %v4938_v35, %v1936_v25  ;;  %v1978_v13 = vrot.slane %v5301_v57, 6  ;;  %v1981_v56 = vrot.slane %v1974_v6, 6 }
 0x2ca   : > { %v1856_v58 = vpop.permute.xlu1 %1855  ;;  %v1858_v52 = vpop.permute.xlu0 %1857  ;;  %v1946_v36 = vmul.f32 %v5142_v38, %v1944_v2  ;;  %v2154_v1 = vrot.slane %v2148_v3, 6  ;;  %v1963_v43 = vsel %vm475_vm3, %v1960_v20, %v1962_v9  ;;  %v2167_v12 = vmul.f32 %v5038_v34, %v2165_v21 }
 0x2cb   : > { %v1863_v33 = vadd.f32 %v1856_v58, %v1824_v62  ;;  %v1864_v50 = vadd.f32 %v1858_v52, %v1825_v51  ;;  %v1844_v27 = vadd.f32 %v1838_v23, %v1806_v40  ;;  %v2156_v51 = vrot.slane %v2149_v10, 6 }
 0x2cc   : > { %2553 = vrot.lane.b32.xlu1 %v2548_v14, %s6428_s15  ;;  %s5306_s15 = sld [smem:[#allocation3 + $0x19]]  ;;  %v2166_v58 = vmul.f32 %v5033_v4, %v2165_v21  ;;  %v1961_v52 = vsel %vm475_vm3, %v1959_v0, %v1960_v20  ;;  %v2153_v14 = vrot.slane %v2147_v47, 6  ;;  %v1980_v35 = vsel %vm475_vm3, %v1978_v13, %v1979_v49 }
 0x2cd   : > { %v2157_v53 = vsel %vm475_vm3, %v2154_v1, %v2156_v51  ;;  %v2168_v60 = vmul.f32 %v4965_v54, %v2165_v21  ;;  %v2282_v10 = vstv %s5326_s5  ;;  %v2290_v21 = vstv %s5331_s6  ;;  %s5739_s5 = sld [smem:[#allocation3 + $0x11]]  ;;  %s5746_s6 = sld [smem:[#allocation3 + $0x43]] }
 0x2ce   : > { %v1874_v16 = vpop.permute.xlu1 %1873  ;;  %v1876_v15 = vpop.permute.xlu0 %1875  ;;  %v2155_v55 = vsel %vm475_vm3, %v2153_v14, %v2154_v1  ;;  %v2172_v23 = vrot.slane %v2166_v58, 6  ;;  %v5395_v51 = vmul.f32 %v5066_v30, %v2290_v21  ;;  %v2309_v58 = vstv %s5345_s19  ;;  %s5750_s19 = sld [smem:[#allocation3 + $0x2]] }
 0x2cf   : > { %v1882_v22 = vadd.f32 %v1874_v16, %v1842_v41  ;;  %v1883_v11 = vadd.f32 %v1876_v15, %v1843_v44  ;;  %v2137_v41 = vmul.f32 %v5033_v4, %v2136_v42  ;;  %v2138_v44 = vmul.f32 %v5038_v34, %v2136_v42 }
 0x2d0   : > { %v2139_v16 = vmul.f32 %v4965_v54, %v2136_v42  ;;  %v2175_v9 = vrot.slane %v2168_v60, 6  ;;  %6438 = vst [vmem:[#allocation34_spill] sm:$0xff] %v5395_v51  ;;  %v5423_v57 = vstv %s5360_s21  ;;  %s5772_s21 = sld [smem:[#allocation3 + $0x34]] }
 0x2d1   : > { %v5347_v48 = vadd.f32 %v2153_v14, %v2137_v41  ;;  %v2292_v14 = vmul.f32 %v5076_v7, %v2290_v21 }
 0x2d2   : > { %v1878_v18 = vpop.permute.xlu1 %1877  ;;  %v1899_v29 = vpop.permute.xlu0 %1898 }
 0x2d3   : > { %v1884_v17 = vadd.f32 %v1878_v18, %v1844_v27  ;;  %v1907_v5 = vadd.f32 %v1899_v29, %v1862_v31  ;;  %v1945_v31 = vmul.f32 %v5122_v8, %v1944_v2  ;;  %v2173_v27 = vrot.slane %v2167_v12, 6 }
 0x2d4   : > { %v5354_v29 = vadd.f32 %v2157_v53, %v2139_v16  ;;  %v2293_v12 = vmul.f32 %v4995_v61, %v2290_v21  ;;  %v5415_v16 = vmul.f32 %v5076_v7, %v2309_v58  ;;  %v2298_v53 = vrot.slane %v2292_v14, 6 }
 0x2d5   : > { %v1940_v45 = vadd.f32 %v1937_v28, %v1907_v5  ;;  %v2274_v28 = vstv %s5318_s4  ;;  %v2174_v20 = vsel %vm475_vm3, %v2172_v23, %v2173_v27  ;;  %s5667_s4 = sld [smem:[#allocation3 + $0x84]] }
 0x2d6   : > { %v1901_v32 = vpop.permute.xlu1 %1900  ;;  %v1903_v39 = vpop.permute.xlu0 %1902  ;;  %v5371_v47 = vmul.f32 %v5066_v30, %v2274_v28  ;;  %v5382_v1 = vmul.f32 %v4995_v61, %v2274_v28 }
 0x2d7   : > { %v1908_v24 = vadd.f32 %v1901_v32, %v1863_v33  ;;  %v1909_v62 = vadd.f32 %v1903_v39, %v1864_v50  ;;  %v5337_v33 = vsel %vm475_vm3, %v1979_v49, %v1981_v56  ;;  %v2141_v50 = vstv %s5306_s15  ;;  %s5657_s15 = sld [smem:[#allocation3 + $0x93]] }
 0x2d8   : > { %v2142_v37 = vmul.f32 %v5033_v4, %v2141_v50  ;;  %v1967_v18 = vadd.f32 %v1959_v0, %v1940_v45  ;;  %v2143_v2 = vmul.f32 %v5038_v34, %v2141_v50  ;;  %v2144_v3 = vmul.f32 %v4965_v54, %v2141_v50 }
 0x2d9   : > { %v1941_v6 = vadd.f32 %v1938_v26, %v1908_v24  ;;  %v1942_v59 = vadd.f32 %v1939_v19, %v1909_v62  ;;  %v5379_v39 = vmul.f32 %v5076_v7, %v2274_v28  ;;  %v5385_v24 = vmul.f32 %v5066_v30, %v2282_v10 }
 0x2da   : > { %v1924_v63 = vpop.permute.xlu1 %1923  ;;  %v1926_v40 = vpop.permute.xlu0 %1925  ;;  %v5364_v0 = vadd.f32 %v2172_v23, %v2142_v37  ;;  %v5388_v62 = vmul.f32 %v5076_v7, %v2282_v10  ;;  %v2300_v23 = vrot.slane %v2293_v12, 6  ;;  %v2312_v37 = vmul.f32 %v4995_v61, %v2309_v58 }
 0x2db   : > { %v1932_v15 = vadd.f32 %v1924_v63, %v1882_v22  ;;  %v1933_v25 = vadd.f32 %v1926_v40, %v1883_v11  ;;  %v5352_v11 = vadd.f32 %v2155_v55, %v2138_v44  ;;  %v1969_v49 = vadd.f32 %v1963_v43, %v1942_v59  ;;  %6434 = vst [vmem:[#allocation19_spill] sm:$0xff] %v5385_v24 }
 0x2dc   : > { %6435 = vst [vmem:[#allocation79_spill] sm:$0xff] %v5388_v62  ;;  %v2176_v43 = vsel %vm475_vm3, %v2173_v27, %v2175_v9  ;;  %v5409_v40 = vmul.f32 %v4995_v61, %v2282_v10  ;;  %v5412_v55 = vmul.f32 %v5066_v30, %v2309_v58  ;;  %v5433_v27 = vstv %s5374_s1  ;;  %s5958_s1 = sld [smem:[#allocation3 + $0x2a]] }
 0x2dd   : > { %v1948_v54 = vadd.f32 %v1945_v31, %v1932_v15  ;;  %v1949_v19 = vadd.f32 %v1946_v36, %v1933_v25  ;;  %v6208_v15 = vrot.slane %v5395_v51, 6  ;;  %v2418_v25 = vstv %s5367_s0  ;;  %s5774_s0 = sld [smem:[#allocation3 + $0x66]] }
 0x2de   : > { %v1928_v42 = vpop.permute.xlu1 %1927  ;;  %v1998_v22 = vpop.permute.xlu0 %1997  ;;  %6439 = vst [vmem:[#allocation57_spill] sm:$0xff] %v5409_v40  ;;  %6440 = vst [vmem:[#allocation25_spill] sm:$0xff] %v5412_v55  ;;  %v6207_v61 = vrot.slane %v5412_v55, 6  ;;  %v5457_v10 = vmul.f32 %v5142_v38, %v2418_v25  ;;  %v2654_v9 = vmul.f32 %v5122_v8, %v5433_v27 }
 0x2df   : > { %v1934_v5 = vadd.f32 %v1928_v42, %v1884_v17  ;;  %v5362_v26 = vadd.f32 %v1998_v22, %v1967_v18  ;;  %v1968_v17 = vadd.f32 %v1961_v52, %v1941_v6  ;;  %v5400_v52 = vadd.f32 %v2174_v20, %v2143_v2 }
 0x2e0   : > { %v1986_v50 = vadd.f32 %v1978_v13, %v1948_v54  ;;  %v1987_v63 = vadd.f32 %v1980_v35, %v1949_v19  ;;  %v2434_v6 = vstv %s5376_s11  ;;  %v2638_v18 = vmul.f32 %v5066_v30, %v5423_v57  ;;  %6445 = vst [vmem:[#allocation31_spill] sm:$0xff] %v5457_v10  ;;  %v3520_v19 = vld [vmem:[#allocation2 + $0x40] sm:$0x3f]  ;;  %s5977_s11 = sld [smem:[#allocation3 + $0x1b]] }
 0x2e1   : > { %6433 = vst [vmem:[#allocation26_spill] sm:$0xff] %v5362_v26  ;;  %v1950_v45 = vadd.f32 %v5323_v46, %v1934_v5  ;;  %v5420_v46 = vstv %s5358_s18  ;;  %v5445_v22 = vadd.f32 %v2176_v43, %v2144_v3  ;;  %v2317_v2 = vrot.slane %v5415_v16, 6  ;;  %s5752_s18 = sld [smem:[#allocation3 + $0x75]] }
 0x2e2   : > { %v2000_v56 = vpop.permute.xlu1 %1999  ;;  %v2002_v32 = vpop.permute.xlu0 %2001  ;;  %v2628_v59 = vmul.f32 %v5033_v4, %v5420_v46  ;;  %v5450_v5 = vmul.f32 %v5122_v8, %v2418_v25  ;;  %v2426_v20 = vstv %s5398_s7  ;;  %v5467_v3 = vsel %vm475_vm3, %v6208_v15, %v2298_v53  ;;  %s5985_s7 = sld [smem:[#allocation3 + $0x4d]] }
 0x2e3   : > { %v5390_v31 = vadd.f32 %v2000_v56, %v1968_v17  ;;  %v5392_v36 = vadd.f32 %v2002_v32, %v1969_v49  ;;  %v1988_v60 = vadd.f32 %v5337_v33, %v1950_v45  ;;  %6446 = vst [vmem:[#allocation35_spill] sm:$0xff] %v5467_v3  ;;  %v5470_v21 = vmul.f32 %v5122_v8, %v2434_v6 }
 0x2e4   : > { %6443 = vst [vmem:[#allocation69_spill] sm:$0xff] %v5450_v5  ;;  %v2436_v54 = vmul.f32 %v5142_v38, %v2434_v6  ;;  %v2437_v17 = vmul.f32 %v3520_v19, %v2434_v6  ;;  %v5476_v49 = vsel %vm475_vm3, %v2298_v53, %v2300_v23  ;;  %v2319_v56 = vrot.slane %v2312_v37, 6 }
 0x2e5   : > { %6436 = vst [vmem:[#allocation13_spill] sm:$0xff] %v5390_v31  ;;  %6437 = vst [vmem:[#allocation44_spill] sm:$0xff] %v5392_v36  ;;  %v5478_v32 = vmul.f32 %v3520_v19, %v2418_v25  ;;  %v2641_v58 = vadd.f32 %v2638_v18, %v2628_v59  ;;  %v5487_v12 = vsel %vm475_vm3, %v6207_v61, %v2317_v2  ;;  %v2735_v59 = vstv %s5435_s12  ;;  %v5514_v18 = vld [vmem:[#allocation2 + $0x40] sm:$0x3f]  ;;  %s6015_s12 = sld [smem:[#allocation3 + $0x7f]] }
 0x2e6   : > { %v2018_v41 = vpop.permute.xlu1 %2017  ;;  %v2020_v44 = vpop.permute.xlu0 %2019  ;;  %6447 = vst [vmem:[#allocation14_spill] sm:$0xff] %v5470_v21  ;;  %6448 = vst [vmem:[#allocation80_spill] sm:$0xff] %v5476_v49  ;;  %v5490_v45 = vmul.f32 %v5122_v8, %v2426_v20  ;;  %v5502_v16 = vmul.f32 %v3520_v19, %v2426_v20  ;;  %v2629_v53 = vmul.f32 %v5038_v34, %v5420_v46  ;;  %v2444_v6 = vrot.slane %v2437_v17, 6 }
 0x2e7   : > { %v5425_v13 = vadd.f32 %v2018_v41, %v1986_v50  ;;  %v5427_v35 = vadd.f32 %v2020_v44, %v1987_v63  ;;  %6449 = vst [vmem:[#allocation29_spill] sm:$0xff] %v5478_v32  ;;  %6450 = vst [vmem:[#allocation68_spill] sm:$0xff] %v5487_v12  ;;  %v5493_v50 = vmul.f32 %v5142_v38, %v2426_v20  ;;  %v2453_v63 = vstv %s5417_s8  ;;  %v5498_v41 = vld [vmem:[#allocation2 + $0x28] sm:$0x3f]  ;;  %v5500_v44 = vld [vmem:[#allocation2 + $0x10] sm:$0x3f] }
 0x2e8   : > { %6451 = vst [vmem:[#allocation23_spill] sm:$0xff] %v5490_v45  ;;  %6453 = vst [vmem:[#allocation47_spill] sm:$0xff] %v5502_v16  ;;  %v2657_v25 = vadd.f32 %v2654_v9, %v2641_v58  ;;  %v2639_v23 = vmul.f32 %v5076_v7, %v5423_v57  ;;  %v5520_v20 = vmul.f32 %v5142_v38, %v2453_v63  ;;  %v2632_v16 = vstv %s5452_s16  ;;  %s5987_s8 = sld [smem:[#allocation3 + $0x5c]]  ;;  %s6019_s16 = sld [smem:[#allocation3 + $0x8e]] }
 0x2e9   : > { %6441 = vst [vmem:[#allocation58_spill] sm:$0xff] %v5425_v13  ;;  %6442 = vst [vmem:[#allocation59_spill] sm:$0xff] %v5427_v35  ;;  %v5522_v9 = vmul.f32 %v3520_v19, %v2453_v63  ;;  %v2655_v58 = vmul.f32 %v5142_v38, %v5433_v27  ;;  %v5531_v61 = vsel %vm475_vm3, %v2317_v2, %v2319_v56  ;;  %v6456_v45 = vrot.slane %v5470_v21, 6 }
 0x2ea   : > { %v2022_v28 = vpop.permute.xlu1 %2021  ;;  %v5443_v42 = vpop.permute.xlu0 %2191  ;;  %6452 = vst [vmem:[#allocation43_spill] sm:$0xff] %v5493_v50  ;;  %6455 = vst [vmem:[#allocation27_spill] sm:$0xff] %v5531_v61  ;;  %v2630_v15 = vmul.f32 %v5420_v46, %v5500_v44  ;;  %v2640_v37 = vmul.f32 %v5423_v57, %v5498_v41  ;;  %v2668_v50 = vadd.f32 3.0, %v2657_v25  ;;  %v2642_v19 = vadd.f32 %v2639_v23, %v2629_v53 }
 0x2eb   : > { %v5454_v33 = vadd.f32 %v2022_v28, %v1988_v60  ;;  %v2442_v60 = vrot.slane %v2436_v54, 6  ;;  %v5517_v28 = vmul.f32 %v5122_v8, %v2453_v63  ;;  %v2645_v63 = vstv %s5462_s23 }
 0x2ec   : > { %v2656_v46 = vmul.f32 %v5433_v27, %v5514_v18  ;;  %v2661_v57 = vstv %s5473_s24  ;;  %v2658_v23 = vadd.f32 %v2655_v58, %v2642_v19  ;;  %v2646_v27 = vmul.f32 %v5066_v30, %v2645_v63 }
 0x2ed   : > { %6444 = vst [vmem:[#allocation24_spill] sm:$0xff] %v5454_v33  ;;  %6454 = vst [vmem:[#allocation71_spill] sm:$0xff] %v5517_v28  ;;  %v5540_v33 = vmul.f32 %v5033_v4, %v2735_v59  ;;  %v5545_v35 = vsel %vm475_vm3, %v6456_v45, %v2442_v60  ;;  %v5548_v2 = vsel %vm475_vm3, %v2442_v60, %v2444_v6  ;;  %v2671_v56 = vmax.f32 %v2668_v50, 0.0  ;;  %v5580_v50 = vld [vmem:[#allocation2] sm:$0xff] }
 0x2ee   : > { %v5480_v43 = vpop.permute.xlu1 %2193  ;;  %v5482_v14 = vpop.permute.xlu0 %2195  ;;  %6457 = vst [vmem:[#allocation17_spill] sm:$0xff] %v5545_v35  ;;  %6458 = vst [vmem:[#allocation36_spill] sm:$0xff] %v5548_v2  ;;  %v2643_v60 = vadd.f32 %v2640_v37, %v2630_v15  ;;  %v2633_v6 = vmul.f32 %v5033_v4, %v2632_v16  ;;  %v2725_v2 = vstv %s5496_s25  ;;  %v2662_v53 = vmul.f32 %v5122_v8, %v2661_v57  ;;  %v5574_v15 = vld [vmem:[#allocation2 + $0x8] sm:$0xff] }
 0x2ef   : > { %v2634_v58 = vmul.f32 %v5038_v34, %v2632_v16  ;;  %v2742_v19 = vrot.slane %v5540_v33, 6  ;;  %v2773_v21 = vstv %s5508_s26  ;;  %v2789_v13 = vstv %s5512_s27  ;;  %6460 = vst [vmem:[#allocation42_spill] sm:$0xff] %v5574_v15 }
 0x2f0   : > { %v2659_v25 = vadd.f32 %v2656_v46, %v2643_v60  ;;  %v2737_v4 = vmul.f32 %v5574_v15, %v2735_v59  ;;  %v5577_v37 = vadd.f32 3.0, %v2658_v23  ;;  %v2647_v32 = vmul.f32 %v5076_v7, %v2645_v63 }
 0x2f1   : > { %v2726_v10 = vmul.f32 %v5580_v50, %v2725_v2  ;;  %v2738_v34 = vmul.f32 %v2735_v59, %v5500_v44  ;;  %v6461_v46 = vrot.slane %v5520_v20, 6  ;;  %v6462_v60 = vrot.slane %v5517_v28, 6 }
 0x2f2   : > { %v5526_v54 = vpop.permute.xlu1 %2211  ;;  %v5528_v17 = vpop.permute.xlu0 %2213  ;;  %v2649_v23 = vadd.f32 %v2646_v27, %v2633_v6  ;;  %v2635_v36 = vmul.f32 %v2632_v16, %v5500_v44  ;;  %v2648_v31 = vmul.f32 %v2645_v63, %v5498_v41  ;;  %v2663_v12 = vmul.f32 %v5142_v38, %v2661_v57 }
 0x2f3   : > { %v5593_v61 = vsel %vm475_vm3, %v6462_v60, %v6461_v46  ;;  %v2750_v59 = vadd.f32 %v2742_v19, %v2726_v10  ;;  %v2774_v55 = vmul.f32 %v5066_v30, %v2773_v21  ;;  %v5600_v40 = vmul.f32 %v5066_v30, %v2789_v13 }
 0x2f4   : > { %6463 = vst [vmem:[#allocation45_spill] sm:$0xff] %v5593_v61  ;;  %v5602_v26 = vmin.f32 %v2671_v56, 6.0  ;;  %v5604_v28 = vadd.f32 3.0, %v2659_v25  ;;  %v2665_v46 = vadd.f32 %v2662_v53, %v2649_v23  ;;  %v2743_v60 = vrot.slane %v2737_v4, 6 }
 0x2f5   : > { %v2650_v63 = vadd.f32 %v2647_v32, %v2634_v58  ;;  %v2745_v6 = vrot.slane %v2738_v34, 6  ;;  %v5610_v10 = vstv %s5556_s20  ;;  %v2651_v56 = vadd.f32 %v2648_v31, %v2635_v36 }
 0x2f6   : > { %v5558_v45 = vpop.permute.xlu1 %2215  ;;  %v5560_v35 = vpop.permute.xlu0 %2236  ;;  %v2664_v25 = vmul.f32 %v2661_v57, %v5514_v18  ;;  %v2843_v53 = vstv %s5565_s22  ;;  %v5624_v4 = vmul.f32 %v5574_v15, %v5610_v10  ;;  %v2777_v32 = vadd.f32 %v2774_v55, %v2750_v59 }
 0x2f7   : > { %6459 = vst [vmem:[#allocation62_spill] sm:$0xff] %v5558_v45  ;;  %v2796_v58 = vrot.slane %v5600_v40, 6  ;;  %v2827_v34 = vstv %s5570_s28  ;;  %v2791_v23 = vmul.f32 %v5076_v7, %v2789_v13  ;;  %v2744_v61 = vsel %vm475_vm3, %v2742_v19, %v2743_v60 }
 0x2f8   : > { %v2792_v31 = vmul.f32 %v2789_v13, %v5498_v41  ;;  %v2755_v36 = vmul.f32 %v5580_v50, %v5610_v10  ;;  %v5634_v57 = vadd.f32 3.0, %v2665_v46  ;;  %v5637_v62 = vmul.f32 %v5122_v8, %v2843_v53 }
 0x2f9   : > { %v2727_v40 = vmul.f32 %v5574_v15, %v2725_v2  ;;  %v2746_v55 = vsel %vm475_vm3, %v2743_v60, %v2745_v6  ;;  %v2828_v13 = vmul.f32 %v5122_v8, %v2827_v34  ;;  %v2775_v19 = vmul.f32 %v5076_v7, %v2773_v21 }
 0x2fa   : > { %v5584_v33 = vpop.permute.xlu1 %2238  ;;  %v5586_v5 = vpop.permute.xlu0 %2240  ;;  %v2728_v46 = vmul.f32 %v2725_v2, %v5500_v44  ;;  %v6213_v24 = vrot.slane %v5624_v4, 6  ;;  %v2804_v49 = vadd.f32 %v2796_v58, %v2777_v32  ;;  %v2797_v51 = vrot.slane %v2791_v23, 6 }
 0x2fb   : > { %v2751_v3 = vadd.f32 %v2744_v61, %v2727_v40  ;;  %v2799_v6 = vrot.slane %v2792_v31, 6  ;;  %v2667_v45 = vadd.f32 %v2664_v25, %v2651_v56  ;;  %v2850_v8 = vrot.slane %v5637_v62, 6 }
 0x2fc   : > { %v2752_v60 = vadd.f32 %v2746_v55, %v2728_v46  ;;  %v5655_v7 = vstv %s5612_s30  ;;  %v2845_v61 = vmul.f32 %v5142_v38, %v2843_v53  ;;  %v2831_v56 = vadd.f32 %v2828_v13, %v2804_v49  ;;  %v5684_v46 = vld [vmem:[#allocation2 + $0x18] sm:$0xff] }
 0x2fd   : > { %v2778_v25 = vadd.f32 %v2775_v19, %v2751_v3  ;;  %v2800_v55 = vsel %vm475_vm3, %v2797_v51, %v2799_v6 }
 0x2fe   : > { %v5614_v27 = vpop.permute.xlu1 %2261  ;;  %v5616_v30 = vpop.permute.xlu0 %2263 }
 0x2ff   : > { %6464 = vst [vmem:[#allocation54_spill] sm:$0xff] %v5614_v27  ;;  %6465 = vst [vmem:[#allocation72_spill] sm:$0xff] %v5616_v30  ;;  %v2776_v30 = vmul.f32 %v2773_v21, %v5498_v41  ;;  %v2666_v27 = vadd.f32 %v2663_v12, %v2650_v63  ;;  %v5665_v21 = vstv %s5620_s3  ;;  %v5672_v63 = vld [vmem:[#allocation2 + $0x20] sm:$0xff] }
 0x300   : > { %6470 = vst [vmem:[#allocation85_spill] sm:$0xff] %v5672_v63  ;;  %v5676_v62 = vmul.f32 %v5672_v63, %v5655_v7  ;;  %v2782_v3 = vmul.f32 %v5684_v46, %v5665_v21  ;;  %v2783_v13 = vmul.f32 %v5672_v63, %v5665_v21  ;;  %v2830_v63 = vmul.f32 %v2827_v34, %v5514_v18 }
 0x301   : > { %v2779_v40 = vadd.f32 %v2776_v30, %v2752_v60  ;;  %v2697_v30 = vadd.f32 3.0, %v2666_v27  ;;  %v2846_v60 = vmul.f32 %v2843_v53, %v5514_v18  ;;  %v2699_v27 = vmax.f32 %v5634_v57, 0.0 }
 0x302   : > { %v5641_v59 = vpop.permute.xlu1 %2265  ;;  %v5643_v16 = vpop.permute.xlu0 %2335 }
 0x303   : > { %6466 = vst [vmem:[#allocation28_spill] sm:$0xff] %v5641_v59  ;;  %6467 = vst [vmem:[#allocation37_spill] sm:$0xff] %v5643_v16  ;;  %v5651_v59 = vstv %s5606_s29  ;;  %v2761_v16 = vrot.slane %v2755_v36, 6  ;;  %v2798_v36 = vsel %vm475_vm3, %v2796_v58, %v2797_v51  ;;  %v2698_v51 = vadd.f32 3.0, %v2667_v45 }
 0x304   : > { %v2731_v23 = vmul.f32 %v5580_v50, %v5651_v59  ;;  %v2732_v31 = vmul.f32 %v5574_v15, %v5651_v59 }
 0x305   : > { %v2763_v12 = vsel %vm475_vm3, %v2761_v16, %v6213_v24  ;;  %v2809_v24 = vmul.f32 %v5684_v46, %v5655_v7  ;;  %v2701_v57 = vmax.f32 %v2698_v51, 0.0 }
 0x306   : > { %v5659_v2 = vpop.permute.xlu1 %2337  ;;  %v5661_v32 = vpop.permute.xlu0 %2339  ;;  %v2770_v49 = vadd.f32 %v2763_v12, %v2732_v31  ;;  %v2851_v12 = vrot.slane %v2845_v61, 6  ;;  %v2806_v31 = vadd.f32 %v2800_v55, %v2779_v40  ;;  %v6475_v61 = vrot.slane %v5676_v62, 6 }
 0x307   : > { %6468 = vst [vmem:[#allocation66_spill] sm:$0xff] %v5659_v2  ;;  %6469 = vst [vmem:[#allocation16_spill] sm:$0xff] %v5661_v32  ;;  %v2769_v32 = vadd.f32 %v2761_v16, %v2731_v23  ;;  %v2858_v16 = vadd.f32 %v2850_v8, %v2831_v56  ;;  %v2805_v23 = vadd.f32 %v2798_v36, %v2778_v25  ;;  %v2815_v15 = vrot.slane %v2809_v24, 6 }
 0x308   : > { %v2829_v2 = vmul.f32 %v5142_v38, %v2827_v34  ;;  %v2786_v53 = vadd.f32 %v2783_v13, %v2770_v49  ;;  %v2853_v25 = vrot.slane %v2846_v60, 6  ;;  %v5711_v36 = vstv %s5667_s4  ;;  %v5721_v49 = vld [vmem:[#allocation2 + $0x30] sm:$0xff] }
 0x309   : > { %v2785_v45 = vadd.f32 %v2782_v3, %v2769_v32  ;;  %v2817_v24 = vsel %vm475_vm3, %v2815_v15, %v6475_v61  ;;  %v2700_v34 = vmax.f32 %v2697_v30, 0.0  ;;  %v2880_v32 = vadd.f32 3.0, %v2858_v16  ;;  %6476 = vst [vmem:[#allocation64_spill] sm:$0xff] %v5721_v49 }
 0x30a   : > { %v5692_v19 = vpop.permute.xlu1 %2355  ;;  %v5694_v58 = vpop.permute.xlu0 %2357  ;;  %v2832_v40 = vadd.f32 %v2829_v2, %v2805_v23  ;;  %v2852_v55 = vsel %vm475_vm3, %v2850_v8, %v2851_v12  ;;  %v2833_v3 = vadd.f32 %v2830_v63, %v2806_v31  ;;  %v2836_v61 = vmul.f32 %v5721_v49, %v5711_v36 }
 0x30b   : > { %6471 = vst [vmem:[#allocation46_spill] sm:$0xff] %v5692_v19  ;;  %6472 = vst [vmem:[#allocation51_spill] sm:$0xff] %v5694_v58  ;;  %v2757_v19 = vmul.f32 %v5610_v10, %v5500_v44  ;;  %v5704_v58 = vstv %s5657_s15  ;;  %v2837_v30 = vmul.f32 %v5142_v38, %v5711_v36  ;;  %v6479_v8 = vmax.f32 %v5577_v37, 0.0 }
 0x30c   : > { %v5718_v10 = vmul.f32 %v5142_v38, %v5704_v58  ;;  %v2863_v13 = vmul.f32 %v5721_v49, %v5704_v58  ;;  %v6480_v16 = vmax.f32 %v5604_v28, 0.0  ;;  %v2702_v31 = vmin.f32 %v2699_v27, 6.0 }
 0x30d   : > { %v2764_v60 = vrot.slane %v2757_v19, 6  ;;  %v2675_v63 = vmin.f32 %v6479_v8, 6.0  ;;  %v2854_v19 = vsel %vm475_vm3, %v2851_v12, %v2853_v25  ;;  %v2859_v38 = vadd.f32 %v2852_v55, %v2832_v40 }
 0x30e   : > { %v5706_v6 = vpop.permute.xlu1 %2359  ;;  %v5708_v56 = vpop.permute.xlu0 %2380  ;;  %v2676_v23 = vmin.f32 %v6480_v16, 6.0  ;;  %v2811_v28 = vmul.f32 %v5655_v7, %v5498_v41  ;;  %v2860_v12 = vadd.f32 %v2854_v19, %v2833_v3  ;;  %v2733_v27 = vmul.f32 %v5651_v59, %v5500_v44 }
 0x30f   : > { %6473 = vst [vmem:[#allocation38_spill] sm:$0xff] %v5706_v6  ;;  %6474 = vst [vmem:[#allocation20_spill] sm:$0xff] %v5708_v56  ;;  %v2823_v6 = vadd.f32 %v2815_v15, %v2785_v45  ;;  %v2824_v56 = vadd.f32 %v2817_v24, %v2786_v53  ;;  %v2870_v15 = vrot.slane %v5718_v10, 6  ;;  %v2703_v45 = vmin.f32 %v2700_v34, 6.0 }
 0x310   : > { %v2883_v53 = vmax.f32 %v2880_v32, 0.0  ;;  %v2704_v24 = vmin.f32 %v2701_v57, 6.0  ;;  %v5759_v57 = vmul.f32 0.16666667, %v5602_v26  ;;  %v5761_v7 = vmul.f32 0.16666667, %v2675_v63 }
 0x311   : > { %v2839_v25 = vadd.f32 %v2836_v61, %v2823_v6  ;;  %v2840_v8 = vadd.f32 %v2837_v30, %v2824_v56  ;;  %v5763_v32 = vmul.f32 0.16666667, %v2676_v23  ;;  %v5768_v56 = vadd.f32 3.0, %v2859_v38 }
 0x312   : > { %v5729_v51 = vpop.permute.xlu1 %2382  ;;  %v5731_v2 = vpop.permute.xlu0 %2384  ;;  %v2886_v59 = vmin.f32 %v2883_v53, 6.0  ;;  %v2784_v55 = vmul.f32 %v5665_v21, %v5498_v41  ;;  %v6484_v26 = vrot.slane %v5522_v9, 6  ;;  %v6485_v3 = vrot.slane %v5520_v20, 6 }
 0x313   : > { %6477 = vst [vmem:[#allocation75_spill] sm:$0xff] %v5729_v51  ;;  %6478 = vst [vmem:[#allocation50_spill] sm:$0xff] %v5731_v2  ;;  %v2869_v51 = vrot.slane %v2863_v13, 6  ;;  %v6481_v2 = vrot.slane %v5624_v4, 6  ;;  %v5785_v61 = vmul.f32 0.16666667, %v2703_v45  ;;  %v2200_v9 = vadd.f32 %v5443_v42, %v5347_v48 }
 0x314   : > { %6482 = vst [vmem:[#allocation84_spill] sm:$0xff] %v5763_v32  ;;  %6483 = vst [vmem:[#allocation86_spill] sm:$0xff] %v5768_v56  ;;  %v5781_v13 = vsel %vm475_vm3, %v6485_v3, %v6484_v26  ;;  %v2818_v30 = vrot.slane %v2811_v28, 6  ;;  %v5789_v21 = vadd.f32 3.0, %v2860_v12  ;;  %v2201_v20 = vadd.f32 %v5480_v43, %v5352_v11 }
 0x315   : > { %v2765_v37 = vsel %vm475_vm3, %v6481_v2, %v2764_v60  ;;  %v2871_v6 = vsel %vm475_vm3, %v2869_v51, %v2870_v15  ;;  %v5783_v60 = vmul.f32 0.16666667, %v2702_v31  ;;  %6487 = vst [vmem:[#allocation63_spill] sm:$0xff] %v5785_v61  ;;  %v5787_v2 = vmul.f32 0.16666667, %v2704_v24  ;;  %v6523_v61 = vld [vmem:[#allocation44_spill] sm:$0xff] }
 0x316   : > { %v5754_v34 = vpop.permute.xlu1 %2405  ;;  %v5756_v4 = vpop.permute.xlu0 %2407  ;;  %v2771_v40 = vadd.f32 %v2765_v37, %v2733_v27  ;;  %6489 = vst [vmem:[#allocation67_spill] sm:$0xff] %v5789_v21  ;;  %v2877_v63 = vadd.f32 %v2869_v51, %v2839_v25  ;;  %v2878_v16 = vadd.f32 %v2871_v6, %v2840_v8  ;;  %v2865_v31 = vmul.f32 %v5704_v58, %v5514_v18 }
 0x317   : > { %6486 = vst [vmem:[#allocation55_spill] sm:$0xff] %v5783_v60  ;;  %6488 = vst [vmem:[#allocation81_spill] sm:$0xff] %v5787_v2  ;;  %v5802_v45 = vstv %s5739_s5  ;;  %v2202_v53 = vadd.f32 %v5482_v14, %v5354_v29  ;;  %v5806_v51 = vmul.f32 0.16666667, %v2886_v59  ;;  %v2245_v11 = vadd.f32 %v5560_v35, %v2200_v9  ;;  %v6495_v9 = vld [vmem:[#allocation62_spill] sm:$0xff]  ;;  %v6526_v60 = vld [vmem:[#allocation69_spill] sm:$0xff] }
 0x318   : > { %v2787_v42 = vadd.f32 %v2784_v55, %v2771_v40  ;;  %v2246_v43 = vadd.f32 %v5584_v33, %v2201_v20  ;;  %v6491_v38 = vrot.slane %v5676_v62, 6  ;;  %v5815_v24 = vstv %s5746_s6 }
 0x319   : > { %6490 = vst [vmem:[#allocation39_spill] sm:$0xff] %v5806_v51  ;;  %v2247_v29 = vadd.f32 %v5586_v5, %v2202_v53  ;;  %v5819_v37 = vadd.f32 3.0, %v2877_v63  ;;  %v5823_v28 = vmul.f32 %v5580_v50, %v5802_v45  ;;  %v5829_v62 = vadd.f32 3.0, %v2878_v16 }
 0x31a   : > { %v5795_v23 = vpop.permute.xlu1 %2409  ;;  %v5797_v19 = vpop.permute.xlu0 %2479  ;;  %v2819_v58 = vsel %vm475_vm3, %v6491_v38, %v2818_v30  ;;  %v2838_v12 = vmul.f32 %v5711_v36, %v5514_v18  ;;  %v2872_v25 = vrot.slane %v2865_v31, 6  ;;  %v5834_v5 = vstv %s5752_s18  ;;  %v6501_v38 = vld [vmem:[#allocation34_spill] sm:$0xff] }
 0x31b   : > { %6492 = vst [vmem:[#allocation21_spill] sm:$0xff] %v5819_v37  ;;  %6493 = vst [vmem:[#allocation61_spill] sm:$0xff] %v5829_v62  ;;  %v2825_v8 = vadd.f32 %v2819_v58, %v2787_v42  ;;  %v2937_v27 = vstv %s5750_s19  ;;  %v5838_v6 = vstv %s5772_s21  ;;  %v5842_v59 = vmul.f32 %v5684_v46, %v5815_v24  ;;  %v6516_v62 = vld [vmem:[#allocation50_spill] sm:$0xff] }
 0x31c   : > { %v2220_v40 = vadd.f32 %v5526_v54, %v5364_v0  ;;  %v2278_v55 = vadd.f32 %v5371_v47, %v2245_v11  ;;  %v2279_v26 = vadd.f32 %v5379_v39, %v2246_v43  ;;  %v5849_v3 = vstv %s5774_s0  ;;  %v6496_v54 = vld [vmem:[#allocation54_spill] sm:$0xff]  ;;  %v6500_v11 = vld [vmem:[#allocation28_spill] sm:$0xff] }
 0x31d   : > { %v2221_v36 = vadd.f32 %v5528_v17, %v5400_v52  ;;  %v2280_v30 = vadd.f32 %v5382_v1, %v2247_v29  ;;  %v6218_v63 = vrot.slane %v5823_v28, 6  ;;  %v5857_v16 = vmul.f32 %v5721_v49, %v5834_v5  ;;  %v6498_v17 = vld [vmem:[#allocation72_spill] sm:$0xff] }
 0x31e   : > { %v5825_v35 = vpop.permute.xlu1 %2481  ;;  %v5827_v33 = vpop.permute.xlu0 %2483  ;;  %v2222_v0 = vadd.f32 %v6495_v9, %v5445_v22  ;;  %v2270_v47 = vadd.f32 %v6496_v54, %v2220_v40  ;;  %v5869_v52 = vsel %vm475_vm3, %v2870_v15, %v2872_v25  ;;  %v2938_v1 = vmul.f32 %v5580_v50, %v2937_v27  ;;  %v6503_v15 = vld [vmem:[#allocation35_spill] sm:$0xff]  ;;  %v6504_v40 = vld [vmem:[#allocation80_spill] sm:$0xff]  ;;  %v6505_v9 = vld [vmem:[#allocation42_spill] sm:$0xff] }
 0x31f   : > { %6494 = vst [vmem:[#allocation48_spill] sm:$0xff] %v5857_v16  ;;  %6497 = vst [vmem:[#allocation56_spill] sm:$0xff] %v5869_v52  ;;  %v2271_v31 = vadd.f32 %v6498_v17, %v2221_v36  ;;  %v5873_v53 = vadd.f32 %v2838_v12, %v2825_v8  ;;  %v2986_v22 = vmul.f32 %v5684_v46, %v5838_v6  ;;  %v6502_v10 = vrot.slane %v6501_v38, 6  ;;  %v6506_v17 = vld [vmem:[#allocation19_spill] sm:$0xff]  ;;  %v6508_v38 = vld [vmem:[#allocation66_spill] sm:$0xff] }
 0x320   : > { %v5879_v42 = vmul.f32 %v5721_v49, %v5849_v3  ;;  %v2272_v43 = vadd.f32 %v6500_v11, %v2222_v0  ;;  %v2306_v29 = vadd.f32 %v6503_v15, %v2279_v26  ;;  %v2307_v36 = vadd.f32 %v6504_v40, %v2280_v30  ;;  %v6507_v0 = vld [vmem:[#allocation37_spill] sm:$0xff]  ;;  %v6509_v15 = vld [vmem:[#allocation79_spill] sm:$0xff]  ;;  %v6510_v40 = vld [vmem:[#allocation16_spill] sm:$0xff] }
 0x321   : > { %6499 = vst [vmem:[#allocation74_spill] sm:$0xff] %v5873_v53  ;;  %v2305_v58 = vadd.f32 %v6502_v10, %v2278_v55  ;;  %v2962_v12 = vadd.f32 %v6218_v63, %v2938_v1  ;;  %v5891_v54 = vmul.f32 %v6505_v9, %v2937_v27  ;;  %v2286_v14 = vadd.f32 %v6506_v17, %v2270_v47  ;;  %v6511_v8 = vld [vmem:[#allocation26_spill] sm:$0xff]  ;;  %v6512_v63 = vld [vmem:[#allocation85_spill] sm:$0xff]  ;;  %v6527_v49 = vld [vmem:[#allocation31_spill] sm:$0xff] }
 0x322   : > { %v5862_v20 = vpop.permute.xlu1 %2499  ;;  %v5864_v39 = vpop.permute.xlu0 %2501  ;;  %v2345_v55 = vadd.f32 %v6508_v38, %v2306_v29  ;;  %v5900_v30 = vmul.f32 %v6505_v9, %v5802_v45  ;;  %v2287_v1 = vadd.f32 %v6509_v15, %v2271_v31  ;;  %v2346_v48 = vadd.f32 %v6510_v40, %v2307_v36  ;;  %v6514_v29 = vld [vmem:[#allocation20_spill] sm:$0xff]  ;;  %v6515_v38 = vld [vmem:[#allocation75_spill] sm:$0xff]  ;;  %v6528_v16 = vld [vmem:[#allocation29_spill] sm:$0xff] }
 0x323   : > { %v2344_v11 = vadd.f32 %v6507_v0, %v2305_v58  ;;  %v5907_v47 = vmul.f32 %v6512_v63, %v5838_v6  ;;  %v6513_v58 = vld [vmem:[#allocation57_spill] sm:$0xff]  ;;  %v5914_v2 = vmul.f32 %v6512_v63, %v5815_v24  ;;  %v5917_v36 = vadd.f32 %v2986_v22, %v2962_v12  ;;  %v6529_v53 = vld [vmem:[#allocation51_spill] sm:$0xff] }
 0x324   : > { %v2288_v17 = vadd.f32 %v6513_v58, %v2272_v43  ;;  %v2390_v51 = vadd.f32 %v6515_v38, %v2345_v55  ;;  %v2391_v31 = vadd.f32 %v6516_v62, %v2346_v48  ;;  %v6519_v43 = vld [vmem:[#allocation25_spill] sm:$0xff]  ;;  %v5933_v48 = vmul.f32 %v2937_v27, %v5500_v44  ;;  %v6521_v62 = vld [vmem:[#allocation68_spill] sm:$0xff] }
 0x325   : > { %v2389_v0 = vadd.f32 %v6514_v29, %v2344_v11  ;;  %v6520_v40 = vrot.slane %v6519_v43, 6  ;;  %v2325_v22 = vadd.f32 %v6521_v62, %v2287_v1  ;;  %v6522_v12 = vld [vmem:[#allocation13_spill] sm:$0xff]  ;;  %v6524_v43 = vld [vmem:[#allocation46_spill] sm:$0xff] }
 0x326   : > { %v5896_v10 = vpop.permute.xlu1 %2503  ;;  %v2043_v26 = vpop.permute.xlu0 %2042  ;;  %v2424_v32 = vadd.f32 %v6528_v16, %v2391_v31  ;;  %v6532_v16 = vld [vmem:[#allocation14_spill] sm:$0xff]  ;;  %v6534_v31 = vld [vmem:[#allocation17_spill] sm:$0xff] }
 0x327   : > { %v2051_v25 = vadd.f32 %v2043_v26, %v6511_v8  ;;  %v5919_v8 = vld [vmem:[#allocation2 + $0x38] sm:$0xff]  ;;  %v2324_v11 = vadd.f32 %v6520_v40, %v2286_v14  ;;  %v6525_v40 = vld [vmem:[#allocation27_spill] sm:$0xff]  ;;  %v2422_v29 = vadd.f32 %v6526_v60, %v2389_v0  ;;  %v2365_v1 = vadd.f32 %v6529_v53, %v2325_v22  ;;  %v6531_v0 = vld [vmem:[#allocation58_spill] sm:$0xff] }
 0x328   : > { %6517 = vst [vmem:[#allocation33_spill] sm:$0xff] %v5919_v8  ;;  %v5923_v26 = vmul.f32 %v5919_v8, %v5849_v3  ;;  %v5930_v38 = vmul.f32 %v5919_v8, %v5834_v5  ;;  %v2326_v56 = vadd.f32 %v6525_v40, %v2288_v17  ;;  %v6535_v22 = vld [vmem:[#allocation59_spill] sm:$0xff] }
 0x329   : > { %v2079_v15 = vadd.f32 3.0, %v2051_v25  ;;  %v2364_v14 = vadd.f32 %v6524_v43, %v2324_v11  ;;  %v3009_v11 = vrot.slane %v5914_v2, 6 }
 0x32a   : > { %6518 = vst [vmem:[#allocation18_spill] sm:$0xff] %v5923_v26  ;;  %v2045_v58 = vpop.permute.xlu1 %2044  ;;  %v2047_v55 = vpop.permute.xlu0 %2046  ;;  %v2423_v26 = vadd.f32 %v6527_v49, %v2390_v51  ;;  %v2415_v51 = vadd.f32 %v5756_v4, %v2365_v1  ;;  %v3063_v2 = vrot.slane %v5930_v38, 6 }
 0x32b   : > { %v2082_v25 = vmax.f32 %v2079_v15, 0.0  ;;  %v2052_v37 = vadd.f32 %v2045_v58, %v6522_v12  ;;  %v2053_v21 = vadd.f32 %v2047_v55, %v6523_v61  ;;  %v6530_v15 = vld [vmem:[#allocation38_spill] sm:$0xff]  ;;  %v2414_v58 = vadd.f32 %v5754_v34, %v2364_v14 }
 0x32c   : > { %v2366_v62 = vadd.f32 %v6530_v15, %v2326_v56  ;;  %v2450_v53 = vadd.f32 %v6534_v31, %v2423_v26  ;;  %v6541_v31 = vld [vmem:[#allocation71_spill] sm:$0xff] }
 0x32d   : > { %v2085_v8 = vmin.f32 %v2082_v25, 6.0  ;;  %v2080_v27 = vadd.f32 3.0, %v2052_v37  ;;  %v2081_v52 = vadd.f32 3.0, %v2053_v21  ;;  %v6533_v37 = vrot.slane %v6532_v16, 6  ;;  %v6536_v25 = vld [vmem:[#allocation36_spill] sm:$0xff] }
 0x32e   : > { %v2068_v61 = vpop.permute.xlu1 %2067  ;;  %v2070_v55 = vpop.permute.xlu0 %2069  ;;  %v2451_v34 = vadd.f32 %v6536_v25, %v2424_v32  ;;  %v6538_v32 = vld [vmem:[#allocation24_spill] sm:$0xff] }
 0x32f   : > { %v2088_v17 = vmul.f32 0.16666667, %v2085_v8  ;;  %v2083_v12 = vmax.f32 %v2080_v27, 0.0  ;;  %v2084_v60 = vmax.f32 %v2081_v52, 0.0  ;;  %v2076_v49 = vadd.f32 %v2068_v61, %v6531_v0  ;;  %v6537_v8 = vld [vmem:[#allocation23_spill] sm:$0xff] }
 0x330   : > { %v2449_v21 = vadd.f32 %v6533_v37, %v2422_v29  ;;  %v2077_v56 = vadd.f32 %v2070_v55, %v6535_v22  ;;  %v2430_v52 = vadd.f32 %v6537_v8, %v2414_v58  ;;  %v2416_v27 = vadd.f32 %v5795_v23, %v2366_v62  ;;  %v6540_v37 = vld [vmem:[#allocation47_spill] sm:$0xff] }
 0x331   : > { %v2086_v43 = vmin.f32 %v2083_v12, 6.0  ;;  %v2087_v14 = vmin.f32 %v2084_v60, 6.0  ;;  %v2107_v40 = vadd.f32 3.0, %v2076_v49  ;;  %2094 = vrot.lane.b32.xlu0 %v2088_v17, %s3618_s17  ;;  %v6539_v60 = vld [vmem:[#allocation43_spill] sm:$0xff]  ;;  %v2950_v58 = vmul.f32 %v5802_v45, %v5500_v44 }
 0x332   : > { %v2488_v4 = vadd.f32 %v5797_v19, %v2449_v21  ;;  %v2108_v1 = vadd.f32 3.0, %v2077_v56  ;;  %v2072_v15 = vpop.permute.xlu1 %2071  ;;  %v2525_v29 = vpop.permute.xlu0 %2524  ;;  %v2431_v0 = vadd.f32 %v6539_v60, %v2415_v51  ;;  %v2489_v23 = vadd.f32 %v5825_v35, %v2450_v53 }
 0x333   : > { %v2089_v26 = vmul.f32 0.16666667, %v2086_v43  ;;  %v2090_v61 = vmul.f32 0.16666667, %v2087_v14  ;;  %v2110_v55 = vmax.f32 %v2107_v40, 0.0  ;;  %v2078_v12 = vadd.f32 %v2072_v15, %v6538_v32 }
 0x334   : > { %v2111_v49 = vmax.f32 %v2108_v1, 0.0  ;;  %v2533_v17 = vadd.f32 %v2525_v29, %v2488_v4  ;;  %v2490_v19 = vadd.f32 %v5827_v33, %v2451_v34  ;;  %v2432_v21 = vadd.f32 %v6540_v37, %v2416_v27  ;;  %v6543_v33 = vld [vmem:[#allocation45_spill] sm:$0xff] }
 0x335   : > { %v2113_v62 = vmin.f32 %v2110_v55, 6.0  ;;  %v2109_v16 = vadd.f32 3.0, %v2078_v12  ;;  %2096 = vrot.lane.b32.xlu1 %v2089_v26, %s3618_s17  ;;  %2098 = vrot.lane.b32.xlu0 %v2090_v61, %s3618_s17  ;;  %v6542_v22 = vrot.slane %v6541_v31, 6  ;;  %v2469_v34 = vadd.f32 %v6543_v33, %v2431_v0 }
 0x336   : > { %v2114_v56 = vmin.f32 %v2111_v49, 6.0  ;;  %v2561_v25 = vadd.f32 3.0, %v2533_v17  ;;  %v2527_v43 = vpop.permute.xlu1 %2526  ;;  %v2529_v14 = vpop.permute.xlu0 %2528  ;;  %v2957_v1 = vrot.slane %v2950_v58, 6  ;;  %v2470_v61 = vadd.f32 %v5781_v13, %v2432_v21 }
 0x337   : > { %v2468_v51 = vadd.f32 %v6542_v22, %v2430_v52  ;;  %v2116_v45 = vmul.f32 0.16666667, %v2113_v62  ;;  %v2112_v40 = vmax.f32 %v2109_v16, 0.0  ;;  %v2534_v35 = vadd.f32 %v2527_v43, %v2489_v23 }
 0x338   : > { %v2535_v53 = vadd.f32 %v2529_v14, %v2490_v19  ;;  %v2117_v8 = vmul.f32 0.16666667, %v2114_v56  ;;  %v2564_v4 = vmax.f32 %v2561_v25, 0.0  ;;  %v2509_v52 = vadd.f32 %v5864_v39, %v2469_v34 }
 0x339   : > { %v2508_v15 = vadd.f32 %v5862_v20, %v2468_v51  ;;  %v2115_v27 = vmin.f32 %v2112_v40, 6.0  ;;  %v2562_v29 = vadd.f32 3.0, %v2534_v35  ;;  %2122 = vrot.lane.b32.xlu1 %v2116_v45, %s3618_s17  ;;  %v2966_v60 = vstv %s5958_s1 }
 0x33a   : > { %v2563_v26 = vadd.f32 3.0, %v2535_v53  ;;  %v2567_v55 = vmin.f32 %v2564_v4, 6.0  ;;  %2124 = vrot.lane.b32.xlu0 %v2117_v8, %s3618_s17  ;;  %v2550_v32 = vpop.permute.xlu1 %2549  ;;  %v2552_v12 = vpop.permute.xlu0 %2551  ;;  %v6544_v19 = vrot.slane %v5900_v30, 6  ;;  %v6545_v39 = vrot.slane %v5823_v28, 6 }
 0x33b   : > { %v2118_v0 = vmul.f32 0.16666667, %v2115_v27  ;;  %v2565_v49 = vmax.f32 %v2562_v29, 0.0  ;;  %v2558_v17 = vadd.f32 %v2550_v32, %v2508_v15  ;;  %v2559_v23 = vadd.f32 %v2552_v12, %v2509_v52 }
 0x33c   : > { %v2566_v20 = vmax.f32 %v2563_v26, 0.0  ;;  %v2570_v58 = vmul.f32 0.16666667, %v2567_v55  ;;  %v2956_v13 = vsel %vm475_vm3, %v6545_v39, %v6544_v19  ;;  %v2968_v62 = vmul.f32 %v6505_v9, %v2966_v60 }
 0x33d   : > { %v2510_v16 = vadd.f32 %v5896_v10, %v2470_v61  ;;  %v2568_v37 = vmin.f32 %v2565_v49, 6.0  ;;  %v2589_v31 = vadd.f32 3.0, %v2558_v17  ;;  %2126 = vrot.lane.b32.xlu1 %v2118_v0, %s3618_s17  ;;  %v2590_v22 = vadd.f32 3.0, %v2559_v23 }
 0x33e   : > { %v2569_v21 = vmin.f32 %v2566_v20, 6.0  ;;  %2576 = vrot.lane.b32.xlu0 %v2570_v58, %s3618_s17  ;;  %v2554_v51 = vpop.permute.xlu1 %2553  ;;  %v6546_v28 = vmov %v6544_v19  ;;  %v3004_v25 = vmul.f32 %v5815_v24, %v5498_v41  ;;  %v2967_v43 = vmul.f32 %v5580_v50, %v2966_v60 }
 0x33f   : > { %v2958_v56 = vsel %vm475_vm3, %v6546_v28, %v2957_v1  ;;  %v2571_v14 = vmul.f32 0.16666667, %v2568_v37  ;;  %v2592_v45 = vmax.f32 %v2589_v31, 0.0  ;;  %v2560_v40 = vadd.f32 %v2554_v51, %v2510_v16 }
 0x340   : > { %v2572_v10 = vmul.f32 0.16666667, %v2569_v21  ;;  %v2593_v35 = vmax.f32 %v2590_v22, 0.0  ;;  %v6547_v53 = vrot.slane %v5842_v59, 6  ;;  %v2988_v30 = vmul.f32 %v5838_v6, %v5498_v41 }
 0x341   : > { %v2969_v34 = vmul.f32 %v2966_v60, %v5500_v44  ;;  %v2595_v8 = vmin.f32 %v2592_v45, 6.0  ;;  %v2591_v24 = vadd.f32 3.0, %v2560_v40  ;;  %2578 = vrot.lane.b32.xlu1 %v2571_v14, %s3618_s17  ;;  %v2963_v4 = vadd.f32 %v2956_v13, %v5891_v54  ;;  %v6551_v40 = vld [vmem:[#allocation33_spill] sm:$0xff] }
 0x342   : > { %v3016_v33 = vadd.f32 %v6547_v53, %v5917_v36  ;;  %v2974_v1 = vrot.slane %v2968_v62, 6  ;;  %v2596_v15 = vmin.f32 %v2593_v35, 6.0  ;;  %2580 = vrot.lane.b32.xlu0 %v2572_v10, %s3618_s17  ;;  %v2964_v27 = vadd.f32 %v2958_v56, %v5933_v48  ;;  %v6552_v35 = vld [vmem:[#allocation84_spill] sm:$0xff] }
 0x343   : > { %v3011_v36 = vrot.slane %v3004_v25, 6  ;;  %v2942_v29 = vstv %s5977_s11  ;;  %v2598_v26 = vmul.f32 0.16666667, %v2595_v8  ;;  %v2594_v6 = vmax.f32 %v2591_v24, 0.0 }
 0x344   : > { %v6548_v52 = vmov %v6547_v53  ;;  %v2973_v55 = vrot.slane %v2967_v43, 6  ;;  %v2599_v54 = vmul.f32 0.16666667, %v2596_v15  ;;  %v2993_v32 = vstv %s5985_s7  ;;  %v6553_v53 = vld [vmem:[#allocation48_spill] sm:$0xff] }
 0x345   : > { %v3010_v61 = vsel %vm475_vm3, %v6548_v52, %v3009_v11  ;;  %v3020_v12 = vstv %s5987_s8  ;;  %v2976_v60 = vrot.slane %v2969_v34, 6  ;;  %v2597_v48 = vmin.f32 %v2594_v6, 6.0  ;;  %2604 = vrot.lane.b32.xlu1 %v2598_v26, %s3618_s17 }
 0x346   : > { %v2943_v0 = vmul.f32 %v5580_v50, %v2942_v29  ;;  %v2975_v49 = vsel %vm475_vm3, %v2973_v55, %v2974_v1  ;;  %v3022_v59 = vmul.f32 %v6512_v63, %v3020_v12  ;;  %2606 = vrot.lane.b32.xlu0 %v2599_v54, %s3618_s17  ;;  %v2990_v20 = vadd.f32 %v5907_v47, %v2963_v4 }
 0x347   : > { %v2991_v17 = vadd.f32 %v2988_v30, %v2964_v27  ;;  %v3012_v58 = vsel %vm475_vm3, %v3009_v11, %v3011_v36  ;;  %v2944_v23 = vmul.f32 %v6505_v9, %v2942_v29  ;;  %v2600_v19 = vmul.f32 0.16666667, %v2597_v48  ;;  %v6555_v30 = vld [vmem:[#allocation18_spill] sm:$0xff] }
 0x348   : > { %v2981_v39 = vadd.f32 %v2973_v55, %v2943_v0  ;;  %v2994_v13 = vmul.f32 %v5684_v46, %v2993_v32  ;;  %v3021_v50 = vmul.f32 %v5684_v46, %v3020_v12  ;;  %v2995_v16 = vmul.f32 %v6512_v63, %v2993_v32  ;;  %v6559_v55 = vld [vmem:[#allocation86_spill] sm:$0xff] }
 0x349   : > { %v2982_v62 = vadd.f32 %v2975_v49, %v2944_v23  ;;  %v2977_v37 = vsel %vm475_vm3, %v2974_v1, %v2976_v60  ;;  %v3023_v47 = vmul.f32 %v3020_v12, %v5498_v41  ;;  %2608 = vrot.lane.b32.xlu1 %v2600_v19, %s3618_s17  ;;  %v3058_v9 = vmul.f32 %v5834_v5, %v5514_v18  ;;  %v6557_v1 = vld [vmem:[#allocation64_spill] sm:$0xff]  ;;  %v6561_v12 = vld [vmem:[#allocation67_spill] sm:$0xff] }
 0x34a   : > { %v3028_v11 = vrot.slane %v3022_v59, 6  ;;  %v2945_v21 = vmul.f32 %v2942_v29, %v5500_v44  ;;  %2683 = vrot.lane.b32.xlu0 %v5759_v57, %s6420_s9  ;;  %v3043_v46 = vadd.f32 %v5879_v42, %v3016_v33  ;;  %v3017_v63 = vadd.f32 %v3010_v61, %v2990_v20  ;;  %v6549_v44 = vld [vmem:[#allocation74_spill] sm:$0xff]  ;;  %v6550_v57 = vld [vmem:[#allocation56_spill] sm:$0xff]  ;;  %v6558_v61 = vld [vmem:[#allocation55_spill] sm:$0xff] }
 0x34b   : > { %v3018_v31 = vadd.f32 %v3012_v58, %v2991_v17  ;;  %v3042_v22 = vmul.f32 %v5849_v3, %v5514_v18  ;;  %v2997_v51 = vadd.f32 %v2994_v13, %v2981_v39  ;;  %v3027_v28 = vrot.slane %v3021_v50, 6  ;;  %v6563_v59 = vld [vmem:[#allocation63_spill] sm:$0xff]  ;;  %v6564_v20 = vld [vmem:[#allocation21_spill] sm:$0xff] }
 0x34c   : > { %v2983_v56 = vadd.f32 %v2977_v37, %v2945_v21  ;;  %v2996_v38 = vmul.f32 %v2993_v32, %v5498_v41  ;;  %v3047_v25 = vstv %s6015_s12  ;;  %v3074_v5 = vstv %s6019_s16  ;;  %v6565_v58 = vld [vmem:[#allocation61_spill] sm:$0xff] }
 0x34d   : > { %v2998_v43 = vadd.f32 %v2995_v16, %v2982_v62  ;;  %v3030_v14 = vrot.slane %v3023_v47, 6  ;;  %2685 = vrot.lane.b32.xlu1 %v5761_v7, %s6420_s9  ;;  %v2879_v42 = vadd.f32 %v6550_v57, %v6549_v44  ;;  %v3065_v10 = vrot.slane %v3058_v9, 6 }
 0x34e   : > { %v3029_v45 = vsel %vm475_vm3, %v3027_v28, %v3028_v11  ;;  %v3076_v3 = vmul.f32 %v6551_v40, %v3074_v5  ;;  %2687 = vrot.lane.b32.xlu0 %v6552_v35, %s6420_s9  ;;  %v6554_v41 = vrot.slane %v6553_v53, 6  ;;  %v3044_v34 = vadd.f32 %v6555_v30, %v3017_v63 }
 0x34f   : > { %v3045_v24 = vadd.f32 %v3042_v22, %v3018_v31  ;;  %v3035_v4 = vadd.f32 %v3027_v28, %v2997_v51  ;;  %v3048_v15 = vmul.f32 %v6557_v1, %v3047_v25  ;;  %v3075_v27 = vmul.f32 %v6557_v1, %v3074_v5 }
 0x350   : > { %v3070_v33 = vadd.f32 %v6554_v41, %v3043_v46  ;;  %v6556_v8 = vmov %v6554_v41  ;;  %v2999_v36 = vadd.f32 %v2996_v38, %v2983_v56  ;;  %v3036_v29 = vadd.f32 %v3029_v45, %v2998_v43  ;;  %v6567_v46 = vld [vmem:[#allocation39_spill] sm:$0xff] }
 0x351   : > { %v3064_v7 = vsel %vm475_vm3, %v6556_v8, %v3063_v2  ;;  %v3049_v26 = vmul.f32 %v6551_v40, %v3047_v25  ;;  %v3031_v6 = vsel %vm475_vm3, %v3028_v11, %v3030_v14  ;;  %v3077_v52 = vmul.f32 %v3074_v5, %v5514_v18  ;;  %2711 = vrot.lane.b32.xlu1 %v6558_v61, %s6420_s9 }
 0x352   : > { %v6560_v54 = vmax.f32 %v6559_v55, 0.0  ;;  %v6562_v60 = vmax.f32 %v6561_v12, 0.0  ;;  %v3066_v0 = vsel %vm475_vm3, %v3063_v2, %v3065_v10  ;;  %v3082_v49 = vrot.slane %v3076_v3, 6  ;;  %2713 = vrot.lane.b32.xlu0 %v6563_v59, %s6420_s9  ;;  %v6566_v2 = vld [vmem:[#allocation81_spill] sm:$0xff] }
 0x353   : > { %v2911_v17 = vmax.f32 %v6564_v20, 0.0  ;;  %v2912_v23 = vmax.f32 %v6565_v58, 0.0  ;;  %v2910_v19 = vadd.f32 3.0, %v2879_v42  ;;  %v3071_v39 = vadd.f32 %v3064_v7, %v3044_v34 }
 0x354   : > { %v2887_v32 = vmin.f32 %v6560_v54, 6.0  ;;  %v2888_v48 = vmin.f32 %v6562_v60, 6.0  ;;  %v3051_v13 = vadd.f32 %v3048_v15, %v3035_v4  ;;  %v3081_v50 = vrot.slane %v3075_v27, 6 }
 0x355   : > { %v3037_v62 = vadd.f32 %v3031_v6, %v2999_v36  ;;  %v3050_v16 = vmul.f32 %v3047_v25, %v5514_v18  ;;  %v3092_v37 = vadd.f32 3.0, %v3070_v33  ;;  %v3072_v47 = vadd.f32 %v3066_v0, %v3045_v24  ;;  %2715 = vrot.lane.b32.xlu1 %v6566_v2, %s6420_s9 }
 0x356   : > { %v3052_v9 = vadd.f32 %v3049_v26, %v3036_v29  ;;  %v3084_v11 = vrot.slane %v3077_v52, 6  ;;  %v3083_v21 = vsel %vm475_vm3, %v3081_v50, %v3082_v49  ;;  %2895 = vrot.lane.b32.xlu0 %v6567_v46, %s6420_s9  ;;  %v2890_v63 = vmul.f32 0.16666667, %v2887_v32 }
 0x357   : > { %v2891_v31 = vmul.f32 0.16666667, %v2888_v48  ;;  %v2914_v22 = vmin.f32 %v2911_v17, 6.0  ;;  %v2915_v51 = vmin.f32 %v2912_v23, 6.0  ;;  %v2913_v28 = vmax.f32 %v2910_v19, 0.0 }
 0x358   : > { %v3093_v56 = vadd.f32 3.0, %v3071_v39  ;;  %v3089_v38 = vadd.f32 %v3081_v50, %v3051_v13  ;;  %v3053_v18 = vadd.f32 %v3050_v16, %v3037_v62  ;;  %v3095_v25 = vmax.f32 %v3092_v37, 0.0 }
 0x359   : > { %v3094_v5 = vadd.f32 3.0, %v3072_v47  ;;  %v3090_v43 = vadd.f32 %v3083_v21, %v3052_v9  ;;  %v3085_v14 = vsel %vm475_vm3, %v3082_v49, %v3084_v11  ;;  %2897 = vrot.lane.b32.xlu1 %v2890_v63, %s6420_s9  ;;  %v2917_v44 = vmul.f32 0.16666667, %v2914_v22 }
 0x35a   : > { %2899 = vrot.lane.b32.xlu0 %v2891_v31, %s6420_s9  ;;  %v2916_v57 = vmin.f32 %v2913_v28, 6.0  ;;  %v3096_v42 = vmax.f32 %v3093_v56, 0.0  ;;  %v3120_v10 = vadd.f32 3.0, %v3089_v38  ;;  %v3091_v45 = vadd.f32 %v3085_v14, %v3053_v18 }
 0x35b   : > { %v2918_v40 = vmul.f32 0.16666667, %v2915_v51  ;;  %v3098_v3 = vmin.f32 %v3095_v25, 6.0  ;;  %v3097_v35 = vmax.f32 %v3094_v5, 0.0  ;;  %v3121_v53 = vadd.f32 3.0, %v3090_v43 }
 0x35c   : > { %v2919_v41 = vmul.f32 0.16666667, %v2916_v57  ;;  %v3099_v33 = vmin.f32 %v3096_v42, 6.0  ;;  %v3123_v30 = vmax.f32 %v3120_v10, 0.0  ;;  %v3122_v34 = vadd.f32 3.0, %v3091_v45 }
 0x35d   : > { %2923 = vrot.lane.b32.xlu1 %v2917_v44, %s6420_s9  ;;  %v3101_v8 = vmul.f32 0.16666667, %v3098_v3  ;;  %v3100_v7 = vmin.f32 %v3097_v35, 6.0  ;;  %v3124_v24 = vmax.f32 %v3121_v53, 0.0 }
 0x35e   : > { %2925 = vrot.lane.b32.xlu0 %v2918_v40, %s6420_s9  ;;  %v3102_v4 = vmul.f32 0.16666667, %v3099_v33  ;;  %v3126_v1 = vmin.f32 %v3123_v30, 6.0  ;;  %v3125_v15 = vmax.f32 %v3122_v34, 0.0 }
 0x35f   : > { %v3103_v27 = vmul.f32 0.16666667, %v3100_v7  ;;  %v3127_v36 = vmin.f32 %v3124_v24, 6.0 }
 0x360   : > { %v3129_v29 = vmul.f32 0.16666667, %v3126_v1  ;;  %v3128_v26 = vmin.f32 %v3125_v15, 6.0 }
 0x361   : > { %2927 = vrot.lane.b32.xlu1 %v2919_v41, %s6420_s9  ;;  %v3130_v6 = vmul.f32 0.16666667, %v3127_v36 }
 0x362   : > { %3107 = vrot.lane.b32.xlu0 %v3101_v8, %s6420_s9  ;;  %v3131_v52 = vmul.f32 0.16666667, %v3128_v26 }
 0x365   : > { %3109 = vrot.lane.b32.xlu1 %v3102_v4, %s6420_s9 }
 0x366   : > { %3111 = vrot.lane.b32.xlu0 %v3103_v27, %s6420_s9 }
 0x369   : > { %3135 = vrot.lane.b32.xlu1 %v3129_v29, %s6420_s9 }
 0x36a   : > { %3137 = vrot.lane.b32.xlu0 %v3130_v6, %s6420_s9 }
 0x36d   : > { %3139 = vrot.lane.b32.xlu1 %v3131_v52, %s6420_s9 }
 0x3a3   : > { %v2095_v61 = vpop.permute.xlu0 %2094 }
 0x3a4   : > { %3356 = vst.msk [vmem:[%s4891_s13 + $0x5d] sm:$0xf8] %vm909_vm7, %v2095_v61 }
 0x3a7   : > { %v2097_v55 = vpop.permute.xlu1 %2096  ;;  %v2099_v54 = vpop.permute.xlu0 %2098 }
 0x3a8   : > { %3357 = vst.msk [vmem:[%s4891_s13 + $0x65] sm:$0xff] %vm425_vm5, %v2097_v55 }
 0x3a9   : > { %3358 = vst.msk [vmem:[%s4891_s13 + $0x6d] sm:$0x1f] %vm912_vm9, %v2099_v54 }
 0x3ab   : > { %v2123_v32 = vpop.permute.xlu1 %2122 }
 0x3ac   : > { %3359 = vst.msk [vmem:[%s4891_s13 + $0x135] sm:$0xf8] %vm909_vm7, %v2123_v32  ;;  %v2125_v12 = vpop.permute.xlu0 %2124 }
 0x3ad   : > { %3360 = vst.msk [vmem:[%s4891_s13 + $0x13d] sm:$0xff] %vm425_vm5, %v2125_v12 }
 0x3af   : > { %v2127_v60 = vpop.permute.xlu1 %2126 }
 0x3b0   : > { %3361 = vst.msk [vmem:[%s4891_s13 + $0x145] sm:$0x1f] %vm912_vm9, %v2127_v60  ;;  %v2577_v48 = vpop.permute.xlu0 %2576 }
 0x3b1   : > { %3385 = vst.msk [vmem:[%s4891_s13 + $0xa4] sm:$0xf0] %vm1393_vm8, %v2577_v48 }
 0x3b3   : > { %v2579_v0 = vpop.permute.xlu1 %2578 }
 0x3b4   : > { %3386 = vst.msk [vmem:[%s4891_s13 + $0xac] sm:$0xff] %vm425_vm5, %v2579_v0  ;;  %v2581_v49 = vpop.permute.xlu0 %2580 }
 0x3b5   : > { %3387 = vst.msk [vmem:[%s4891_s13 + $0xb4] sm:$0x3f] %vm1396_vm10, %v2581_v49 }
 0x3b7   : > { %v2605_v59 = vpop.permute.xlu1 %2604 }
 0x3b8   : > { %3388 = vst.msk [vmem:[%s4891_s13 + $0x17c] sm:$0xf0] %vm1393_vm8, %v2605_v59  ;;  %v2607_v20 = vpop.permute.xlu0 %2606 }
 0x3b9   : > { %3389 = vst.msk [vmem:[%s4891_s13 + $0x184] sm:$0xff] %vm425_vm5, %v2607_v20 }
 0x3bb   : > { %v2609_v17 = vpop.permute.xlu1 %2608 }
 0x3bc   : > { %3390 = vst.msk [vmem:[%s4891_s13 + $0x18c] sm:$0x3f] %vm1396_vm10, %v2609_v17  ;;  %v2684_v58 = vpop.permute.xlu0 %2683 }
 0x3bd   : > { %3397 = vst.msk [vmem:[%s4891_s13 + $0x2e] sm:$0xfc] %vm423_vm4, %v2684_v58 }
 0x3bf   : > { %v2686_v23 = vpop.permute.xlu1 %2685 }
 0x3c0   : > { %3398 = vst.msk [vmem:[%s4891_s13 + $0x36] sm:$0xff] %vm425_vm5, %v2686_v23  ;;  %v2688_v19 = vpop.permute.xlu0 %2687 }
 0x3c1   : > { %3399 = vst.msk [vmem:[%s4891_s13 + $0x3e] sm:$0xf] %vm427_vm6, %v2688_v19 }
 0x3c3   : > { %v2712_v39 = vpop.permute.xlu1 %2711 }
 0x3c4   : > { %3400 = vst.msk [vmem:[%s4891_s13 + $0x106] sm:$0xfc] %vm423_vm4, %v2712_v39  ;;  %v2714_v13 = vpop.permute.xlu0 %2713 }
 0x3c5   : > { %3401 = vst.msk [vmem:[%s4891_s13 + $0x10e] sm:$0xff] %vm425_vm5, %v2714_v13 }
 0x3c7   : > { %v2716_v50 = vpop.permute.xlu1 %2715 }
 0x3c8   : > { %3402 = vst.msk [vmem:[%s4891_s13 + $0x116] sm:$0xf] %vm427_vm6, %v2716_v50  ;;  %v2896_v62 = vpop.permute.xlu0 %2895 }
 0x3c9   : > { %3415 = vst.msk [vmem:[%s4891_s13 + $0x75] sm:$0xf8] %vm909_vm7, %v2896_v62 }
 0x3cb   : > { %v2898_v16 = vpop.permute.xlu1 %2897 }
 0x3cc   : > { %3416 = vst.msk [vmem:[%s4891_s13 + $0x7d] sm:$0xff] %vm425_vm5, %v2898_v16  ;;  %v2900_v37 = vpop.permute.xlu0 %2899 }
 0x3cd   : > { %3417 = vst.msk [vmem:[%s4891_s13 + $0x85] sm:$0x1f] %vm912_vm9, %v2900_v37 }
 0x3cf   : > { %v2924_v47 = vpop.permute.xlu1 %2923 }
 0x3d0   : > { %3418 = vst.msk [vmem:[%s4891_s13 + $0x14d] sm:$0xf8] %vm909_vm7, %v2924_v47  ;;  %v2926_v9 = vpop.permute.xlu0 %2925 }
 0x3d1   : > { %3419 = vst.msk [vmem:[%s4891_s13 + $0x155] sm:$0xff] %vm425_vm5, %v2926_v9 }
 0x3d3   : > { %v2928_v11 = vpop.permute.xlu1 %2927 }
 0x3d4   : > { %3420 = vst.msk [vmem:[%s4891_s13 + $0x15d] sm:$0x1f] %vm912_vm9, %v2928_v11  ;;  %v3108_v2 = vpop.permute.xlu0 %3107 }
 0x3d5   : > { %3433 = vst.msk [vmem:[%s4891_s13 + $0xbc] sm:$0xf0] %vm1393_vm8, %v3108_v2 }
 0x3d7   : > { %v3110_v21 = vpop.permute.xlu1 %3109 }
 0x3d8   : > { %3434 = vst.msk [vmem:[%s4891_s13 + $0xc4] sm:$0xff] %vm425_vm5, %v3110_v21  ;;  %v3112_v46 = vpop.permute.xlu0 %3111 }
 0x3d9   : > { %3435 = vst.msk [vmem:[%s4891_s13 + $0xcc] sm:$0x3f] %vm1396_vm10, %v3112_v46 }
 0x3db   : > { %v3136_v63 = vpop.permute.xlu1 %3135 }
 0x3dc   : > { %3436 = vst.msk [vmem:[%s4891_s13 + $0x194] sm:$0xf0] %vm1393_vm8, %v3136_v63  ;;  %v3138_v31 = vpop.permute.xlu0 %3137 }
 0x3dd   : > { %3437 = vst.msk [vmem:[%s4891_s13 + $0x19c] sm:$0xff] %vm425_vm5, %v3138_v31 }
 0x3df   : > { %v3140_v22 = vpop.permute.xlu1 %3139 }
 0x3e0   : > { %3438 = vst.msk [vmem:[%s4891_s13 + $0x1a4] sm:$0x3f] %vm1396_vm10, %v3140_v22 }
 0x3e1 PF: > { %s6568_s17 = sld [smem:[#allocation9_spill]]  ;;  %s6569_s11 = sld [smem:[#allocation10_spill]] }
 0x3e2   : > { %p13_p9 = scmp.ge.s32.totalorder %s3656_s14, 4   ;;  %s6570_s9 = smov %s3600_s10 }
 0x3e3   : > { %s6572_s12 = smov %s3656_s14 }
 0x3e4   :  { %15 = sbr.rel (!%p13_p9) target bundleno = 7 (0x7), region = 94 }
 0x3e7   : > { %s6571_s10 = smov %s6568_s17 }
 0x3eb   :  { %3169 = vsyncpa [#allocation4], 1 }
 0x3ec   :  { %3171 = vsyncpa [#allocation4 + $0x1], 1 }
 0x3ed   :  { %3172 = vsyncpa [#allocation5], 1 }
 0x3ee   :  { %3174 = vsyncpa [#allocation5 + $0x1], 1 }

</bundles_post_ra>
